<compile_context>
chip_gen: v7x
topology: tpu7x:2x2x1
jax: 0.10.0
libtpu: 0.0.40
codegen_flags: <defaults>
</compile_context>

<pallas_src>
from functools import partial

import numpy as np
import jax
import jax.numpy as jnp
from jax.experimental import pallas as pl
from jax.experimental.pallas import tpu as pltpu

POOL_K = 5
POOL_S = 3
CONV_OUT = 128


def _pool_matrix(h, w, h_out, w_out):
    """(P, H*W) averaging matrix for AvgPool2d(5, stride=3)."""
    pm = np.zeros((h_out * w_out, h * w), np.float32)
    inv = 1.0 / float(POOL_K * POOL_K)
    for oh in range(h_out):
        for ow in range(w_out):
            pidx = oh * w_out + ow
            for kh in range(POOL_K):
                for kw in range(POOL_K):
                    sidx = (oh * POOL_S + kh) * w + (ow * POOL_S + kw)
                    pm[pidx, sidx] = inv
    return pm


def _inception_aux_kernel(x_ref, pm_ref, wc_ref, shift_ref,
                          w1_ref, b1_ref, w2_ref, b2_ref,
                          o_ref, feat_pn_ref, feat_ref, *, n, p):
    """Fused AvgPool + 1x1Conv/BN/ReLU + Linear/ReLU/[Dropout]/Linear.

    x_ref:      (N*S, C)        channels-last input rows (S = H*W)
    pm_ref:     (P*N, N*S)      block-diagonal pooling matrix (rows p-major)
    wc_ref:     (C, 128)        1x1 conv weight with BN scale folded
    shift_ref:  (1, 128)        folded BN shift (includes conv bias)
    w1_ref:     (2048, 1024)    fc1 weight (bf16), rows permuted to p*128+c order
    b1_ref:     (1, 1024)
    w2_ref:     (1024, NCpad)   fc2 weight (bf16), padded to 128-lane multiple
    b2_ref:     (1, NCpad)
    o_ref:      (N, NCpad)
    feat_pn_ref:(P*N, 128)      VMEM scratch
    feat_ref:   (N, 2048)       VMEM scratch (flattened features)
    """
    # ---- Stage 1: AvgPool (pooling-matrix matmul) + 1x1 conv + folded BN + ReLU
    pooled = jnp.dot(pm_ref[...], x_ref[...],
                     preferred_element_type=jnp.float32)          # (P*N, C)
    feat = jnp.dot(pooled, wc_ref[...],
                   preferred_element_type=jnp.float32)            # (P*N, 128)
    feat_pn_ref[...] = jnp.maximum(feat + shift_ref[...], 0.0)

    # ---- Lay the P position blocks out along the lane axis -> (N, P*128).
    # Flatten order is p*128 + c; fc1 weights were row-permuted at setup to match
    # PyTorch's channel-major x.view(N, -1).
    for pp in range(p):
        feat_ref[:, pp * CONV_OUT:(pp + 1) * CONV_OUT] = \
            feat_pn_ref[pp * n:(pp + 1) * n, :]

    # ---- Stage 2: Linear(2048,1024) + ReLU + Dropout(eval=id) + Linear(1024,NCpad)
    h = jnp.dot(feat_ref[...].astype(jnp.bfloat16), w1_ref[...],
                preferred_element_type=jnp.float32) + b1_ref[...]
    h = jnp.maximum(h, 0.0)
    # Dropout(p=0.7): identity in eval mode.
    out = jnp.dot(h.astype(jnp.bfloat16), w2_ref[...],
                  preferred_element_type=jnp.float32) + b2_ref[...]
    o_ref[...] = out.astype(o_ref.dtype)


def inception_aux_forward(x, params):
    n, c, hh, ww = x.shape
    h_out = (hh - POOL_K) // POOL_S + 1
    w_out = (ww - POOL_K) // POOL_S + 1
    p = h_out * w_out
    s = hh * ww
    assert CONV_OUT * p == 2048, "flatten size must be 2048 to match nn.Linear(2048, 1024)"

    num_classes = params["fc2_w"].shape[0]
    nc_pad = ((num_classes + 127) // 128) * 128

    # ---------- host-side layout / folding (one-time, outside the kernel) ------
    # Channels-last input: rows = (batch, spatial), lanes = channels.
    x_flat = jnp.transpose(x, (0, 2, 3, 1)).reshape(n * s, c)

    # Block-diagonal pooling matrix; row order (p, n) -> p*N + n.
    pm = _pool_matrix(hh, ww, h_out, w_out)                                 # (P, S)
    pm_big = np.einsum("ps,ij->pijs", pm, np.eye(n, dtype=np.float32))
    pm_big = jnp.asarray(pm_big.reshape(p * n, n * s))                      # (P*N, N*S)

    # Fold BatchNorm (inference running stats) + conv bias into scale/shift.
    eps = 1e-5
    inv_std = 1.0 / jnp.sqrt(params["bn_var"] + eps)
    bn_scale = params["bn_gamma"] * inv_std                                 # (128,)
    wc = params["conv_w"].reshape(CONV_OUT, c).T * bn_scale[None, :]        # (C, 128)
    shift = ((params["conv_b"] - params["bn_mean"]) * bn_scale
             + params["bn_beta"]).reshape(1, CONV_OUT)

    # Fold the PyTorch channel-major flatten (index c*P + p) into fc1's weight
    # rows so the kernel-native (p*128 + c) flatten needs no transpose.
    w1t = params["fc1_w"].T.reshape(CONV_OUT, p, -1)                        # (128, P, 1024)
    w1 = jnp.transpose(w1t, (1, 0, 2)).reshape(p * CONV_OUT, -1)            # (2048, 1024)
    w1 = w1.astype(jnp.bfloat16)
    b1 = params["fc1_b"].reshape(1, -1)

    # fc2, zero-padded to a 128-lane multiple on the output dim.
    w2 = jnp.zeros((1024, nc_pad), jnp.float32).at[:, :num_classes].set(params["fc2_w"].T)
    w2 = w2.astype(jnp.bfloat16)
    b2 = jnp.zeros((1, nc_pad), jnp.float32).at[:, :num_classes].set(params["fc2_b"][None, :])

    out_pad = pl.pallas_call(
        partial(_inception_aux_kernel, n=n, p=p),
        out_shape=jax.ShapeDtypeStruct((n, nc_pad), jnp.float32),
        grid=(1,),
        in_specs=[
            pl.BlockSpec((n * s, c), lambda i: (0, 0)),
            pl.BlockSpec((p * n, n * s), lambda i: (0, 0)),
            pl.BlockSpec((c, CONV_OUT), lambda i: (0, 0)),
            pl.BlockSpec((1, CONV_OUT), lambda i: (0, 0)),
            pl.BlockSpec((p * CONV_OUT, 1024), lambda i: (0, 0)),
            pl.BlockSpec((1, 1024), lambda i: (0, 0)),
            pl.BlockSpec((1024, nc_pad), lambda i: (0, 0)),
            pl.BlockSpec((1, nc_pad), lambda i: (0, 0)),
        ],
        out_specs=pl.BlockSpec((n, nc_pad), lambda i: (0, 0)),
        scratch_shapes=[
            pltpu.VMEM((p * n, CONV_OUT), jnp.float32),
            pltpu.VMEM((n, p * CONV_OUT), jnp.float32),
        ],
        compiler_params=pltpu.CompilerParams(
            dimension_semantics=("arbitrary",),
            vmem_limit_bytes=32 * 1024 * 1024),
    )(x_flat, pm_big, wc, shift, w1, b1, w2, b2)

    return out_pad[:, :num_classes]


def _reference_forward(x, params):
    """Pure-JAX f32 reference matching the PyTorch module (eval mode)."""
    n, c, hh, ww = x.shape
    h_out = (hh - POOL_K) // POOL_S + 1
    w_out = (ww - POOL_K) // POOL_S + 1
    cols = []
    for oh in range(h_out):
        for ow in range(w_out):
            win = x[:, :, oh * POOL_S:oh * POOL_S + POOL_K,
                    ow * POOL_S:ow * POOL_S + POOL_K]
            cols.append(jnp.mean(win, axis=(2, 3)))
    pooled = jnp.stack(cols, axis=-1).reshape(n, c, h_out, w_out)
    wc = params["conv_w"].reshape(CONV_OUT, c)
    y = jnp.einsum("nchw,oc->nohw", pooled, wc) + params["conv_b"][None, :, None, None]
    inv_std = 1.0 / jnp.sqrt(params["bn_var"] + 1e-5)
    y = ((y - params["bn_mean"][None, :, None, None])
         * (params["bn_gamma"] * inv_std)[None, :, None, None]
         + params["bn_beta"][None, :, None, None])
    y = jnp.maximum(y, 0.0)
    feat = y.reshape(n, -1)                                   # channel-major flatten
    h1 = jnp.maximum(feat @ params["fc1_w"].T + params["fc1_b"][None, :], 0.0)
    return h1 @ params["fc2_w"].T + params["fc2_b"][None, :]


def make_params(key, in_channels, num_classes):
    ks = jax.random.split(key, 10)
    return {
        # ConvBlock: Conv2d(in_channels, 128, kernel_size=1) + BatchNorm2d(128)
        "conv_w": 0.1 * jax.random.normal(ks[0], (CONV_OUT, in_channels, 1, 1), jnp.float32),
        "conv_b": 0.1 * jax.random.normal(ks[1], (CONV_OUT,), jnp.float32),
        "bn_gamma": 1.0 + 0.1 * jax.random.normal(ks[2], (CONV_OUT,), jnp.float32),
        "bn_beta": 0.1 * jax.random.normal(ks[3], (CONV_OUT,), jnp.float32),
        "bn_mean": 0.1 * jax.random.normal(ks[4], (CONV_OUT,), jnp.float32),
        "bn_var": 1.0 + 0.1 * jnp.abs(jax.random.normal(ks[5], (CONV_OUT,), jnp.float32)),
        # fc: Linear(2048, 1024) + ReLU + Dropout + Linear(1024, num_classes)
        "fc1_w": 0.02 * jax.random.normal(ks[6], (1024, 2048), jnp.float32),
        "fc1_b": 0.02 * jax.random.normal(ks[7], (1024,), jnp.float32),
        "fc2_w": 0.02 * jax.random.normal(ks[8], (num_classes, 1024), jnp.float32),
        "fc2_b": 0.02 * jax.random.normal(ks[9], (num_classes,), jnp.float32),
    }


if __name__ == "__main__":
    # Input spatial must be 14x14 so that AvgPool(5, stride=3) -> 4x4 and
    # 128*4*4 == 2048 matches nn.Linear(2048, 1024) in the module spec.
    batch, in_channels, spatial, num_classes = 2, 8, 14, 10

    key = jax.random.PRNGKey(0)
    kx, kp = jax.random.split(key)
    x = jax.random.normal(kx, (batch, in_channels, spatial, spatial), jnp.float32)
    params = make_params(kp, in_channels, num_classes)

    out = inception_aux_forward(x, params)
    out = jax.block_until_ready(out)
    assert out.shape == (batch, num_classes)

    # Sanity check against a pure-JAX f32 reference (kernel uses bf16 FC weights,
    # so tolerance is loose but well above the observed bf16 error).
    ref = jax.block_until_ready(_reference_forward(x, params))
    np.testing.assert_allclose(np.asarray(out), np.asarray(ref), atol=2e-2, rtol=2e-2)

    print("KERNEL_OK")
</pallas_src>

<mosaic_0001>
module attributes {stable_mosaic.version = 11 : i64} {
  func.func @_inception_aux_kernel(%arg0: i32, %arg1: memref<392x8xf32, #tpu.memory_space<vmem>>, %arg2: memref<32x392xf32, #tpu.memory_space<vmem>>, %arg3: memref<8x128xf32, #tpu.memory_space<vmem>>, %arg4: memref<1x128xf32, #tpu.memory_space<vmem>>, %arg5: memref<2048x1024xbf16, #tpu.memory_space<vmem>>, %arg6: memref<1x1024xf32, #tpu.memory_space<vmem>>, %arg7: memref<1024x128xbf16, #tpu.memory_space<vmem>>, %arg8: memref<1x128xf32, #tpu.memory_space<vmem>>, %arg9: memref<2x128xf32, #tpu.memory_space<vmem>>, %arg10: memref<32x128xf32, #tpu.memory_space<vmem>>, %arg11: memref<2x2048xf32, #tpu.memory_space<vmem>>) attributes {dimension_semantics = [#tpu.dimension_semantics<arbitrary>], iteration_bounds = array<i64: 1>, scalar_prefetch = 0 : i64, scratch_operands = 2 : i64, tpu.core_type = #tpu.core_type<tc>, window_params = [{pipeline_mode = #tpu.pipeline_mode<synchronous>, transform_indices = @transform_0, window_bounds = array<i64: 392, 8>}, {pipeline_mode = #tpu.pipeline_mode<synchronous>, transform_indices = @transform_1, window_bounds = array<i64: 32, 392>}, {pipeline_mode = #tpu.pipeline_mode<synchronous>, transform_indices = @transform_2, window_bounds = array<i64: 8, 128>}, {pipeline_mode = #tpu.pipeline_mode<synchronous>, transform_indices = @transform_3, window_bounds = array<i64: 1, 128>}, {pipeline_mode = #tpu.pipeline_mode<synchronous>, transform_indices = @transform_4, window_bounds = array<i64: 2048, 1024>}, {pipeline_mode = #tpu.pipeline_mode<synchronous>, transform_indices = @transform_5, window_bounds = array<i64: 1, 1024>}, {pipeline_mode = #tpu.pipeline_mode<synchronous>, transform_indices = @transform_6, window_bounds = array<i64: 1024, 128>}, {pipeline_mode = #tpu.pipeline_mode<synchronous>, transform_indices = @transform_7, window_bounds = array<i64: 1, 128>}, {pipeline_mode = #tpu.pipeline_mode<synchronous>, transform_indices = @transform_8, window_bounds = array<i64: 2, 128>}]} {
    %c0 = arith.constant 0 : index
    %c0_0 = arith.constant 0 : index
    %0 = vector.load %arg2[%c0, %c0_0] : memref<32x392xf32, #tpu.memory_space<vmem>>, vector<32x392xf32>
    %c0_1 = arith.constant 0 : index
    %c0_2 = arith.constant 0 : index
    %1 = vector.load %arg1[%c0_1, %c0_2] : memref<392x8xf32, #tpu.memory_space<vmem>>, vector<392x8xf32>
    %cst = arith.constant dense<0.000000e+00> : vector<32x8xf32>
    %2 = tpu.matmul %0, %1, %cst {dimension_numbers = #tpu.dot_dimension_numbers<[1], [0], [0], [1], [0, 0, 1, 1], [], []>} : vector<32x392xf32>, vector<392x8xf32>, vector<32x8xf32> -> vector<32x8xf32>
    %c0_3 = arith.constant 0 : index
    %c0_4 = arith.constant 0 : index
    %3 = vector.load %arg3[%c0_3, %c0_4] : memref<8x128xf32, #tpu.memory_space<vmem>>, vector<8x128xf32>
    %cst_5 = arith.constant dense<0.000000e+00> : vector<32x128xf32>
    %4 = tpu.matmul %2, %3, %cst_5 {dimension_numbers = #tpu.dot_dimension_numbers<[1], [0], [0], [1], [0, 0, 1, 1], [], []>} : vector<32x8xf32>, vector<8x128xf32>, vector<32x128xf32> -> vector<32x128xf32>
    %c0_6 = arith.constant 0 : index
    %c0_7 = arith.constant 0 : index
    %5 = vector.load %arg4[%c0_6, %c0_7] : memref<1x128xf32, #tpu.memory_space<vmem>>, vector<1x128xf32>
    %6 = vector.broadcast %5 : vector<1x128xf32> to vector<32x128xf32>
    %7 = arith.addf %4, %6 : vector<32x128xf32>
    %cst_8 = arith.constant 0.000000e+00 : f32
    %8 = vector.broadcast %cst_8 : f32 to vector<32x128xf32>
    %9 = arith.maximumf %7, %8 : vector<32x128xf32>
    %c0_9 = arith.constant 0 : index
    %c0_10 = arith.constant 0 : index
    %10 = vector.load %arg10[%c0_9, %c0_10] : memref<32x128xf32, #tpu.memory_space<vmem>>, vector<32x128xf32>
    tpu.vector_store %arg10[%c0_9, %c0_10], %9 {strides = array<i32>} : memref<32x128xf32, #tpu.memory_space<vmem>>, vector<32x128xf32>,
    %c0_11 = arith.constant 0 : index
    %c0_12 = arith.constant 0 : index
    %11 = vector.load %arg10[%c0_11, %c0_12] : memref<32x128xf32, #tpu.memory_space<vmem>>, vector<2x128xf32>
    %c0_13 = arith.constant 0 : index
    %c0_14 = arith.constant 0 : index
    %12 = vector.load %arg11[%c0_13, %c0_14] : memref<2x2048xf32, #tpu.memory_space<vmem>>, vector<2x128xf32>
    tpu.vector_store %arg11[%c0_13, %c0_14], %11 {strides = array<i32>} : memref<2x2048xf32, #tpu.memory_space<vmem>>, vector<2x128xf32>,
    %c2 = arith.constant 2 : index
    %c0_15 = arith.constant 0 : index
    %13 = vector.load %arg10[%c2, %c0_15] : memref<32x128xf32, #tpu.memory_space<vmem>>, vector<2x128xf32>
    %c0_16 = arith.constant 0 : index
    %c128 = arith.constant 128 : index
    %14 = vector.load %arg11[%c0_16, %c128] : memref<2x2048xf32, #tpu.memory_space<vmem>>, vector<2x128xf32>
    tpu.vector_store %arg11[%c0_16, %c128], %13 {strides = array<i32>} : memref<2x2048xf32, #tpu.memory_space<vmem>>, vector<2x128xf32>,
    %c4 = arith.constant 4 : index
    %c0_17 = arith.constant 0 : index
    %15 = vector.load %arg10[%c4, %c0_17] : memref<32x128xf32, #tpu.memory_space<vmem>>, vector<2x128xf32>
    %c0_18 = arith.constant 0 : index
    %c256 = arith.constant 256 : index
    %16 = vector.load %arg11[%c0_18, %c256] : memref<2x2048xf32, #tpu.memory_space<vmem>>, vector<2x128xf32>
    tpu.vector_store %arg11[%c0_18, %c256], %15 {strides = array<i32>} : memref<2x2048xf32, #tpu.memory_space<vmem>>, vector<2x128xf32>,
    %c6 = arith.constant 6 : index
    %c0_19 = arith.constant 0 : index
    %17 = vector.load %arg10[%c6, %c0_19] : memref<32x128xf32, #tpu.memory_space<vmem>>, vector<2x128xf32>
    %c0_20 = arith.constant 0 : index
    %c384 = arith.constant 384 : index
    %18 = vector.load %arg11[%c0_20, %c384] : memref<2x2048xf32, #tpu.memory_space<vmem>>, vector<2x128xf32>
    tpu.vector_store %arg11[%c0_20, %c384], %17 {strides = array<i32>} : memref<2x2048xf32, #tpu.memory_space<vmem>>, vector<2x128xf32>,
    %c8 = arith.constant 8 : index
    %c0_21 = arith.constant 0 : index
    %19 = vector.load %arg10[%c8, %c0_21] : memref<32x128xf32, #tpu.memory_space<vmem>>, vector<2x128xf32>
    %c0_22 = arith.constant 0 : index
    %c512 = arith.constant 512 : index
    %20 = vector.load %arg11[%c0_22, %c512] : memref<2x2048xf32, #tpu.memory_space<vmem>>, vector<2x128xf32>
    tpu.vector_store %arg11[%c0_22, %c512], %19 {strides = array<i32>} : memref<2x2048xf32, #tpu.memory_space<vmem>>, vector<2x128xf32>,
    %c10 = arith.constant 10 : index
    %c0_23 = arith.constant 0 : index
    %21 = vector.load %arg10[%c10, %c0_23] : memref<32x128xf32, #tpu.memory_space<vmem>>, vector<2x128xf32>
    %c0_24 = arith.constant 0 : index
    %c640 = arith.constant 640 : index
    %22 = vector.load %arg11[%c0_24, %c640] : memref<2x2048xf32, #tpu.memory_space<vmem>>, vector<2x128xf32>
    tpu.vector_store %arg11[%c0_24, %c640], %21 {strides = array<i32>} : memref<2x2048xf32, #tpu.memory_space<vmem>>, vector<2x128xf32>,
    %c12 = arith.constant 12 : index
    %c0_25 = arith.constant 0 : index
    %23 = vector.load %arg10[%c12, %c0_25] : memref<32x128xf32, #tpu.memory_space<vmem>>, vector<2x128xf32>
    %c0_26 = arith.constant 0 : index
    %c768 = arith.constant 768 : index
    %24 = vector.load %arg11[%c0_26, %c768] : memref<2x2048xf32, #tpu.memory_space<vmem>>, vector<2x128xf32>
    tpu.vector_store %arg11[%c0_26, %c768], %23 {strides = array<i32>} : memref<2x2048xf32, #tpu.memory_space<vmem>>, vector<2x128xf32>,
    %c14 = arith.constant 14 : index
    %c0_27 = arith.constant 0 : index
    %25 = vector.load %arg10[%c14, %c0_27] : memref<32x128xf32, #tpu.memory_space<vmem>>, vector<2x128xf32>
    %c0_28 = arith.constant 0 : index
    %c896 = arith.constant 896 : index
    %26 = vector.load %arg11[%c0_28, %c896] : memref<2x2048xf32, #tpu.memory_space<vmem>>, vector<2x128xf32>
    tpu.vector_store %arg11[%c0_28, %c896], %25 {strides = array<i32>} : memref<2x2048xf32, #tpu.memory_space<vmem>>, vector<2x128xf32>,
    %c16 = arith.constant 16 : index
    %c0_29 = arith.constant 0 : index
    %27 = vector.load %arg10[%c16, %c0_29] : memref<32x128xf32, #tpu.memory_space<vmem>>, vector<2x128xf32>
    %c0_30 = arith.constant 0 : index
    %c1024 = arith.constant 1024 : index
    %28 = vector.load %arg11[%c0_30, %c1024] : memref<2x2048xf32, #tpu.memory_space<vmem>>, vector<2x128xf32>
    tpu.vector_store %arg11[%c0_30, %c1024], %27 {strides = array<i32>} : memref<2x2048xf32, #tpu.memory_space<vmem>>, vector<2x128xf32>,
    %c18 = arith.constant 18 : index
    %c0_31 = arith.constant 0 : index
    %29 = vector.load %arg10[%c18, %c0_31] : memref<32x128xf32, #tpu.memory_space<vmem>>, vector<2x128xf32>
    %c0_32 = arith.constant 0 : index
    %c1152 = arith.constant 1152 : index
    %30 = vector.load %arg11[%c0_32, %c1152] : memref<2x2048xf32, #tpu.memory_space<vmem>>, vector<2x128xf32>
    tpu.vector_store %arg11[%c0_32, %c1152], %29 {strides = array<i32>} : memref<2x2048xf32, #tpu.memory_space<vmem>>, vector<2x128xf32>,
    %c20 = arith.constant 20 : index
    %c0_33 = arith.constant 0 : index
    %31 = vector.load %arg10[%c20, %c0_33] : memref<32x128xf32, #tpu.memory_space<vmem>>, vector<2x128xf32>
    %c0_34 = arith.constant 0 : index
    %c1280 = arith.constant 1280 : index
    %32 = vector.load %arg11[%c0_34, %c1280] : memref<2x2048xf32, #tpu.memory_space<vmem>>, vector<2x128xf32>
    tpu.vector_store %arg11[%c0_34, %c1280], %31 {strides = array<i32>} : memref<2x2048xf32, #tpu.memory_space<vmem>>, vector<2x128xf32>,
    %c22 = arith.constant 22 : index
    %c0_35 = arith.constant 0 : index
    %33 = vector.load %arg10[%c22, %c0_35] : memref<32x128xf32, #tpu.memory_space<vmem>>, vector<2x128xf32>
    %c0_36 = arith.constant 0 : index
    %c1408 = arith.constant 1408 : index
    %34 = vector.load %arg11[%c0_36, %c1408] : memref<2x2048xf32, #tpu.memory_space<vmem>>, vector<2x128xf32>
    tpu.vector_store %arg11[%c0_36, %c1408], %33 {strides = array<i32>} : memref<2x2048xf32, #tpu.memory_space<vmem>>, vector<2x128xf32>,
    %c24 = arith.constant 24 : index
    %c0_37 = arith.constant 0 : index
    %35 = vector.load %arg10[%c24, %c0_37] : memref<32x128xf32, #tpu.memory_space<vmem>>, vector<2x128xf32>
    %c0_38 = arith.constant 0 : index
    %c1536 = arith.constant 1536 : index
    %36 = vector.load %arg11[%c0_38, %c1536] : memref<2x2048xf32, #tpu.memory_space<vmem>>, vector<2x128xf32>
    tpu.vector_store %arg11[%c0_38, %c1536], %35 {strides = array<i32>} : memref<2x2048xf32, #tpu.memory_space<vmem>>, vector<2x128xf32>,
    %c26 = arith.constant 26 : index
    %c0_39 = arith.constant 0 : index
    %37 = vector.load %arg10[%c26, %c0_39] : memref<32x128xf32, #tpu.memory_space<vmem>>, vector<2x128xf32>
    %c0_40 = arith.constant 0 : index
    %c1664 = arith.constant 1664 : index
    %38 = vector.load %arg11[%c0_40, %c1664] : memref<2x2048xf32, #tpu.memory_space<vmem>>, vector<2x128xf32>
    tpu.vector_store %arg11[%c0_40, %c1664], %37 {strides = array<i32>} : memref<2x2048xf32, #tpu.memory_space<vmem>>, vector<2x128xf32>,
    %c28 = arith.constant 28 : index
    %c0_41 = arith.constant 0 : index
    %39 = vector.load %arg10[%c28, %c0_41] : memref<32x128xf32, #tpu.memory_space<vmem>>, vector<2x128xf32>
    %c0_42 = arith.constant 0 : index
    %c1792 = arith.constant 1792 : index
    %40 = vector.load %arg11[%c0_42, %c1792] : memref<2x2048xf32, #tpu.memory_space<vmem>>, vector<2x128xf32>
    tpu.vector_store %arg11[%c0_42, %c1792], %39 {strides = array<i32>} : memref<2x2048xf32, #tpu.memory_space<vmem>>, vector<2x128xf32>,
    %c30 = arith.constant 30 : index
    %c0_43 = arith.constant 0 : index
    %41 = vector.load %arg10[%c30, %c0_43] : memref<32x128xf32, #tpu.memory_space<vmem>>, vector<2x128xf32>
    %c0_44 = arith.constant 0 : index
    %c1920 = arith.constant 1920 : index
    %42 = vector.load %arg11[%c0_44, %c1920] : memref<2x2048xf32, #tpu.memory_space<vmem>>, vector<2x128xf32>
    tpu.vector_store %arg11[%c0_44, %c1920], %41 {strides = array<i32>} : memref<2x2048xf32, #tpu.memory_space<vmem>>, vector<2x128xf32>,
    %c0_45 = arith.constant 0 : index
    %c0_46 = arith.constant 0 : index
    %43 = vector.load %arg11[%c0_45, %c0_46] : memref<2x2048xf32, #tpu.memory_space<vmem>>, vector<2x2048xf32>
    %44 = arith.truncf %43 : vector<2x2048xf32> to vector<2x2048xbf16>
    %c0_47 = arith.constant 0 : index
    %c0_48 = arith.constant 0 : index
    %45 = vector.load %arg5[%c0_47, %c0_48] : memref<2048x1024xbf16, #tpu.memory_space<vmem>>, vector<2048x1024xbf16>
    %cst_49 = arith.constant dense<0.000000e+00> : vector<2x1024xf32>
    %46 = tpu.matmul %44, %45, %cst_49 {dimension_numbers = #tpu.dot_dimension_numbers<[1], [0], [0], [1], [0, 0, 1, 1], [], []>} : vector<2x2048xbf16>, vector<2048x1024xbf16>, vector<2x1024xf32> -> vector<2x1024xf32>
    %c0_50 = arith.constant 0 : index
    %c0_51 = arith.constant 0 : index
    %47 = vector.load %arg6[%c0_50, %c0_51] : memref<1x1024xf32, #tpu.memory_space<vmem>>, vector<1x1024xf32>
    %48 = vector.broadcast %47 : vector<1x1024xf32> to vector<2x1024xf32>
    %49 = arith.addf %46, %48 : vector<2x1024xf32>
    %cst_52 = arith.constant 0.000000e+00 : f32
    %50 = vector.broadcast %cst_52 : f32 to vector<2x1024xf32>
    %51 = arith.maximumf %49, %50 : vector<2x1024xf32>
    %52 = arith.truncf %51 : vector<2x1024xf32> to vector<2x1024xbf16>
    %c0_53 = arith.constant 0 : index
    %c0_54 = arith.constant 0 : index
    %53 = vector.load %arg7[%c0_53, %c0_54] : memref<1024x128xbf16, #tpu.memory_space<vmem>>, vector<1024x128xbf16>
    %cst_55 = arith.constant dense<0.000000e+00> : vector<2x128xf32>
    %54 = tpu.matmul %52, %53, %cst_55 {dimension_numbers = #tpu.dot_dimension_numbers<[1], [0], [0], [1], [0, 0, 1, 1], [], []>} : vector<2x1024xbf16>, vector<1024x128xbf16>, vector<2x128xf32> -> vector<2x128xf32>
    %c0_56 = arith.constant 0 : index
    %c0_57 = arith.constant 0 : index
    %55 = vector.load %arg8[%c0_56, %c0_57] : memref<1x128xf32, #tpu.memory_space<vmem>>, vector<1x128xf32>
    %56 = vector.broadcast %55 : vector<1x128xf32> to vector<2x128xf32>
    %57 = arith.addf %54, %56 : vector<2x128xf32>
    %c0_58 = arith.constant 0 : index
    %c0_59 = arith.constant 0 : index
    %58 = vector.load %arg9[%c0_58, %c0_59] : memref<2x128xf32, #tpu.memory_space<vmem>>, vector<2x128xf32>
    tpu.vector_store %arg9[%c0_58, %c0_59], %57 {strides = array<i32>} : memref<2x128xf32, #tpu.memory_space<vmem>>, vector<2x128xf32>,
    return
  }
  func.func @transform_0(%arg0: i32) -> (i32, i32) {
    %c0_i32 = arith.constant 0 : i32
    %c0_i32_0 = arith.constant 0 : i32
    %c0_i32_1 = arith.constant 0 : i32
    return %c0_i32, %c0_i32_0 : i32, i32
  }
  func.func @transform_1(%arg0: i32) -> (i32, i32) {
    %c0_i32 = arith.constant 0 : i32
    %c0_i32_0 = arith.constant 0 : i32
    %c0_i32_1 = arith.constant 0 : i32
    return %c0_i32, %c0_i32_0 : i32, i32
  }
  func.func @transform_2(%arg0: i32) -> (i32, i32) {
    %c0_i32 = arith.constant 0 : i32
    %c0_i32_0 = arith.constant 0 : i32
    %c0_i32_1 = arith.constant 0 : i32
    return %c0_i32, %c0_i32_0 : i32, i32
  }
  func.func @transform_3(%arg0: i32) -> (i32, i32) {
    %c0_i32 = arith.constant 0 : i32
    %c0_i32_0 = arith.constant 0 : i32
    %c0_i32_1 = arith.constant 0 : i32
    return %c0_i32, %c0_i32_0 : i32, i32
  }
  func.func @transform_4(%arg0: i32) -> (i32, i32) {
    %c0_i32 = arith.constant 0 : i32
    %c0_i32_0 = arith.constant 0 : i32
    %c0_i32_1 = arith.constant 0 : i32
    return %c0_i32, %c0_i32_0 : i32, i32
  }
  func.func @transform_5(%arg0: i32) -> (i32, i32) {
    %c0_i32 = arith.constant 0 : i32
    %c0_i32_0 = arith.constant 0 : i32
    %c0_i32_1 = arith.constant 0 : i32
    return %c0_i32, %c0_i32_0 : i32, i32
  }
  func.func @transform_6(%arg0: i32) -> (i32, i32) {
    %c0_i32 = arith.constant 0 : i32
    %c0_i32_0 = arith.constant 0 : i32
    %c0_i32_1 = arith.constant 0 : i32
    return %c0_i32, %c0_i32_0 : i32, i32
  }
  func.func @transform_7(%arg0: i32) -> (i32, i32) {
    %c0_i32 = arith.constant 0 : i32
    %c0_i32_0 = arith.constant 0 : i32
    %c0_i32_1 = arith.constant 0 : i32
    return %c0_i32, %c0_i32_0 : i32, i32
  }
  func.func @transform_8(%arg0: i32) -> (i32, i32) {
    %c0_i32 = arith.constant 0 : i32
    %c0_i32_0 = arith.constant 0 : i32
    %c0_i32_1 = arith.constant 0 : i32
    return %c0_i32, %c0_i32_0 : i32, i32
  }
}

</mosaic_0001>

<bundles_post_ra>
// kernel: tpu_custom_call.1
= control target key start
LH: loop header
LB: loop body
LE: loop exit
PB: predicated region body
PF: predicated region fallthrough
CT: control target
= control target key end

     0   :  { %13 = vsyncpa [#allocation5], 0  ;;  %s11057_s0 = inlined_call_operand.vmem [shape: f32[392,8], index: 0, kind: input, shape index: {}]   ;;  %s11058_s1 = inlined_call_operand.hbm [shape: f32[32,392], index: 1, kind: input, shape index: {}]   ;;  %s11059_s2 = inlined_call_operand.hbm [shape: f32[8,128], index: 2, kind: input, shape index: {}]   ;;  %s11060_s3 = inlined_call_operand.hbm [shape: f32[1,128], index: 3, kind: input, shape index: {}]   ;;  %s11061_s4 = inlined_call_operand.hbm [shape: bf16[2048,1024], index: 4, kind: input, shape index: {}]   ;;  %s11062_s5 = inlined_call_operand.hbm [shape: f32[1,1024], index: 5, kind: input, shape index: {}]   ;;  %s11063_s6 = inlined_call_operand.hbm [shape: bf16[1024,128], index: 6, kind: input, shape index: {}]   ;;  %s11064_s7 = inlined_call_operand.hbm [shape: f32[1,128], index: 7, kind: input, shape index: {}]   ;;  %s11065_s8 = inlined_call_operand.hbm [shape: f32[2,128], index: 8, kind: output, shape index: {}]  }
   0x1   :  { %14 = vsyncpa [#allocation8], 0 }
   0x2   :  { %15 = vsyncpa [#allocation11], 0 }
   0x3   :  { %16 = vsyncpa [#allocation14], 0 }
   0x4   :  { %17 = vsyncpa [#allocation6], 0  ;;  %s10519_s27 = smov [#allocation7]   ;;  %s10333_s9 = scalar_lea.hbm %s11059_s2, 128 }
   0x5   :  { %s38_s28 = sshll.u32 %s10519_s27, 4  ;;  %p10334_p0 = scmp.ne.s32.totalorder %s11059_s2, %s10333_s9  ;;  %s39_s28 = int_to_ptr.vmem [resolvable:$true] %s38_s28 }
   0x6   :  { %p10337_p1 = scmp.lt.u32.totalorder %s10333_s9, %s11059_s2 }
   0x8   :  { %p10339_p2 = pnand %p10337_p1, %p10334_p0 }
   0xa   :  { %10342 = shalt.err (!%p10339_p2)
}
   0xb   :  { %s10343_s14 = scalar_lea.vmem %s39_s28, 128  ;;  %p10348_p4 = scmp.lt.s32.totalorder %s39_s28, %s39_s28 }
   0xc   :  { %p10344_p3 = scmp.ne.s32.totalorder %s39_s28, %s10343_s14  ;;  %p10349_p5 = scmp.lt.s32.totalorder %s10343_s14, %s10343_s14 }
   0xe   :  { %p10350_p6 = por %p10349_p5, %p10348_p4 }
  0x10   :  { %p10351_p7 = pnand %p10350_p6, %p10344_p3 }
  0x12   :  { %10354 = shalt.err (!%p10351_p7)
}
  0x13   :  { %41 = dma.hbm_to_vmem [thread:$0]  %s11059_s2, 128, %s39_s28, [#allocation8]  }
  0x14   :  { %s10520_s17 = smov [#allocation10]   ;;  %s10521_s19 = smov [#allocation13]  }
  0x15   :  { %s57_s18 = sshll.u32 %s10520_s17, 4  ;;  %s79_s20 = sshll.u32 %s10521_s19, 4  ;;  %s58_s18 = int_to_ptr.vmem [resolvable:$true] %s57_s18  ;;  %s80_s20 = int_to_ptr.vmem [resolvable:$true] %s79_s20 }
  0x16   :  { %s10355_s23 = scalar_lea.hbm %s11061_s4, 131072 }
  0x17   :  { %p10356_p8 = scmp.ne.s32.totalorder %s11061_s4, %s10355_s23  ;;  %p10359_p9 = scmp.lt.u32.totalorder %s10355_s23, %s11061_s4 }
  0x19   :  { %p10361_p10 = pnand %p10359_p9, %p10356_p8 }
  0x1b   :  { %10364 = shalt.err (!%p10361_p10)
}
  0x1c   :  { %s10365_s2 = scalar_lea.vmem %s58_s18, 131072  ;;  %p10370_p12 = scmp.lt.s32.totalorder %s58_s18, %s58_s18 }
  0x1d   :  { %p10366_p11 = scmp.ne.s32.totalorder %s58_s18, %s10365_s2  ;;  %p10371_p13 = scmp.lt.s32.totalorder %s10365_s2, %s10365_s2 }
  0x1f   :  { %p10372_p0 = por %p10371_p13, %p10370_p12 }
  0x21   :  { %p10373_p1 = pnand %p10372_p0, %p10366_p11 }
  0x23   :  { %10376 = shalt.err (!%p10373_p1)
}
  0x24   :  { %s10522_s28 = smov 512   ;;  %s10523_s29 = smov 32  }
  0x25   :  { %63 = dma.hbm_to_vmem [thread:$0]  %s11061_s4, 131072, %s58_s18, [#allocation11], %s10522_s28, %s10522_s28, %s10523_s29  }
  0x26   :  { %s10377_s12 = scalar_lea.hbm %s11063_s6, 8192 }
  0x27   :  { %p10378_p2 = scmp.ne.s32.totalorder %s11063_s6, %s10377_s12  ;;  %p10381_p3 = scmp.lt.u32.totalorder %s10377_s12, %s11063_s6 }
  0x29   :  { %p10383_p4 = pnand %p10381_p3, %p10378_p2 }
  0x2b   :  { %10386 = shalt.err (!%p10383_p4)
}
  0x2c   :  { %s10387_s17 = scalar_lea.vmem %s80_s20, 8192  ;;  %p10392_p6 = scmp.lt.s32.totalorder %s80_s20, %s80_s20 }
  0x2d   :  { %p10388_p5 = scmp.ne.s32.totalorder %s80_s20, %s10387_s17  ;;  %p10393_p7 = scmp.lt.s32.totalorder %s10387_s17, %s10387_s17 }
  0x2f   :  { %p10394_p8 = por %p10393_p7, %p10392_p6 }
  0x31   :  { %p10395_p9 = pnand %p10394_p8, %p10388_p5 }
  0x33   :  { %10398 = shalt.err (!%p10395_p9)
}
  0x34   :  { %s10524_s4 = smov 64   ;;  %s10525_s18 = smov 4  }
  0x35   :  { %85 = dma.hbm_to_vmem [thread:$0]  %s11063_s6, 8192, %s80_s20, [#allocation14], %s10524_s4, %s10524_s4, %s10525_s18  }
  0x36   :  { %s10526_s22 = smov [#allocation4]   ;;  %s10527_s24 = smov [#allocation9]  }
  0x37   :  { %s25_s23 = sshll.u32 %s10526_s22, 4  ;;  %s48_s25 = sshll.u32 %s10527_s24, 4  ;;  %s26_s23 = int_to_ptr.vmem [resolvable:$true] %s25_s23  ;;  %s49_s25 = int_to_ptr.vmem [resolvable:$true] %s48_s25 }
  0x38   :  { %s10399_s2 = scalar_lea.hbm %s11058_s1, 2048 }
  0x39   :  { %p10400_p10 = scmp.ne.s32.totalorder %s11058_s1, %s10399_s2  ;;  %p10403_p11 = scmp.lt.u32.totalorder %s10399_s2, %s11058_s1 }
  0x3b   :  { %p10405_p12 = pnand %p10403_p11, %p10400_p10 }
  0x3d   :  { %10408 = shalt.err (!%p10405_p12)
}
  0x3e   :  { %s10409_s6 = scalar_lea.vmem %s26_s23, 2048  ;;  %p10414_p0 = scmp.lt.s32.totalorder %s26_s23, %s26_s23 }
  0x3f   :  { %p10410_p13 = scmp.ne.s32.totalorder %s26_s23, %s10409_s6  ;;  %p10415_p1 = scmp.lt.s32.totalorder %s10409_s6, %s10409_s6 }
  0x41   :  { %p10416_p2 = por %p10415_p1, %p10414_p0 }
  0x43   :  { %p10417_p3 = pnand %p10416_p2, %p10410_p13 }
  0x45   :  { %10420 = shalt.err (!%p10417_p3)
}
  0x46   :  { %31 = dma.hbm_to_vmem [thread:$0]  %s11058_s1, 2048, %s26_s23, [#allocation5], %s10522_s28, %s10522_s28, %s10523_s29  }
  0x47   :  { %s10421_s15 = scalar_lea.hbm %s11060_s3, 16 }
  0x48   :  { %p10422_p4 = scmp.ne.s32.totalorder %s11060_s3, %s10421_s15  ;;  %p10425_p5 = scmp.lt.u32.totalorder %s10421_s15, %s11060_s3 }
  0x4a   :  { %p10427_p6 = pnand %p10425_p5, %p10422_p4 }
  0x4c   :  { %10430 = shalt.err (!%p10427_p6)
}
  0x4d   :  { %s10431_s19 = scalar_lea.vmem %s49_s25, 16  ;;  %s10435_s21 = scalar_lea.vmem %s49_s25, 32 }
  0x4e   :  { %p10432_p7 = scmp.ne.s32.totalorder %s49_s25, %s10431_s19  ;;  %p10436_p8 = scmp.lt.s32.totalorder %s49_s25, %s49_s25 }
  0x4f   :  { %p10437_p9 = scmp.lt.s32.totalorder %s10435_s21, %s10431_s19 }
  0x51   :  { %p10438_p10 = por %p10437_p9, %p10436_p8 }
  0x53   :  { %p10439_p11 = pnand %p10438_p10, %p10432_p7 }
  0x55   :  { %10442 = shalt.err (!%p10439_p11)
}
  0x56   :  { %51 = dma.hbm_to_vmem [thread:$0]  %s11060_s3, 16, %s49_s25, [#allocation8]  }
  0x57   :  { %s10528_s29 = smov [#allocation12]   ;;  %s10529_s23 = smov [#allocation15]  }
  0x58   :  { %s70_s22 = sshll.u32 %s10528_s29, 4  ;;  %s92_s24 = sshll.u32 %s10529_s23, 4  ;;  %s71_s22 = int_to_ptr.vmem [resolvable:$true] %s70_s22  ;;  %s93_s24 = int_to_ptr.vmem [resolvable:$true] %s92_s24 }
  0x59   :  { %s10443_s2 = scalar_lea.hbm %s11062_s5, 128 }
  0x5a   :  { %p10444_p12 = scmp.ne.s32.totalorder %s11062_s5, %s10443_s2  ;;  %p10447_p13 = scmp.lt.u32.totalorder %s10443_s2, %s11062_s5 }
  0x5c   :  { %p10449_p0 = pnand %p10447_p13, %p10444_p12 }
  0x5e   :  { %10452 = shalt.err (!%p10449_p0)
}
  0x5f   :  { %s10453_s3 = scalar_lea.vmem %s71_s22, 128  ;;  %p10458_p2 = scmp.lt.s32.totalorder %s71_s22, %s71_s22 }
  0x60   :  { %p10454_p1 = scmp.ne.s32.totalorder %s71_s22, %s10453_s3  ;;  %p10459_p3 = scmp.lt.s32.totalorder %s10453_s3, %s10453_s3 }
  0x62   :  { %p10460_p4 = por %p10459_p3, %p10458_p2 }
  0x64   :  { %p10461_p5 = pnand %p10460_p4, %p10454_p1 }
  0x66   :  { %10464 = shalt.err (!%p10461_p5)
}
  0x67   :  { %73 = dma.hbm_to_vmem [thread:$0]  %s11062_s5, 128, %s71_s22, [#allocation11]  }
  0x68   :  { %s10465_s13 = scalar_lea.hbm %s11064_s7, 16 }
  0x69   :  { %p10466_p6 = scmp.ne.s32.totalorder %s11064_s7, %s10465_s13  ;;  %p10469_p7 = scmp.lt.u32.totalorder %s10465_s13, %s11064_s7 }
  0x6b   :  { %p10471_p8 = pnand %p10469_p7, %p10466_p6 }
  0x6d   :  { %10474 = shalt.err (!%p10471_p8)
}
  0x6e   :  { %s10475_s4 = scalar_lea.vmem %s93_s24, 16  ;;  %s10479_s18 = scalar_lea.vmem %s93_s24, 32 }
  0x6f   :  { %p10476_p9 = scmp.ne.s32.totalorder %s93_s24, %s10475_s4  ;;  %p10480_p10 = scmp.lt.s32.totalorder %s93_s24, %s93_s24 }
  0x70   :  { %p10481_p11 = scmp.lt.s32.totalorder %s10479_s18, %s10475_s4 }
  0x72   :  { %p10482_p12 = por %p10481_p11, %p10480_p10 }
  0x74   :  { %p10483_p13 = pnand %p10482_p12, %p10476_p9 }
  0x76   :  { %10486 = shalt.err (!%p10483_p13)
}
  0x77   :  { %95 = dma.hbm_to_vmem [thread:$0]  %s11064_s7, 16, %s93_s24, [#allocation14]  }
  0x78   :  { %10509 = dma.done.wait [#allocation5], 2048  }
  0x79   :  { %10510 = vsyncadd [#allocation5], 4294965248 }
  0x7a   :  { %10511 = dma.done.wait [#allocation8], 144  }
  0x7b   :  { %10512 = vsyncadd [#allocation8], 4294967152 }
  0x7c   :  { %10513 = dma.done.wait [#allocation11], 131200  }
  0x7d   :  { %10514 = vsyncadd [#allocation11], 4294836096 }
  0x7e   :  { %10515 = dma.done.wait [#allocation14], 8208  }
  0x7f   :  { %10516 = vsyncadd [#allocation14], 4294959088  ;;  %v10530_v0 = vmov 0.0|0.0   ;;  %v150_v1 = vld [vmem:[%s11057_s0 + $0x80] sm:$0xff]  ;;  %v151_v2 = vld [vmem:[%s11057_s0 + $0x88] sm:$0xff]  ;;  %vm183_vm0 = vcmask 64512  }
  0x80   :  { %10106 = vmatprep.subr.bf16.mxu1 %v10530_v0  ;;  %v134_v3 = vld [vmem:[%s11057_s0] sm:$0xff]  ;;  %v10074_v4 = vpack.c.bf16 %v151_v2, %v150_v1  ;;  %v135_v5 = vld [vmem:[%s11057_s0 + $0x8] sm:$0xff]  ;;  %v152_v10 = vld [vmem:[%s11057_s0 + $0x90] sm:$0xff] }
  0x81   :  { %v166_v6 = vld [vmem:[%s11057_s0 + $0x100] sm:$0xff]  ;;  %v167_v7 = vld [vmem:[%s11057_s0 + $0x108] sm:$0xff]  ;;  %v10076_v8 = vpack.c.bf16 %v135_v5, %v134_v3  ;;  %v153_v11 = vld [vmem:[%s11057_s0 + $0x98] sm:$0xff] }
  0x82   :  { %v10107_v9 = vpack.c.bf16 %v167_v7, %v166_v6  ;;  %v136_v12 = vld [vmem:[%s11057_s0 + $0x10] sm:$0xff]  ;;  %10075 = vmatprep.subr.bf16.mxu0 %v10074_v4  ;;  %v10078_v13 = vpack.c.bf16 %v153_v11, %v152_v10  ;;  %v137_v14 = vld [vmem:[%s11057_s0 + $0x18] sm:$0xff]  ;;  %v154_v19 = vld [vmem:[%s11057_s0 + $0xa0] sm:$0xff] }
  0x83   :  { %v168_v15 = vld [vmem:[%s11057_s0 + $0x110] sm:$0xff]  ;;  %v169_v16 = vld [vmem:[%s11057_s0 + $0x118] sm:$0xff]  ;;  %10077 = vmatpush3.bf16.msra.mxu0 %v10076_v8  ;;  %v10080_v17 = vpack.c.bf16 %v137_v14, %v136_v12  ;;  %v155_v20 = vld [vmem:[%s11057_s0 + $0xa8] sm:$0xff] }
  0x84   :  { %10108 = vmatpush1.bf16.msra.mxu1 %v10107_v9  ;;  %v10110_v18 = vpack.c.bf16 %v169_v16, %v168_v15  ;;  %v138_v21 = vld [vmem:[%s11057_s0 + $0x20] sm:$0xff]  ;;  %10079 = vmatprep.subr.bf16.mxu0 %v10078_v13  ;;  %v10082_v22 = vpack.c.bf16 %v155_v20, %v154_v19  ;;  %v139_v23 = vld [vmem:[%s11057_s0 + $0x28] sm:$0xff]  ;;  %v156_v26 = vld [vmem:[%s11057_s0 + $0xb0] sm:$0xff] }
  0x85   :  { %10109 = vmatprep.subr.bf16.mxu1 %v10530_v0  ;;  %v170_v24 = vld [vmem:[%s11057_s0 + $0x120] sm:$0xff]  ;;  %v171_v25 = vld [vmem:[%s11057_s0 + $0x128] sm:$0xff]  ;;  %v157_v27 = vld [vmem:[%s11057_s0 + $0xb8] sm:$0xff]  ;;  %v10084_v28 = vpack.c.bf16 %v139_v23, %v138_v21 }
  0x86   :  { %v10113_v29 = vpack.c.bf16 %v171_v25, %v170_v24  ;;  %v140_v30 = vld [vmem:[%s11057_s0 + $0x30] sm:$0xff]  ;;  %v10086_v31 = vpack.c.bf16 %v157_v27, %v156_v26  ;;  %v141_v32 = vld [vmem:[%s11057_s0 + $0x38] sm:$0xff]  ;;  %v158_v35 = vld [vmem:[%s11057_s0 + $0xc0] sm:$0xff] }
  0x87   :  { %10081 = vmatpush3.bf16.msra.mxu0 %v10080_v17  ;;  %v172_v33 = vld [vmem:[%s11057_s0 + $0x130] sm:$0xff]  ;;  %v173_v34 = vld [vmem:[%s11057_s0 + $0x138] sm:$0xff]  ;;  %v159_v36 = vld [vmem:[%s11057_s0 + $0xc8] sm:$0xff]  ;;  %v10088_v37 = vpack.c.bf16 %v141_v32, %v140_v30  ;;  %v10531_v17 = vmov 0.0  }
  0x88   :  { %10111 = vmatpush1.bf16.msra.mxu1 %v10110_v18  ;;  %10083 = vmatprep.subr.bf16.mxu0 %v10082_v22  ;;  %v10116_v38 = vpack.c.bf16 %v173_v34, %v172_v33  ;;  %v142_v39 = vld [vmem:[%s11057_s0 + $0x40] sm:$0xff]  ;;  %v10090_v40 = vpack.c.bf16 %v159_v36, %v158_v35  ;;  %v143_v41 = vld [vmem:[%s11057_s0 + $0x48] sm:$0xff]  ;;  %v160_v44 = vld [vmem:[%s11057_s0 + $0xd0] sm:$0xff] }
  0x89   :  { %10112 = vmatprep.subr.bf16.mxu1 %v10530_v0  ;;  %v174_v42 = vld [vmem:[%s11057_s0 + $0x140] sm:$0xff]  ;;  %v175_v43 = vld [vmem:[%s11057_s0 + $0x148] sm:$0xff]  ;;  %v161_v45 = vld [vmem:[%s11057_s0 + $0xd8] sm:$0xff]  ;;  %v10092_v46 = vpack.c.bf16 %v143_v41, %v142_v39 }
  0x8a   :  { %v10119_v47 = vpack.c.bf16 %v175_v43, %v174_v42  ;;  %v144_v48 = vld [vmem:[%s11057_s0 + $0x50] sm:$0xff]  ;;  %v145_v49 = vld [vmem:[%s11057_s0 + $0x58] sm:$0xff]  ;;  %v119_v50 = vld [vmem:[#allocation4 + $0x8] sm:$0xff]  ;;  %v10094_v51 = vpack.c.bf16 %v161_v45, %v160_v44 }
  0x8b   :  { %10085 = vmatpush3.bf16.msra.mxu0 %v10084_v28  ;;  %v176_v52 = vld [vmem:[%s11057_s0 + $0x150] sm:$0xff]  ;;  %v177_v53 = vld [vmem:[%s11057_s0 + $0x158] sm:$0xff]  ;;  %v162_v55 = vld [vmem:[%s11057_s0 + $0xe0] sm:$0xff]  ;;  %260 = vmatprep.mubr.f32.mxu0 %v119_v50  ;;  %v10096_v61 = vpack.c.bf16 %v145_v49, %v144_v48 }
  0x8c   :  { %10114 = vmatpush1.bf16.msra.mxu1 %v10113_v29  ;;  %10087 = vmatprep.subr.bf16.mxu0 %v10086_v31  ;;  %v121_v54 = vld [vmem:[#allocation4 + $0x18] sm:$0xff]  ;;  %v163_v56 = vld [vmem:[%s11057_s0 + $0xe8] sm:$0xff]  ;;  %v146_v57 = vld [vmem:[%s11057_s0 + $0x60] sm:$0xff]  ;;  %v10122_v62 = vpack.c.bf16 %v177_v53, %v176_v52 }
  0x8d   :  { %10115 = vmatprep.subr.bf16.mxu1 %v10530_v0  ;;  %8831 = vmatprep.mubr.msk.f32.mxu1 %vm183_vm0, %v121_v54  ;;  %v147_v58 = vld [vmem:[%s11057_s0 + $0x68] sm:$0xff]  ;;  %v178_v59 = vld [vmem:[%s11057_s0 + $0x160] sm:$0xff]  ;;  %v164_v63 = vld [vmem:[%s11057_s0 + $0xf0] sm:$0xff]  ;;  %v10098_v2 = vpack.c.bf16 %v163_v56, %v162_v55 }
  0x8e   :  { %v179_v60 = vld [vmem:[%s11057_s0 + $0x168] sm:$0xff]  ;;  %v165_v1 = vld [vmem:[%s11057_s0 + $0xf8] sm:$0xff]  ;;  %v148_v3 = vld [vmem:[%s11057_s0 + $0x70] sm:$0xff]  ;;  %v10100_v7 = vpack.c.bf16 %v147_v58, %v146_v57 }
  0x8f   :  { %10089 = vmatpush3.bf16.msra.mxu0 %v10088_v37  ;;  %v149_v4 = vld [vmem:[%s11057_s0 + $0x78] sm:$0xff]  ;;  %v180_v5 = vld [vmem:[%s11057_s0 + $0x170] sm:$0xff]  ;;  %v10125_v8 = vpack.c.bf16 %v179_v60, %v178_v59  ;;  %v10102_v9 = vpack.c.bf16 %v165_v1, %v164_v63  ;;  %v366_v12 = vld [vmem:[#allocation7] sm:$0xff] }
  0x90   :  { %10117 = vmatpush1.bf16.msra.mxu1 %v10116_v38  ;;  %10091 = vmatprep.subr.bf16.mxu0 %v10090_v40  ;;  %v181_v6 = vld [vmem:[%s11057_s0 + $0x178] sm:$0xff]  ;;  %v10104_v10 = vpack.c.bf16 %v149_v4, %v148_v3  ;;  %v118_v13 = vld [vmem:[#allocation4] sm:$0xff]  ;;  %v123_v15 = vld [vmem:[#allocation4 + $0x28] sm:$0xff] }
  0x91   :  { %10118 = vmatprep.subr.bf16.mxu1 %v10530_v0  ;;  %v10128_v11 = vpack.c.bf16 %v181_v6, %v180_v5  ;;  %v182_v14 = vld [vmem:[%s11057_s0 + $0x180] sm:$0xff]  ;;  %v120_v16 = vld [vmem:[#allocation4 + $0x10] sm:$0xff]  ;;  %v125_v18 = vld [vmem:[#allocation4 + $0x38] sm:$0xff]  ;;  %s10533_s0 = smov [#allocation16]  }
  0x92   :  { %v122_v19 = vld [vmem:[#allocation4 + $0x20] sm:$0xff]  ;;  %v127_v20 = vld [vmem:[#allocation4 + $0x48] sm:$0xff]  ;;  %v124_v21 = vld [vmem:[#allocation4 + $0x30] sm:$0xff]  ;;  %s8819_s30 = sshll.u32 %s10533_s0, 4  ;;  %s8820_s30 = int_to_ptr.vmem [resolvable:$true] %s8819_s30 }
  0x93   :  { %10093 = vmatpush3.bf16.msra.mxu0 %v10092_v46  ;;  %v129_v22 = vld [vmem:[#allocation4 + $0x58] sm:$0xff]  ;;  %v131_v23 = vld [vmem:[#allocation4 + $0x68] sm:$0xff]  ;;  %v128_v24 = vld [vmem:[#allocation4 + $0x50] sm:$0xff]  ;;  %s10487_s9 = scalar_lea.vmem %s8820_s30, 32  ;;  %p10492_p1 = scmp.lt.s32.totalorder %s8820_s30, %s8820_s30 }
  0x94   :  { %10120 = vmatpush1.bf16.msra.mxu1 %v10119_v47  ;;  %10095 = vmatprep.subr.bf16.mxu0 %v10094_v51  ;;  %v130_v25 = vld [vmem:[#allocation4 + $0x60] sm:$0xff]  ;;  %v133_v26 = vld [vmem:[#allocation4 + $0x78] sm:$0xff]  ;;  %v132_v27 = vld [vmem:[#allocation4 + $0x70] sm:$0xff]  ;;  %p10488_p0 = scmp.ne.s32.totalorder %s8820_s30, %s10487_s9  ;;  %p10493_p2 = scmp.lt.s32.totalorder %s10487_s9, %s10487_s9 }
  0x95   :  { %10121 = vmatprep.subr.bf16.mxu1 %v10530_v0  ;;  %v619_v28 = vld [vmem:[#allocation10] sm:$0xff]  ;;  %v10828_v30 = vld [vmem:[#allocation10 + $0x8] sm:$0xff] }
  0x96   :  { %v623_v29 = vld [vmem:[#allocation10 + $0x20] sm:$0xff]  ;;  %v10830_v33 = vld [vmem:[#allocation10 + $0x28] sm:$0xff]  ;;  %p10494_p3 = por %p10493_p2, %p10492_p1 }
  0x97   :  { %10097 = vmatpush3.bf16.msra.mxu0 %v10096_v61  ;;  %v8840_v31 = vcombine.low %v619_v28, %v623_v29  ;;  %v8841_v32 = vcombine.high %v619_v28, %v623_v29  ;;  %v627_v34 = vld [vmem:[#allocation10 + $0x40] sm:$0xff]  ;;  %v8842_v36 = vcombine.low %v10828_v30, %v10830_v33  ;;  %v8843_v37 = vcombine.high %v10828_v30, %v10830_v33  ;;  %v656_v28 = vld [vmem:[#allocation10 + $0x128] sm:$0xff] }
  0x98   :  { %10123 = vmatpush1.bf16.msra.mxu1 %v10122_v62  ;;  %10099 = vmatprep.subr.bf16.mxu0 %v10098_v2  ;;  %v631_v35 = vld [vmem:[#allocation10 + $0x60] sm:$0xff]  ;;  %p10495_p4 = pnand %p10494_p3, %p10488_p0 }
  0x99   :  { %10124 = vmatprep.subr.bf16.mxu1 %v10530_v0  ;;  %v8849_v38 = vcombine.high %v627_v34, %v631_v35  ;;  %v8848_v39 = vcombine.low %v627_v34, %v631_v35  ;;  %v635_v40 = vld [vmem:[#allocation10 + $0x80] sm:$0xff]  ;;  %v664_v34 = vld [vmem:[#allocation10 + $0x168] sm:$0xff] }
  0x9a   :  { %v639_v41 = vld [vmem:[#allocation10 + $0xa0] sm:$0xff]  ;;  %v668_v35 = vld [vmem:[#allocation10 + $0x188] sm:$0xff] }
  0x9b   :  { %10101 = vmatpush3.bf16.msra.mxu0 %v10100_v7  ;;  %v8857_v42 = vcombine.high %v635_v40, %v639_v41  ;;  %v8856_v43 = vcombine.low %v635_v40, %v639_v41  ;;  %v643_v44 = vld [vmem:[#allocation10 + $0xc0] sm:$0xff]  ;;  %v680_v40 = vld [vmem:[#allocation10 + $0x1e8] sm:$0xff] }
  0x9c   :  { %10126 = vmatpush1.bf16.msra.mxu1 %v10125_v8  ;;  %10103 = vmatprep.subr.bf16.mxu0 %v10102_v9  ;;  %v647_v45 = vld [vmem:[#allocation10 + $0xe0] sm:$0xff] }
  0x9d   :  { %10127 = vmatprep.subr.bf16.mxu1 %v10530_v0  ;;  %v126_v0 = vld [vmem:[#allocation4 + $0x40] sm:$0xff]  ;;  %v8865_v46 = vcombine.high %v643_v44, %v647_v45  ;;  %v8864_v47 = vcombine.low %v643_v44, %v647_v45  ;;  %v651_v48 = vld [vmem:[#allocation10 + $0x100] sm:$0xff]  ;;  %v688_v44 = vld [vmem:[#allocation10 + $0x228] sm:$0xff] }
  0x9e   :  { %v655_v49 = vld [vmem:[#allocation10 + $0x120] sm:$0xff] }
  0x9f   :  { %10105 = vmatpush3.bf16.msra.mxu0 %v10104_v10  ;;  %v8873_v50 = vcombine.high %v651_v48, %v655_v49  ;;  %v8872_v51 = vcombine.low %v651_v48, %v655_v49  ;;  %v659_v52 = vld [vmem:[#allocation10 + $0x140] sm:$0xff] }
  0xa0   :  { %10129 = vmatpush1.bf16.msra.mxu1 %v10128_v11  ;;  %10066 = vmatprep.subr.mxu0 %v366_v12  ;;  %v663_v53 = vld [vmem:[#allocation10 + $0x160] sm:$0xff] }
  0xa1   :  { %313 = vmatprep.subr.mxu1 %v10531_v17  ;;  %v8881_v54 = vcombine.high %v659_v52, %v663_v53  ;;  %v8880_v55 = vcombine.low %v659_v52, %v663_v53  ;;  %v667_v56 = vld [vmem:[#allocation10 + $0x180] sm:$0xff] }
  0xa2   :  { %261 = vmatmul.mubr.f32.vlgmr.msra.gmra.mrb[0].mxu0 %v118_v13  ;;  %v671_v57 = vld [vmem:[#allocation10 + $0x1a0] sm:$0xff]  ;;  %v628_v13 = vld [vmem:[#allocation10 + $0x48] sm:$0xff] }
  0xa3   :  { %265 = vmatprep.mubr.f32.mxu0 %v123_v15  ;;  %10067 = vmatpush3.msra.mxu0 %v366_v12  ;;  %v8889_v58 = vcombine.high %v667_v56, %v671_v57  ;;  %v8888_v59 = vcombine.low %v667_v56, %v671_v57  ;;  %v675_v60 = vld [vmem:[#allocation10 + $0x1c0] sm:$0xff] }
  0xa4   :  { %314 = vmatpush1.msra.mxu1 %v182_v14  ;;  %7133 = vmatprep.subr.bf16.mxu0 %v8843_v37  ;;  %v679_v61 = vld [vmem:[#allocation10 + $0x1e0] sm:$0xff]  ;;  %v632_v14 = vld [vmem:[#allocation10 + $0x68] sm:$0xff] }
  0xa5   :  { %346 = vmatmul.mubr.f32.vlgmr.msra.gmra.mrb[0].mxu1 %v120_v16  ;;  %6805 = vmatprep.subr.bf16.mxu1 %v8841_v32  ;;  %v8896_v62 = vcombine.low %v675_v60, %v679_v61  ;;  %v8897_v63 = vcombine.high %v675_v60, %v679_v61  ;;  %v683_v1 = vld [vmem:[#allocation10 + $0x200] sm:$0xff]  ;;  %v660_v32 = vld [vmem:[#allocation10 + $0x148] sm:$0xff] }
  0xa6   :  { %8832 = vmatprep.mubr.msk.f32.mxu1 %vm183_vm0, %v125_v18  ;;  %266 = vmatmul.mubr.f32.gmra.mrb[2].mxu0 %v122_v19  ;;  %v687_v2 = vld [vmem:[#allocation10 + $0x220] sm:$0xff]  ;;  %v8851_v19 = vcombine.high %v628_v13, %v632_v14  ;;  %v8883_v33 = vcombine.high %v660_v32, %v664_v34  ;;  %v8882_v37 = vcombine.low %v660_v32, %v664_v34  ;;  %v692_v60 = vld [vmem:[#allocation10 + $0x248] sm:$0xff] }
  0xa7   :  { %270 = vmatprep.mubr.f32.mxu0 %v127_v20  ;;  %6806 = vmatpush1.bf16.msra.mxu1 %v8840_v31  ;;  %v8904_v3 = vcombine.low %v683_v1, %v687_v2  ;;  %v8905_v4 = vcombine.high %v683_v1, %v687_v2  ;;  %v636_v20 = vld [vmem:[#allocation10 + $0x88] sm:$0xff] }
  0xa8   :  { %6807 = vmatprep.subr.bf16.mxu1 %v8849_v38 }
  0xa9   :  { %351 = vmatmul.mubr.f32.gmra.mrb[2].mxu1 %v124_v21  ;;  %v640_v21 = vld [vmem:[#allocation10 + $0xa8] sm:$0xff] }
  0xaa   :  { %271 = vmatmul.mubr.f32.gmra.mrb[4].mxu0 %v126_v0  ;;  %8833 = vmatprep.mubr.msk.f32.mxu1 %vm183_vm0, %v129_v22  ;;  %v8850_v0 = vcombine.low %v628_v13, %v632_v14  ;;  %v8859_v22 = vcombine.high %v636_v20, %v640_v21  ;;  %v707_v13 = vld [vmem:[#allocation10 + $0x2c0] sm:$0xff] }
  0xab   :  { %275 = vmatprep.mubr.f32.mxu0 %v131_v23  ;;  %6808 = vmatpush1.bf16.msra.mxu1 %v8848_v39  ;;  %v644_v23 = vld [vmem:[#allocation10 + $0xc8] sm:$0xff]  ;;  %v711_v14 = vld [vmem:[#allocation10 + $0x2e0] sm:$0xff] }
  0xac   :  { %6809 = vmatprep.subr.bf16.mxu1 %v8857_v42  ;;  %v676_v39 = vld [vmem:[#allocation10 + $0x1c8] sm:$0xff] }
  0xad   :  { %356 = vmatmul.mubr.f32.gmra.mrb[4].mxu1 %v128_v24  ;;  %v648_v24 = vld [vmem:[#allocation10 + $0xe8] sm:$0xff]  ;;  %v8899_v42 = vcombine.high %v676_v39, %v680_v40  ;;  %v8898_v45 = vcombine.low %v676_v39, %v680_v40 }
  0xae   :  { %276 = vmatmul.mubr.f32.gmra.mrb[6].mxu0 %v130_v25  ;;  %8834 = vmatprep.mubr.msk.f32.mxu1 %vm183_vm0, %v133_v26  ;;  %v8858_v25 = vcombine.low %v636_v20, %v640_v21  ;;  %v8867_v26 = vcombine.high %v644_v23, %v648_v24  ;;  %v8866_v29 = vcombine.low %v644_v23, %v648_v24  ;;  %v715_v21 = vld [vmem:[#allocation10 + $0x300] sm:$0xff]  ;;  %v720_v24 = vld [vmem:[#allocation10 + $0x328] sm:$0xff] }
  0xaf   :  { %6810 = vmatpush1.bf16.msra.mxu1 %v8856_v43  ;;  %v684_v43 = vld [vmem:[#allocation10 + $0x208] sm:$0xff] }
  0xb0   :  { %6811 = vmatprep.subr.bf16.mxu1 %v8865_v46  ;;  %v8907_v46 = vcombine.high %v684_v43, %v688_v44  ;;  %v732_v39 = vld [vmem:[#allocation10 + $0x388] sm:$0xff] }
  0xb1   :  { %361 = vmatmul.mubr.f32.gmra.mrb[6].mxu1 %v132_v27  ;;  %v652_v27 = vld [vmem:[#allocation10 + $0x108] sm:$0xff] }
  0xb2   :  { %v8875_v31 = vcombine.high %v652_v27, %v656_v28  ;;  %v8874_v30 = vcombine.low %v652_v27, %v656_v28  ;;  %v723_v28 = vld [vmem:[#allocation10 + $0x340] sm:$0xff]  ;;  %v736_v40 = vld [vmem:[#allocation10 + $0x3a8] sm:$0xff] }
  0xb3   :  { %6812 = vmatpush1.bf16.msra.mxu1 %v8864_v47  ;;  %v8906_v47 = vcombine.low %v684_v43, %v688_v44  ;;  %v743_v43 = vld [vmem:[#allocation10 + $0x3e0] sm:$0xff]  ;;  %v740_v44 = vld [vmem:[#allocation10 + $0x3c8] sm:$0xff] }
  0xb4   :  { %6813 = vmatprep.subr.bf16.mxu1 %v8873_v50 }
  0xb7   :  { %6814 = vmatpush1.bf16.msra.mxu1 %v8872_v51 }
  0xb8   :  { %6815 = vmatprep.subr.bf16.mxu1 %v8881_v54 }
  0xbb   :  { %6816 = vmatpush1.bf16.msra.mxu1 %v8880_v55 }
  0xbc   :  { %6817 = vmatprep.subr.bf16.mxu1 %v8889_v58  ;;  %v691_v58 = vld [vmem:[#allocation10 + $0x240] sm:$0xff] }
  0xbf   :  { %6818 = vmatpush1.bf16.msra.mxu1 %v8888_v59  ;;  %v695_v59 = vld [vmem:[#allocation10 + $0x260] sm:$0xff] }
  0xc0   :  { %6819 = vmatprep.subr.bf16.mxu1 %v8897_v63  ;;  %v696_v63 = vld [vmem:[#allocation10 + $0x268] sm:$0xff]  ;;  %v8912_v2 = vcombine.low %v691_v58, %v695_v59 }
  0xc3   :  { %6820 = vmatpush1.bf16.msra.mxu1 %v8896_v62  ;;  %v8913_v62 = vcombine.high %v691_v58, %v695_v59 }
  0xc4   :  { %6821 = vmatprep.subr.bf16.mxu1 %v8905_v4  ;;  %v8915_v4 = vcombine.high %v692_v60, %v696_v63 }
  0xc7   :  { %6822 = vmatpush1.bf16.msra.mxu1 %v8904_v3  ;;  %v8914_v3 = vcombine.low %v692_v60, %v696_v63  ;;  %v10843_v60 = vld [vmem:[#allocation9] ss:$0 sm:$0xff] }
  0xc8   :  { %6823 = vmatprep.subr.bf16.mxu1 %v8913_v62 }
  0xcb   :  { %6824 = vmatpush1.bf16.msra.mxu1 %v8912_v2 }
 0x175   :  { %v9961_v5 = vpop.f32.mrb[0].mxu0 }
 0x176   :  { %v9962_v6 = vpop.f32.mrb[1].mxu0 }
 0x177   :  { %v9963_v7 = vadd.f32 %v9962_v6, %v9961_v5  ;;  %v699_v5 = vld [vmem:[#allocation10 + $0x280] sm:$0xff] }
 0x178   :  { %v347_v8 = vpop.f32.mrb[0].mxu1  ;;  %v703_v6 = vld [vmem:[#allocation10 + $0x2a0] sm:$0xff] }
 0x179   :  { %v349_v9 = vpop.f32.mrb[1].mxu1  ;;  %v348_v10 = vadd.f32 %v9963_v7, %v347_v8  ;;  %v9964_v11 = vpop.f32.mrb[2].mxu0  ;;  %v700_v7 = vld [vmem:[#allocation10 + $0x288] sm:$0xff]  ;;  %v8921_v8 = vcombine.high %v699_v5, %v703_v6 }
 0x17a   :  { %v9965_v12 = vpop.f32.mrb[3].mxu0  ;;  %v704_v9 = vld [vmem:[#allocation10 + $0x2a8] sm:$0xff] }
 0x17b   :  { %v9966_v15 = vadd.f32 %v9965_v12, %v9964_v11  ;;  %10068 = vmatprep.mubr.msk.f32.mxu0 %vm183_vm0, %v348_v10  ;;  %v8920_v10 = vcombine.low %v699_v5, %v703_v6  ;;  %v8922_v11 = vcombine.low %v700_v7, %v704_v9  ;;  %v8923_v12 = vcombine.high %v700_v7, %v704_v9 }
 0x17c   :  { %v352_v16 = vpop.f32.mrb[2].mxu1  ;;  %6825 = vmatprep.subr.bf16.mxu1 %v8921_v8  ;;  %v523_v6 = vlaneseq }
 0x17d   :  { %v354_v17 = vpop.f32.mrb[3].mxu1  ;;  %v353_v18 = vadd.f32 %v9966_v15, %v352_v16  ;;  %v9967_v48 = vpop.f32.mrb[4].mxu0  ;;  %6826 = vmatpush1.bf16.msra.mxu1 %v8920_v10  ;;  %v708_v15 = vld [vmem:[#allocation10 + $0x2c8] sm:$0xff]  ;;  %v8929_v16 = vcombine.high %v707_v13, %v711_v14 }
 0x17e   :  { %v9968_v49 = vpop.f32.mrb[5].mxu0  ;;  %v712_v17 = vld [vmem:[#allocation10 + $0x2e8] sm:$0xff]  ;;  %v10847_v10 = vshrl.u32 %v523_v6, 7 }
 0x17f   :  { %10069 = vmatmul.mubr.msk.f32.vlgmr.msra.gmra.mrb[8].mxu0 %vm183_vm0, %v353_v18  ;;  %v9969_v50 = vadd.f32 %v9968_v49, %v9967_v48  ;;  %v8928_v18 = vcombine.low %v707_v13, %v711_v14  ;;  %v8931_v20 = vcombine.high %v708_v15, %v712_v17  ;;  %6827 = vmatprep.subr.bf16.mxu1 %v8929_v16  ;;  %v804_v6 = vld [vmem:[#allocation10 + $0x5c8] sm:$0xff] }
 0x180   :  { %7134 = vmatpush1.bf16.msra.mxu0 %v8842_v36  ;;  %v672_v36 = vld [vmem:[#allocation10 + $0x1a8] sm:$0xff]  ;;  %v357_v51 = vpop.f32.mrb[4].mxu1 }
 0x181   :  { %7135 = vmatprep.subr.bf16.mxu0 %v8851_v19  ;;  %v8891_v38 = vcombine.high %v668_v35, %v672_v36  ;;  %v8890_v41 = vcombine.low %v668_v35, %v672_v36  ;;  %v9970_v52 = vpop.f32.mrb[6].mxu0  ;;  %v358_v53 = vadd.f32 %v9969_v50, %v357_v51  ;;  %v359_v54 = vpop.f32.mrb[5].mxu1  ;;  %v8930_v19 = vcombine.low %v708_v15, %v712_v17  ;;  %v735_v35 = vld [vmem:[#allocation10 + $0x3a0] sm:$0xff] }
 0x182   :  { %v9971_v55 = vpop.f32.mrb[7].mxu0  ;;  %6828 = vmatpush1.bf16.msra.mxu1 %v8928_v18  ;;  %v748_v54 = vld [vmem:[#allocation10 + $0x408] sm:$0xff]  ;;  %v755_v17 = vld [vmem:[#allocation10 + $0x440] sm:$0xff] }
 0x183   :  { %v9972_v56 = vadd.f32 %v9971_v55, %v9970_v52  ;;  %10071 = vmatprep.mubr.msk.f32.mxu0 %vm183_vm0, %v358_v53  ;;  %v747_v52 = vld [vmem:[#allocation10 + $0x400] sm:$0xff] }
 0x184   :  { %7136 = vmatpush1.bf16.msra.mxu0 %v8850_v0  ;;  %v362_v57 = vpop.f32.mrb[6].mxu1  ;;  %v719_v0 = vld [vmem:[#allocation10 + $0x320] sm:$0xff] }
 0x185   :  { %7137 = vmatprep.subr.bf16.mxu0 %v8859_v22  ;;  %v363_v61 = vadd.f32 %v9972_v56, %v362_v57  ;;  %v364_v1 = vpop.f32.mrb[7].mxu1  ;;  %v716_v22 = vld [vmem:[#allocation10 + $0x308] sm:$0xff]  ;;  %v8937_v23 = vcombine.high %v715_v21, %v719_v0  ;;  %v751_v53 = vld [vmem:[#allocation10 + $0x420] sm:$0xff] }
 0x186   :  { %v8939_v27 = vcombine.high %v716_v22, %v720_v24  ;;  %v8969_v55 = vcombine.high %v747_v52, %v751_v53  ;;  %v752_v56 = vld [vmem:[#allocation10 + $0x428] sm:$0xff]  ;;  %v8968_v57 = vcombine.low %v747_v52, %v751_v53  ;;  %v759_v18 = vld [vmem:[#allocation10 + $0x460] sm:$0xff] }
 0x187   :  { %10072 = vmatmul.mubr.msk.f32.gmra.mrb[10].mxu0 %vm183_vm0, %v363_v61  ;;  %6829 = vmatprep.subr.bf16.mxu1 %v8937_v23  ;;  %v8970_v58 = vcombine.low %v748_v54, %v752_v56  ;;  %v8971_v59 = vcombine.high %v748_v54, %v752_v56  ;;  %v763_v23 = vld [vmem:[#allocation10 + $0x480] sm:$0xff]  ;;  %v788_v52 = vld [vmem:[#allocation10 + $0x548] sm:$0xff] }
 0x188   :  { %7138 = vmatpush1.bf16.msra.mxu0 %v8858_v25  ;;  %v8936_v25 = vcombine.low %v715_v21, %v719_v0  ;;  %v792_v53 = vld [vmem:[#allocation10 + $0x568] sm:$0xff] }
 0x189   :  { %7139 = vmatprep.subr.bf16.mxu0 %v8867_v26  ;;  %v8938_v26 = vcombine.low %v716_v22, %v720_v24 }
 0x18a   :  { %6830 = vmatpush1.bf16.msra.mxu1 %v8936_v25  ;;  %v8977_v25 = vcombine.high %v755_v17, %v759_v18 }
 0x18c   :  { %7140 = vmatpush1.bf16.msra.mxu0 %v8866_v29  ;;  %v727_v29 = vld [vmem:[#allocation10 + $0x360] sm:$0xff] }
 0x18d   :  { %7141 = vmatprep.subr.bf16.mxu0 %v8875_v31  ;;  %v724_v31 = vld [vmem:[#allocation10 + $0x348] sm:$0xff]  ;;  %v8944_v32 = vcombine.low %v723_v28, %v727_v29  ;;  %v8945_v34 = vcombine.high %v723_v28, %v727_v29 }
 0x18e   :  { %v764_v28 = vld [vmem:[#allocation10 + $0x488] sm:$0xff] }
 0x18f   :  { %6831 = vmatprep.subr.bf16.mxu1 %v8945_v34  ;;  %v768_v29 = vld [vmem:[#allocation10 + $0x4a8] sm:$0xff] }
 0x190   :  { %7142 = vmatpush1.bf16.msra.mxu0 %v8874_v30  ;;  %v728_v30 = vld [vmem:[#allocation10 + $0x368] sm:$0xff]  ;;  %6832 = vmatpush1.bf16.msra.mxu1 %v8944_v32 }
 0x191   :  { %7143 = vmatprep.subr.bf16.mxu0 %v8883_v33  ;;  %v731_v33 = vld [vmem:[#allocation10 + $0x380] sm:$0xff]  ;;  %v8946_v36 = vcombine.low %v724_v31, %v728_v30 }
 0x194   :  { %7144 = vmatpush1.bf16.msra.mxu0 %v8882_v37  ;;  %v8947_v37 = vcombine.high %v724_v31, %v728_v30  ;;  %v8976_v31 = vcombine.low %v755_v17, %v759_v18  ;;  %v8987_v30 = vcombine.high %v764_v28, %v768_v29  ;;  %v812_v17 = vld [vmem:[#allocation10 + $0x608] sm:$0xff] }
 0x195   :  { %7145 = vmatprep.subr.bf16.mxu0 %v8891_v38  ;;  %v8953_v38 = vcombine.high %v731_v33, %v735_v35  ;;  %v816_v18 = vld [vmem:[#allocation10 + $0x628] sm:$0xff] }
 0x197   :  { %6833 = vmatprep.subr.bf16.mxu1 %v8953_v38 }
 0x198   :  { %7146 = vmatpush1.bf16.msra.mxu0 %v8890_v41  ;;  %v739_v41 = vld [vmem:[#allocation10 + $0x3c0] sm:$0xff] }
 0x199   :  { %7147 = vmatprep.subr.bf16.mxu0 %v8899_v42  ;;  %v8955_v42 = vcombine.high %v732_v39, %v736_v40  ;;  %v8961_v48 = vcombine.high %v739_v41, %v743_v43  ;;  %v8960_v50 = vcombine.low %v739_v41, %v743_v43  ;;  %v783_v43 = vld [vmem:[#allocation10 + $0x520] sm:$0xff] }
 0x19c   :  { %7148 = vmatpush1.bf16.msra.mxu0 %v8898_v45  ;;  %v744_v45 = vld [vmem:[#allocation10 + $0x3e8] sm:$0xff] }
 0x19d   :  { %7149 = vmatprep.subr.bf16.mxu0 %v8907_v46  ;;  %v8952_v46 = vcombine.low %v731_v33, %v735_v35  ;;  %v8963_v49 = vcombine.high %v740_v44, %v744_v45  ;;  %v8962_v51 = vcombine.low %v740_v44, %v744_v45  ;;  %v771_v33 = vld [vmem:[#allocation10 + $0x4c0] sm:$0xff]  ;;  %v780_v44 = vld [vmem:[#allocation10 + $0x508] sm:$0xff] }
 0x19e   :  { %v775_v35 = vld [vmem:[#allocation10 + $0x4e0] sm:$0xff]  ;;  %v784_v45 = vld [vmem:[#allocation10 + $0x528] sm:$0xff] }
 0x19f   :  { %6834 = vmatpush1.bf16.msra.mxu1 %v8952_v46  ;;  %v8992_v46 = vcombine.low %v771_v33, %v775_v35 }
 0x1a0   :  { %7150 = vmatpush1.bf16.msra.mxu0 %v8906_v47  ;;  %v8954_v47 = vcombine.low %v732_v39, %v736_v40  ;;  %6835 = vmatprep.subr.bf16.mxu1 %v8961_v48  ;;  %v8986_v39 = vcombine.low %v764_v28, %v768_v29  ;;  %v8993_v40 = vcombine.high %v771_v33, %v775_v35  ;;  %v824_v28 = vld [vmem:[#allocation10 + $0x668] sm:$0xff]  ;;  %v831_v33 = vld [vmem:[#allocation10 + $0x6a0] sm:$0xff] }
 0x1a1   :  { %7151 = vmatprep.subr.bf16.mxu0 %v8915_v4  ;;  %v10532_v4 = vmov 1983009808   ;;  %v828_v35 = vld [vmem:[#allocation10 + $0x688] sm:$0xff] }
 0x1a2   :  { %v521_v5 = vunpack.c.l.s4 %v10532_v4  ;;  %v803_v4 = vld [vmem:[#allocation10 + $0x5c0] sm:$0xff] }
 0x1a3   :  { %6836 = vmatpush1.bf16.msra.mxu1 %v8960_v50  ;;  %v787_v50 = vld [vmem:[#allocation10 + $0x540] sm:$0xff] }
 0x1a4   :  { %7152 = vmatpush1.bf16.msra.mxu0 %v8914_v3  ;;  %6846 = vmatprep.subr.bf16.mxu1 %v8969_v55  ;;  %v522_v9 = vunpack.c.0.s8 %v521_v5  ;;  %v9002_v55 = vcombine.low %v780_v44, %v784_v45  ;;  %v807_v5 = vld [vmem:[#allocation10 + $0x5e0] sm:$0xff] }
 0x1a5   :  { %7153 = vmatprep.subr.bf16.mxu0 %v8923_v12 }
 0x1a8   :  { %7154 = vmatpush1.bf16.msra.mxu0 %v8922_v11  ;;  %v10850_v11 = vsub.s32 %v522_v9, %v10847_v10 }
 0x1a9   :  { %7155 = vmatprep.subr.bf16.mxu0 %v8931_v20  ;;  %v760_v20 = vld [vmem:[#allocation10 + $0x468] sm:$0xff] }
 0x1ac   :  { %7156 = vmatpush1.bf16.msra.mxu0 %v8930_v19  ;;  %v756_v19 = vld [vmem:[#allocation10 + $0x448] sm:$0xff] }
 0x1ad   :  { %7157 = vmatprep.subr.bf16.mxu0 %v8939_v27  ;;  %v767_v27 = vld [vmem:[#allocation10 + $0x4a0] sm:$0xff]  ;;  %v8978_v32 = vcombine.low %v756_v19, %v760_v20 }
 0x1ae   :  { %v8985_v34 = vcombine.high %v763_v23, %v767_v27  ;;  %v8984_v38 = vcombine.low %v763_v23, %v767_v27  ;;  %v9035_v23 = vcombine.high %v812_v17, %v816_v18  ;;  %v820_v27 = vld [vmem:[#allocation10 + $0x648] sm:$0xff] }
 0x1b0   :  { %7158 = vmatpush1.bf16.msra.mxu0 %v8938_v26  ;;  %v8979_v26 = vcombine.high %v756_v19, %v760_v20  ;;  %v9024_v19 = vcombine.low %v803_v4, %v807_v5 }
 0x1b1   :  { %7159 = vmatprep.subr.bf16.mxu0 %v8947_v37  ;;  %v776_v37 = vld [vmem:[#allocation10 + $0x4e8] sm:$0xff] }
 0x1b4   :  { %7160 = vmatpush1.bf16.msra.mxu0 %v8946_v36  ;;  %v772_v36 = vld [vmem:[#allocation10 + $0x4c8] sm:$0xff] }
 0x1b5   :  { %7161 = vmatprep.subr.bf16.mxu0 %v8955_v42  ;;  %v8995_v41 = vcombine.high %v772_v36, %v776_v37  ;;  %v779_v42 = vld [vmem:[#allocation10 + $0x500] sm:$0xff] }
 0x1b6   :  { %v9001_v48 = vcombine.high %v779_v42, %v783_v43  ;;  %v9000_v54 = vcombine.low %v779_v42, %v783_v43  ;;  %v839_v42 = vld [vmem:[#allocation10 + $0x6e0] sm:$0xff]  ;;  %v836_v43 = vld [vmem:[#allocation10 + $0x6c8] sm:$0xff] }
 0x1b8   :  { %7162 = vmatpush1.bf16.msra.mxu0 %v8954_v47  ;;  %v8994_v47 = vcombine.low %v772_v36, %v776_v37  ;;  %v832_v36 = vld [vmem:[#allocation10 + $0x6a8] sm:$0xff] }
 0x1b9   :  { %7163 = vmatprep.subr.bf16.mxu0 %v8963_v49  ;;  %v9003_v49 = vcombine.high %v780_v44, %v784_v45  ;;  %v840_v44 = vld [vmem:[#allocation10 + $0x6e8] sm:$0xff] }
 0x1bc   :  { %7164 = vmatpush1.bf16.msra.mxu0 %v8962_v51  ;;  %v791_v51 = vld [vmem:[#allocation10 + $0x560] sm:$0xff] }
 0x1bd   :  { %7174 = vmatprep.subr.bf16.mxu0 %v8971_v59  ;;  %v9009_v56 = vcombine.high %v787_v50, %v791_v51  ;;  %v799_v59 = vld [vmem:[#allocation10 + $0x5a0] sm:$0xff] }
 0x252   :  { %v10070_v61 = vpop.f32.mrb[8].mxu0 }
 0x253   :  { %v458_v62 = vadd.f32 %v10070_v61, %v10843_v60  ;;  %v452_v63 = vpop.f32.mrb[9].mxu0  ;;  %v796_v61 = vld [vmem:[#allocation10 + $0x588] sm:$0xff] }
 0x254   :  { %v453_v1 = vadd.f32 %v10843_v60, %v452_v63  ;;  %v9008_v63 = vcombine.low %v787_v50, %v791_v51  ;;  %v847_v50 = vld [vmem:[#allocation10 + $0x720] sm:$0xff]  ;;  %v844_v51 = vld [vmem:[#allocation10 + $0x708] sm:$0xff] }
 0x255   :  { %v472_v2 = vmax.f32 %v458_v62, 0.0  ;;  %v800_v62 = vld [vmem:[#allocation10 + $0x5a8] sm:$0xff] }
 0x256   :  { %v471_v3 = vmax.f32 %v453_v1, 0.0  ;;  %v9010_v1 = vcombine.low %v788_v52, %v792_v53  ;;  %v9018_v9 = vcombine.low %v796_v61, %v800_v62 }
 0x257   :  { %476 = vst [vmem:[#allocation2 + $0x8] sm:$0xff] %v472_v2 }
 0x258   :  { %475 = vst [vmem:[#allocation2] sm:$0xff] %v471_v3  ;;  %v9019_v3 = vcombine.high %v796_v61, %v800_v62  ;;  %v856_v61 = vld [vmem:[#allocation10 + $0x768] sm:$0xff] }
 0x25e   :  { %v487_v7 = vld [vmem:[#allocation2 + $0x8] sm:$0xff]  }
 0x25f   :  { %488 = vst [vmem:[#allocation3 + $0x8] sm:$0xff] %v487_v7   ;;  %v479_v8 = vld [vmem:[#allocation2] sm:$0xff]   ;;  %v808_v7 = vld [vmem:[#allocation10 + $0x5e8] sm:$0xff] }
 0x260   :  { %480 = vst [vmem:[#allocation3] sm:$0xff] %v479_v8   ;;  %v9026_v20 = vcombine.low %v804_v6, %v808_v7 }
 0x267   :  { %v511_v12 = vld [vmem:[#allocation3] sm:$0xff] }
 0x268   :  { %v526_v13 = vrot.slane %v511_v12, %v10850_v11  ;;  %v519_v14 = vcombine.high %v511_v12, %v511_v12  ;;  %v9025_v12 = vcombine.high %v803_v4, %v807_v5  ;;  %v863_v4 = vld [vmem:[#allocation10 + $0x7a0] sm:$0xff]  ;;  %v860_v5 = vld [vmem:[#allocation10 + $0x788] sm:$0xff] }
 0x26a   :  { %v534_v15 = vcombine.high %v526_v13, %v526_v13  ;;  %v10854_v16 = vrot.slane %v519_v14, %v10850_v11  ;;  %v10860_v22 = vpack.c.bf16 %v526_v13, %v526_v13  ;;  %v9027_v13 = vcombine.high %v804_v6, %v808_v7  ;;  %v811_v14 = vld [vmem:[#allocation10 + $0x600] sm:$0xff]  ;;  %v864_v6 = vld [vmem:[#allocation10 + $0x7a8] sm:$0xff] }
 0x26c   :  { %v10856_v21 = vpack.c.bf16 %v534_v15, %v534_v15  ;;  %v535_v0 = vcombine.high %v10854_v16, %v10854_v16  ;;  %v815_v15 = vld [vmem:[#allocation10 + $0x620] sm:$0xff] }
 0x26d   :  { %v9032_v29 = vcombine.low %v811_v14, %v815_v15 }
 0x26e   :  { %6837 = vmatprep.mubr.bf16.mxu1 %v10856_v21  ;;  %7165 = vmatprep.mubr.bf16.mxu0 %v10856_v21  ;;  %v10864_v24 = vpack.c.bf16 %v535_v0, %v535_v0  ;;  %v9033_v0 = vcombine.high %v811_v14, %v815_v15  ;;  %v871_v14 = vld [vmem:[#allocation10 + $0x7e0] sm:$0xff]  ;;  %v868_v15 = vld [vmem:[#allocation10 + $0x7c8] sm:$0xff] }
 0x26f   :  { %6838 = vmatmul.mubr.bf16.vlgmr.msra.gmra.mrb[8].mxu1 %v10860_v22  ;;  %7166 = vmatmul.mubr.bf16.vlgmr.msra.gmra.mrb[12].mxu0 %v10860_v22 }
 0x270   :  { %6847 = vmatpush1.bf16.msra.mxu1 %v8968_v57  ;;  %7175 = vmatpush1.bf16.msra.mxu0 %v8970_v58  ;;  %v9011_v57 = vcombine.high %v788_v52, %v792_v53  ;;  %v795_v58 = vld [vmem:[#allocation10 + $0x580] sm:$0xff]  ;;  %v848_v52 = vld [vmem:[#allocation10 + $0x728] sm:$0xff] }
 0x271   :  { %6878 = vmatprep.mubr.bf16.mxu1 %v10864_v24  ;;  %7206 = vmatprep.mubr.bf16.mxu0 %v10864_v24  ;;  %v9017_v2 = vcombine.high %v795_v58, %v799_v59  ;;  %v9016_v8 = vcombine.low %v795_v58, %v799_v59  ;;  %v855_v58 = vld [vmem:[#allocation10 + $0x760] sm:$0xff]  ;;  %v852_v59 = vld [vmem:[#allocation10 + $0x748] sm:$0xff] }
 0x272   :  { %6848 = vmatprep.subr.bf16.mxu1 %v8977_v25  ;;  %7176 = vmatprep.subr.bf16.mxu0 %v8979_v26  ;;  %v819_v25 = vld [vmem:[#allocation10 + $0x640] sm:$0xff] }
 0x273   :  { %v823_v26 = vld [vmem:[#allocation10 + $0x660] sm:$0xff] }
 0x274   :  { %6849 = vmatpush1.bf16.msra.mxu1 %v8976_v31  ;;  %7177 = vmatpush1.bf16.msra.mxu0 %v8978_v32  ;;  %v9034_v31 = vcombine.low %v812_v17, %v816_v18  ;;  %v9041_v32 = vcombine.high %v819_v25, %v823_v26  ;;  %v9040_v37 = vcombine.low %v819_v25, %v823_v26  ;;  %v872_v17 = vld [vmem:[#allocation10 + $0x7e8] sm:$0xff]  ;;  %v10870_v18 = vld [vmem:[#allocation3 + $0x8] sm:$0xff]  ;;  %v10073_v26 = vpop.f32.mrb[10].mxu0 }
 0x275   :  { %6850 = vmatprep.subr.bf16.mxu1 %v8985_v34  ;;  %7178 = vmatprep.subr.bf16.mxu0 %v8987_v30  ;;  %v9043_v34 = vcombine.high %v820_v27, %v824_v28  ;;  %v827_v30 = vld [vmem:[#allocation10 + $0x680] sm:$0xff] }
 0x276   :  { %v9048_v45 = vcombine.low %v827_v30, %v831_v33  ;;  %v875_v25 = vld [vmem:[#allocation10 + $0x800] sm:$0xff] }
 0x278   :  { %6851 = vmatpush1.bf16.msra.mxu1 %v8984_v38  ;;  %7179 = vmatpush1.bf16.msra.mxu0 %v8986_v39  ;;  %v9042_v38 = vcombine.low %v820_v27, %v824_v28  ;;  %v9049_v39 = vcombine.high %v827_v30, %v831_v33  ;;  %v879_v27 = vld [vmem:[#allocation10 + $0x820] sm:$0xff]  ;;  %v876_v28 = vld [vmem:[#allocation10 + $0x808] sm:$0xff] }
 0x279   :  { %6852 = vmatprep.subr.bf16.mxu1 %v8993_v40  ;;  %7180 = vmatprep.subr.bf16.mxu0 %v8995_v41  ;;  %v9051_v40 = vcombine.high %v828_v35, %v832_v36  ;;  %v835_v41 = vld [vmem:[#allocation10 + $0x6c0] sm:$0xff] }
 0x27a   :  { %v9056_v53 = vcombine.low %v835_v41, %v839_v42 }
 0x27c   :  { %6853 = vmatpush1.bf16.msra.mxu1 %v8992_v46  ;;  %7181 = vmatpush1.bf16.msra.mxu0 %v8994_v47  ;;  %v9050_v46 = vcombine.low %v828_v35, %v832_v36  ;;  %v9057_v47 = vcombine.high %v835_v41, %v839_v42  ;;  %v9090_v35 = vcombine.low %v868_v15, %v872_v17  ;;  %v883_v41 = vld [vmem:[#allocation10 + $0x840] sm:$0xff] }
 0x27d   :  { %6854 = vmatprep.subr.bf16.mxu1 %v9001_v48  ;;  %7182 = vmatprep.subr.bf16.mxu0 %v9003_v49  ;;  %v9059_v48 = vcombine.high %v836_v43, %v840_v44  ;;  %v843_v49 = vld [vmem:[#allocation10 + $0x700] sm:$0xff] }
 0x27e   :  { %v9064_v62 = vcombine.low %v843_v49, %v847_v50  ;;  %v887_v42 = vld [vmem:[#allocation10 + $0x860] sm:$0xff] }
 0x280   :  { %6855 = vmatpush1.bf16.msra.mxu1 %v9000_v54  ;;  %7183 = vmatpush1.bf16.msra.mxu0 %v9002_v55  ;;  %v9058_v54 = vcombine.low %v836_v43, %v840_v44  ;;  %v9065_v55 = vcombine.high %v843_v49, %v847_v50  ;;  %v884_v43 = vld [vmem:[#allocation10 + $0x848] sm:$0xff]  ;;  %v891_v50 = vld [vmem:[#allocation10 + $0x880] sm:$0xff] }
 0x281   :  { %6856 = vmatprep.subr.bf16.mxu1 %v9009_v56  ;;  %7184 = vmatprep.subr.bf16.mxu0 %v9011_v57  ;;  %v9067_v56 = vcombine.high %v844_v51, %v848_v52  ;;  %v851_v57 = vld [vmem:[#allocation10 + $0x740] sm:$0xff]  ;;  %v888_v44 = vld [vmem:[#allocation10 + $0x868] sm:$0xff] }
 0x282   :  { %v9072_v7 = vcombine.low %v851_v57, %v855_v58  ;;  %v9107_v49 = vcombine.high %v884_v43, %v888_v44 }
 0x284   :  { %6857 = vmatpush1.bf16.msra.mxu1 %v9008_v63  ;;  %7185 = vmatpush1.bf16.msra.mxu0 %v9010_v1  ;;  %v9066_v63 = vcombine.low %v844_v51, %v848_v52  ;;  %v9073_v1 = vcombine.high %v851_v57, %v855_v58  ;;  %v895_v51 = vld [vmem:[#allocation10 + $0x8a0] sm:$0xff]  ;;  %v892_v52 = vld [vmem:[#allocation10 + $0x888] sm:$0xff] }
 0x285   :  { %6858 = vmatprep.subr.bf16.mxu1 %v9017_v2  ;;  %7186 = vmatprep.subr.bf16.mxu0 %v9019_v3  ;;  %v9075_v2 = vcombine.high %v852_v59, %v856_v61  ;;  %v859_v3 = vld [vmem:[#allocation10 + $0x780] sm:$0xff] }
 0x286   :  { %v899_v58 = vld [vmem:[#allocation10 + $0x8c0] sm:$0xff] }
 0x288   :  { %6859 = vmatpush1.bf16.msra.mxu1 %v9016_v8  ;;  %7187 = vmatpush1.bf16.msra.mxu0 %v9018_v9  ;;  %v9074_v8 = vcombine.low %v852_v59, %v856_v61  ;;  %v9081_v9 = vcombine.high %v859_v3, %v863_v4  ;;  %v903_v59 = vld [vmem:[#allocation10 + $0x8e0] sm:$0xff] }
 0x289   :  { %6860 = vmatprep.subr.bf16.mxu1 %v9025_v12  ;;  %7188 = vmatprep.subr.bf16.mxu0 %v9027_v13  ;;  %v9083_v12 = vcombine.high %v860_v5, %v864_v6  ;;  %v867_v13 = vld [vmem:[#allocation10 + $0x7c0] sm:$0xff] }
 0x28a   :  { %v9088_v33 = vcombine.low %v867_v13, %v871_v14 }
 0x28c   :  { %6861 = vmatpush1.bf16.msra.mxu1 %v9024_v19  ;;  %7189 = vmatpush1.bf16.msra.mxu0 %v9026_v20  ;;  %v9080_v19 = vcombine.low %v859_v3, %v863_v4  ;;  %v9082_v20 = vcombine.low %v860_v5, %v864_v6  ;;  %v9121_v3 = vcombine.high %v899_v58, %v903_v59  ;;  %v907_v5 = vld [vmem:[#allocation10 + $0x900] sm:$0xff] }
 0x28d   :  { %6862 = vmatprep.subr.bf16.mxu1 %v9033_v0  ;;  %7190 = vmatprep.subr.bf16.mxu0 %v9035_v23  ;;  %v9089_v0 = vcombine.high %v867_v13, %v871_v14  ;;  %v9091_v23 = vcombine.high %v868_v15, %v872_v17  ;;  %v911_v6 = vld [vmem:[#allocation10 + $0x920] sm:$0xff] }
 0x28e   :  { %v9129_v13 = vcombine.high %v907_v5, %v911_v6  ;;  %v915_v15 = vld [vmem:[#allocation10 + $0x940] sm:$0xff] }
 0x28f   :  { %v919_v17 = vld [vmem:[#allocation10 + $0x960] sm:$0xff] }
 0x290   :  { %6863 = vmatpush1.bf16.msra.mxu1 %v9032_v29  ;;  %7191 = vmatpush1.bf16.msra.mxu0 %v9034_v31  ;;  %v880_v29 = vld [vmem:[#allocation10 + $0x828] sm:$0xff]  ;;  %v10874_v31 = vrot.slane %v10870_v18, %v10850_v11 }
 0x291   :  { %6864 = vmatprep.subr.bf16.mxu1 %v9041_v32  ;;  %7192 = vmatprep.subr.bf16.mxu0 %v9043_v34  ;;  %v468_v32 = vadd.f32 %v10073_v26, %v10843_v60  ;;  %v462_v34 = vpop.f32.mrb[11].mxu0 }
 0x292   :  { %v463_v30 = vadd.f32 %v10843_v60, %v462_v34  ;;  %v9096_v60 = vcombine.low %v875_v25, %v879_v27  ;;  %v9136_v34 = vcombine.low %v915_v15, %v919_v17 }
 0x293   :  { %v474_v36 = vmax.f32 %v468_v32, 0.0  ;;  %v928_v32 = vld [vmem:[#allocation10 + $0x9a8] sm:$0xff] }
 0x294   :  { %6865 = vmatpush1.bf16.msra.mxu1 %v9040_v37  ;;  %7193 = vmatpush1.bf16.msra.mxu0 %v9042_v38  ;;  %v9097_v37 = vcombine.high %v875_v25, %v879_v27  ;;  %v9099_v38 = vcombine.high %v876_v28, %v880_v29  ;;  %v9137_v25 = vcombine.high %v915_v15, %v919_v17  ;;  %v923_v27 = vld [vmem:[#allocation10 + $0x980] sm:$0xff] }
 0x295   :  { %6866 = vmatprep.subr.bf16.mxu1 %v9049_v39  ;;  %7194 = vmatprep.subr.bf16.mxu0 %v9051_v40  ;;  %v473_v39 = vmax.f32 %v463_v30, 0.0  ;;  %v551_v40 = vcombine.high %v10874_v31, %v10874_v31  ;;  %478 = vst [vmem:[#allocation2 + $0x18] sm:$0xff] %v474_v36  ;;  %v931_v36 = vld [vmem:[#allocation10 + $0x9c0] sm:$0xff] }
 0x296   :  { %v971_v17 = vld [vmem:[#allocation10 + $0xb00] sm:$0xff] }
 0x297   :  { %477 = vst [vmem:[#allocation2 + $0x10] sm:$0xff] %v473_v39  ;;  %v936_v39 = vld [vmem:[#allocation10 + $0x9e8] sm:$0xff] }
 0x298   :  { %6867 = vmatpush1.bf16.msra.mxu1 %v9048_v45  ;;  %7195 = vmatpush1.bf16.msra.mxu0 %v9050_v46  ;;  %v10882_v45 = vpack.c.bf16 %v10854_v16, %v10854_v16  ;;  %v9098_v46 = vcombine.low %v876_v28, %v880_v29  ;;  %v9104_v16 = vcombine.low %v883_v41, %v887_v42  ;;  %v927_v28 = vld [vmem:[#allocation10 + $0x9a0] sm:$0xff]  ;;  %v924_v29 = vld [vmem:[#allocation10 + $0x988] sm:$0xff] }
 0x299   :  { %6868 = vmatprep.subr.bf16.mxu1 %v9057_v47  ;;  %7196 = vmatprep.subr.bf16.mxu0 %v9059_v48  ;;  %v10884_v47 = vpack.c.bf16 %v551_v40, %v551_v40  ;;  %v9105_v48 = vcombine.high %v883_v41, %v887_v42  ;;  %v9144_v40 = vcombine.low %v923_v27, %v927_v28 }
 0x29a   :  { %v9146_v41 = vcombine.low %v924_v29, %v928_v32 }
 0x29c   :  { %6869 = vmatpush1.bf16.msra.mxu1 %v9056_v53  ;;  %7197 = vmatpush1.bf16.msra.mxu0 %v9058_v54  ;;  %v896_v53 = vld [vmem:[#allocation10 + $0x8a8] sm:$0xff]  ;;  %v9106_v54 = vcombine.low %v884_v43, %v888_v44  ;;  %v939_v44 = vld [vmem:[#allocation10 + $0xa00] sm:$0xff] }
 0x29d   :  { %6870 = vmatprep.subr.bf16.mxu1 %v9065_v55  ;;  %7198 = vmatprep.subr.bf16.mxu0 %v9067_v56  ;;  %v9113_v55 = vcombine.high %v891_v50, %v895_v51  ;;  %v503_v56 = vld [vmem:[#allocation2 + $0x18] sm:$0xff]   ;;  %v9115_v57 = vcombine.high %v892_v52, %v896_v53 }
 0x29e   :  { %504 = vst [vmem:[#allocation3 + $0x18] sm:$0xff] %v503_v56   ;;  %v495_v61 = vld [vmem:[#allocation2 + $0x10] sm:$0xff]  }
 0x29f   :  { %496 = vst [vmem:[#allocation3 + $0x10] sm:$0xff] %v495_v61   ;;  %v955_v61 = vld [vmem:[#allocation10 + $0xa80] sm:$0xff] }
 0x2a0   :  { %6871 = vmatpush1.bf16.msra.mxu1 %v9064_v62  ;;  %7199 = vmatpush1.bf16.msra.mxu0 %v9066_v63  ;;  %v900_v62 = vld [vmem:[#allocation10 + $0x8c8] sm:$0xff] }
 0x2a1   :  { %6872 = vmatprep.subr.bf16.mxu1 %v9073_v1  ;;  %7200 = vmatprep.subr.bf16.mxu0 %v9075_v2  ;;  %v904_v63 = vld [vmem:[#allocation10 + $0x8e8] sm:$0xff]  ;;  %v9112_v1 = vcombine.low %v891_v50, %v895_v51  ;;  %v9114_v2 = vcombine.low %v892_v52, %v896_v53  ;;  %v947_v53 = vld [vmem:[#allocation10 + $0xa40] sm:$0xff] }
 0x2a2   :  { %v9123_v4 = vcombine.high %v900_v62, %v904_v63 }
 0x2a4   :  { %6873 = vmatpush1.bf16.msra.mxu1 %v9072_v7  ;;  %7201 = vmatpush1.bf16.msra.mxu0 %v9074_v8  ;;  %v908_v7 = vld [vmem:[#allocation10 + $0x908] sm:$0xff] }
 0x2a5   :  { %6874 = vmatprep.subr.bf16.mxu1 %v9081_v9  ;;  %7202 = vmatprep.subr.bf16.mxu0 %v9083_v12  ;;  %v912_v8 = vld [vmem:[#allocation10 + $0x928] sm:$0xff]  ;;  %v9120_v9 = vcombine.low %v899_v58, %v903_v59  ;;  %v9122_v12 = vcombine.low %v900_v62, %v904_v63  ;;  %v959_v62 = vld [vmem:[#allocation10 + $0xaa0] sm:$0xff] }
 0x2a6   :  { %v9131_v14 = vcombine.high %v908_v7, %v912_v8  ;;  %v956_v63 = vld [vmem:[#allocation10 + $0xa88] sm:$0xff] }
 0x2a8   :  { %6875 = vmatpush1.bf16.msra.mxu1 %v9080_v19  ;;  %7203 = vmatpush1.bf16.msra.mxu0 %v9082_v20  ;;  %v916_v19 = vld [vmem:[#allocation10 + $0x948] sm:$0xff] }
 0x2a9   :  { %6876 = vmatprep.subr.bf16.mxu1 %v9089_v0  ;;  %7204 = vmatprep.subr.bf16.mxu0 %v9091_v23  ;;  %v920_v20 = vld [vmem:[#allocation10 + $0x968] sm:$0xff]  ;;  %v9128_v0 = vcombine.low %v907_v5, %v911_v6  ;;  %v9130_v23 = vcombine.low %v908_v7, %v912_v8  ;;  %v963_v6 = vld [vmem:[#allocation10 + $0xac0] sm:$0xff] }
 0x2aa   :  { %v9139_v26 = vcombine.high %v916_v19, %v920_v20  ;;  %v9138_v30 = vcombine.low %v916_v19, %v920_v20  ;;  %v967_v7 = vld [vmem:[#allocation10 + $0xae0] sm:$0xff]  ;;  %v964_v8 = vld [vmem:[#allocation10 + $0xac8] sm:$0xff] }
 0x2ab   :  { %v975_v19 = vld [vmem:[#allocation10 + $0xb20] sm:$0xff]  ;;  %v972_v20 = vld [vmem:[#allocation10 + $0xb08] sm:$0xff] }
 0x2ac   :  { %6877 = vmatpush1.bf16.msra.mxu1 %v9088_v33  ;;  %7205 = vmatpush1.bf16.msra.mxu0 %v9090_v35  ;;  %v9145_v33 = vcombine.high %v923_v27, %v927_v28  ;;  %v9147_v35 = vcombine.high %v924_v29, %v928_v32  ;;  %v979_v28 = vld [vmem:[#allocation10 + $0xb40] sm:$0xff]  ;;  %v980_v32 = vld [vmem:[#allocation10 + $0xb48] sm:$0xff] }
 0x2ad   :  { %6887 = vmatprep.subr.bf16.mxu1 %v9097_v37  ;;  %7215 = vmatprep.subr.bf16.mxu0 %v9099_v38  ;;  %v935_v37 = vld [vmem:[#allocation10 + $0x9e0] sm:$0xff]  ;;  %v932_v38 = vld [vmem:[#allocation10 + $0x9c8] sm:$0xff] }
 0x2ae   :  { %v9153_v42 = vcombine.high %v931_v36, %v935_v37  ;;  %v9155_v43 = vcombine.high %v932_v38, %v936_v39  ;;  %v9154_v50 = vcombine.low %v932_v38, %v936_v39  ;;  %v983_v29 = vld [vmem:[#allocation10 + $0xb60] sm:$0xff]  ;;  %v988_v39 = vld [vmem:[#allocation10 + $0xb88] sm:$0xff] }
 0x2af   :  { %6879 = vmatmul.mubr.bf16.vlgmr.msra.gmra.mrb[8].mxu1 %v10882_v45  ;;  %7207 = vmatmul.mubr.bf16.vlgmr.msra.gmra.mrb[12].mxu0 %v10882_v45  ;;  %v991_v38 = vld [vmem:[#allocation10 + $0xba0] sm:$0xff] }
 0x2b0   :  { %6888 = vmatpush1.bf16.msra.mxu1 %v9096_v60  ;;  %6919 = vmatprep.mubr.bf16.mxu1 %v10884_v47  ;;  %v943_v60 = vld [vmem:[#allocation10 + $0xa20] sm:$0xff] }
 0x2b1   :  { %7216 = vmatpush1.bf16.msra.mxu0 %v9098_v46  ;;  %7247 = vmatprep.mubr.bf16.mxu0 %v10884_v47  ;;  %v940_v46 = vld [vmem:[#allocation10 + $0xa08] sm:$0xff]  ;;  %v9161_v51 = vcombine.high %v939_v44, %v943_v60  ;;  %v9160_v56 = vcombine.low %v939_v44, %v943_v60  ;;  %v995_v60 = vld [vmem:[#allocation10 + $0xbc0] sm:$0xff] }
 0x2b2   :  { %6889 = vmatprep.subr.bf16.mxu1 %v9105_v48  ;;  %7217 = vmatprep.subr.bf16.mxu0 %v9107_v49  ;;  %v944_v48 = vld [vmem:[#allocation10 + $0xa28] sm:$0xff]  ;;  %v9152_v49 = vcombine.low %v931_v36, %v935_v37  ;;  %v987_v37 = vld [vmem:[#allocation10 + $0xb80] sm:$0xff] }
 0x2b3   :  { %v9163_v52 = vcombine.high %v940_v46, %v944_v48 }
 0x2b4   :  { %6890 = vmatpush1.bf16.msra.mxu1 %v9104_v16  ;;  %v951_v16 = vld [vmem:[#allocation10 + $0xa60] sm:$0xff] }
 0x2b5   :  { %7218 = vmatpush1.bf16.msra.mxu0 %v9106_v54  ;;  %6891 = vmatprep.subr.bf16.mxu1 %v9113_v55  ;;  %v948_v54 = vld [vmem:[#allocation10 + $0xa48] sm:$0xff]  ;;  %v9169_v58 = vcombine.high %v947_v53, %v951_v16 }
 0x2b6   :  { %7219 = vmatprep.subr.bf16.mxu0 %v9115_v57  ;;  %v952_v55 = vld [vmem:[#allocation10 + $0xa68] sm:$0xff]  ;;  %v9162_v57 = vcombine.low %v940_v46, %v944_v48  ;;  %v999_v46 = vld [vmem:[#allocation10 + $0xbe0] sm:$0xff] }
 0x2b7   :  { %v9171_v59 = vcombine.high %v948_v54, %v952_v55  ;;  %v996_v48 = vld [vmem:[#allocation10 + $0xbc8] sm:$0xff] }
 0x2b8   :  { %6892 = vmatpush1.bf16.msra.mxu1 %v9112_v1  ;;  %v960_v1 = vld [vmem:[#allocation10 + $0xaa8] sm:$0xff] }
 0x2b9   :  { %7220 = vmatpush1.bf16.msra.mxu0 %v9114_v2  ;;  %6893 = vmatprep.subr.bf16.mxu1 %v9121_v3  ;;  %v9168_v2 = vcombine.low %v947_v53, %v951_v16  ;;  %v9170_v3 = vcombine.low %v948_v54, %v952_v55  ;;  %v9179_v5 = vcombine.high %v956_v63, %v960_v1  ;;  %v1003_v54 = vld [vmem:[#allocation10 + $0xc00] sm:$0xff] }
 0x2ba   :  { %7221 = vmatprep.subr.bf16.mxu0 %v9123_v4  ;;  %v9177_v4 = vcombine.high %v955_v61, %v959_v62  ;;  %v9217_v53 = vcombine.high %v995_v60, %v999_v46  ;;  %v1007_v55 = vld [vmem:[#allocation10 + $0xc20] sm:$0xff] }
 0x2bc   :  { %6894 = vmatpush1.bf16.msra.mxu1 %v9120_v9  ;;  %v968_v9 = vld [vmem:[#allocation10 + $0xae8] sm:$0xff] }
 0x2bd   :  { %7222 = vmatpush1.bf16.msra.mxu0 %v9122_v12  ;;  %6895 = vmatprep.subr.bf16.mxu1 %v9129_v13  ;;  %v9176_v12 = vcombine.low %v955_v61, %v959_v62  ;;  %v9178_v13 = vcombine.low %v956_v63, %v960_v1  ;;  %v9187_v15 = vcombine.high %v964_v8, %v968_v9  ;;  %v1011_v1 = vld [vmem:[#allocation10 + $0xc40] sm:$0xff] }
 0x2be   :  { %7223 = vmatprep.subr.bf16.mxu0 %v9131_v14  ;;  %v9185_v14 = vcombine.high %v963_v6, %v967_v7  ;;  %v9225_v61 = vcombine.high %v1003_v54, %v1007_v55 }
 0x2c0   :  { %6896 = vmatpush1.bf16.msra.mxu1 %v9128_v0  ;;  %v976_v0 = vld [vmem:[#allocation10 + $0xb28] sm:$0xff] }
 0x2c1   :  { %7224 = vmatpush1.bf16.msra.mxu0 %v9130_v23  ;;  %6897 = vmatprep.subr.bf16.mxu1 %v9137_v25  ;;  %v9184_v23 = vcombine.low %v963_v6, %v967_v7  ;;  %v9186_v25 = vcombine.low %v964_v8, %v968_v9  ;;  %v9195_v27 = vcombine.high %v972_v20, %v976_v0  ;;  %v1019_v9 = vld [vmem:[#allocation10 + $0xc80] sm:$0xff] }
 0x2c2   :  { %7225 = vmatprep.subr.bf16.mxu0 %v9139_v26  ;;  %v9193_v26 = vcombine.high %v971_v17, %v975_v19  ;;  %v10899_v6 = vpack.c.bf16 %v10874_v31, %v10874_v31 }
 0x2c4   :  { %6898 = vmatpush1.bf16.msra.mxu1 %v9136_v34  ;;  %v984_v34 = vld [vmem:[#allocation10 + $0xb68] sm:$0xff] }
 0x2c5   :  { %7226 = vmatpush1.bf16.msra.mxu0 %v9138_v30  ;;  %6899 = vmatprep.subr.bf16.mxu1 %v9145_v33  ;;  %v9192_v30 = vcombine.low %v971_v17, %v975_v19  ;;  %v9194_v33 = vcombine.low %v972_v20, %v976_v0  ;;  %v9203_v36 = vcombine.high %v980_v32, %v984_v34  ;;  %v1024_v17 = vld [vmem:[#allocation10 + $0xca8] sm:$0xff] }
 0x2c6   :  { %7227 = vmatprep.subr.bf16.mxu0 %v9147_v35  ;;  %v9201_v35 = vcombine.high %v979_v28, %v983_v29 }
 0x2c8   :  { %6900 = vmatpush1.bf16.msra.mxu1 %v9144_v40  ;;  %v992_v40 = vld [vmem:[#allocation10 + $0xba8] sm:$0xff] }
 0x2c9   :  { %7228 = vmatpush1.bf16.msra.mxu0 %v9146_v41  ;;  %6901 = vmatprep.subr.bf16.mxu1 %v9153_v42  ;;  %v9200_v41 = vcombine.low %v979_v28, %v983_v29  ;;  %v9202_v42 = vcombine.low %v980_v32, %v984_v34  ;;  %v9211_v44 = vcombine.high %v988_v39, %v992_v40 }
 0x2ca   :  { %7229 = vmatprep.subr.bf16.mxu0 %v9155_v43  ;;  %v9209_v43 = vcombine.high %v987_v37, %v991_v38 }
 0x2cc   :  { %6902 = vmatpush1.bf16.msra.mxu1 %v9152_v49  ;;  %v1000_v49 = vld [vmem:[#allocation10 + $0xbe8] sm:$0xff] }
 0x2cd   :  { %7230 = vmatpush1.bf16.msra.mxu0 %v9154_v50  ;;  %6903 = vmatprep.subr.bf16.mxu1 %v9161_v51  ;;  %v536_v50 = vcombine.high %v10870_v18, %v10870_v18  ;;  %v9208_v51 = vcombine.low %v987_v37, %v991_v38  ;;  %v9219_v16 = vcombine.high %v996_v48, %v1000_v49 }
 0x2ce   :  { %7231 = vmatprep.subr.bf16.mxu0 %v9163_v52  ;;  %v9210_v52 = vcombine.low %v988_v39, %v992_v40  ;;  %v9218_v18 = vcombine.low %v996_v48, %v1000_v49 }
 0x2d0   :  { %6904 = vmatpush1.bf16.msra.mxu1 %v9160_v56  ;;  %v1004_v56 = vld [vmem:[#allocation10 + $0xc08] sm:$0xff] }
 0x2d1   :  { %7232 = vmatpush1.bf16.msra.mxu0 %v9162_v57  ;;  %6905 = vmatprep.subr.bf16.mxu1 %v9169_v58  ;;  %v1008_v57 = vld [vmem:[#allocation10 + $0xc28] sm:$0xff]  ;;  %v10893_v58 = vrot.slane %v536_v50, %v10850_v11  ;;  %v1051_v50 = vld [vmem:[#allocation10 + $0xd80] sm:$0xff] }
 0x2d2   :  { %7233 = vmatprep.subr.bf16.mxu0 %v9171_v59  ;;  %v9216_v59 = vcombine.low %v995_v60, %v999_v46  ;;  %v9227_v62 = vcombine.high %v1004_v56, %v1008_v57  ;;  %v9226_v7 = vcombine.low %v1004_v56, %v1008_v57  ;;  %v1059_v57 = vld [vmem:[#allocation10 + $0xdc0] sm:$0xff] }
 0x2d3   :  { %v552_v63 = vcombine.high %v10893_v58, %v10893_v58 }
 0x2d4   :  { %6906 = vmatpush1.bf16.msra.mxu1 %v9168_v2  ;;  %v1015_v2 = vld [vmem:[#allocation10 + $0xc60] sm:$0xff] }
 0x2d5   :  { %7234 = vmatpush1.bf16.msra.mxu0 %v9170_v3  ;;  %6907 = vmatprep.subr.bf16.mxu1 %v9177_v4  ;;  %v9224_v3 = vcombine.low %v1003_v54, %v1007_v55  ;;  %v1012_v4 = vld [vmem:[#allocation10 + $0xc48] sm:$0xff]  ;;  %v9233_v8 = vcombine.high %v1011_v1, %v1015_v2  ;;  %v9232_v19 = vcombine.low %v1011_v1, %v1015_v2 }
 0x2d6   :  { %7235 = vmatprep.subr.bf16.mxu0 %v9179_v5  ;;  %v1016_v5 = vld [vmem:[#allocation10 + $0xc68] sm:$0xff] }
 0x2d7   :  { %v9234_v31 = vcombine.low %v1012_v4, %v1016_v5 }
 0x2d8   :  { %6908 = vmatpush1.bf16.msra.mxu1 %v9176_v12  ;;  %v1023_v12 = vld [vmem:[#allocation10 + $0xca0] sm:$0xff] }
 0x2d9   :  { %7236 = vmatpush1.bf16.msra.mxu0 %v9178_v13  ;;  %6909 = vmatprep.subr.bf16.mxu1 %v9185_v14  ;;  %v10902_v13 = vpack.c.bf16 %v552_v63, %v552_v63  ;;  %v9235_v14 = vcombine.high %v1012_v4, %v1016_v5  ;;  %v9241_v20 = vcombine.high %v1019_v9, %v1023_v12  ;;  %v1071_v4 = vld [vmem:[#allocation10 + $0xe20] sm:$0xff]  ;;  %v1068_v5 = vld [vmem:[#allocation10 + $0xe08] sm:$0xff] }
 0x2da   :  { %7237 = vmatprep.subr.bf16.mxu0 %v9187_v15  ;;  %v1020_v15 = vld [vmem:[#allocation10 + $0xc88] sm:$0xff]  ;;  %v9240_v28 = vcombine.low %v1019_v9, %v1023_v12 }
 0x2db   :  { %v9243_v0 = vcombine.high %v1020_v15, %v1024_v17  ;;  %v9242_v29 = vcombine.low %v1020_v15, %v1024_v17  ;;  %v1075_v15 = vld [vmem:[#allocation10 + $0xe40] sm:$0xff] }
 0x2dc   :  { %6910 = vmatpush1.bf16.msra.mxu1 %v9184_v23  ;;  %v1027_v23 = vld [vmem:[#allocation10 + $0xcc0] sm:$0xff] }
 0x2dd   :  { %7238 = vmatpush1.bf16.msra.mxu0 %v9186_v25  ;;  %6911 = vmatprep.subr.bf16.mxu1 %v9193_v26  ;;  %v1031_v25 = vld [vmem:[#allocation10 + $0xce0] sm:$0xff]  ;;  %v1028_v26 = vld [vmem:[#allocation10 + $0xcc8] sm:$0xff] }
 0x2de   :  { %7239 = vmatprep.subr.bf16.mxu0 %v9195_v27  ;;  %v1032_v27 = vld [vmem:[#allocation10 + $0xce8] sm:$0xff]  ;;  %v9249_v32 = vcombine.high %v1027_v23, %v1031_v25  ;;  %v9248_v37 = vcombine.low %v1027_v23, %v1031_v25  ;;  %v1079_v17 = vld [vmem:[#allocation10 + $0xe60] sm:$0xff] }
 0x2df   :  { %v9251_v34 = vcombine.high %v1028_v26, %v1032_v27  ;;  %v9250_v38 = vcombine.low %v1028_v26, %v1032_v27  ;;  %v9297_v23 = vcombine.high %v1075_v15, %v1079_v17  ;;  %v1083_v26 = vld [vmem:[#allocation10 + $0xe80] sm:$0xff] }
 0x2e0   :  { %6912 = vmatpush1.bf16.msra.mxu1 %v9192_v30  ;;  %v1035_v30 = vld [vmem:[#allocation10 + $0xd00] sm:$0xff] }
 0x2e1   :  { %7240 = vmatpush1.bf16.msra.mxu0 %v9194_v33  ;;  %6913 = vmatprep.subr.bf16.mxu1 %v9201_v35  ;;  %v1039_v33 = vld [vmem:[#allocation10 + $0xd20] sm:$0xff]  ;;  %v1036_v35 = vld [vmem:[#allocation10 + $0xd08] sm:$0xff] }
 0x2e2   :  { %7241 = vmatprep.subr.bf16.mxu0 %v9203_v36  ;;  %v1040_v36 = vld [vmem:[#allocation10 + $0xd28] sm:$0xff]  ;;  %v9257_v39 = vcombine.high %v1035_v30, %v1039_v33  ;;  %v9256_v60 = vcombine.low %v1035_v30, %v1039_v33  ;;  %v1087_v27 = vld [vmem:[#allocation10 + $0xea0] sm:$0xff] }
 0x2e3   :  { %v9259_v40 = vcombine.high %v1036_v35, %v1040_v36  ;;  %v9258_v46 = vcombine.low %v1036_v35, %v1040_v36  ;;  %v9305_v30 = vcombine.high %v1083_v26, %v1087_v27  ;;  %v1091_v35 = vld [vmem:[#allocation10 + $0xec0] sm:$0xff] }
 0x2e4   :  { %6914 = vmatpush1.bf16.msra.mxu1 %v9200_v41  ;;  %v1043_v41 = vld [vmem:[#allocation10 + $0xd40] sm:$0xff] }
 0x2e5   :  { %7242 = vmatpush1.bf16.msra.mxu0 %v9202_v42  ;;  %6915 = vmatprep.subr.bf16.mxu1 %v9209_v43  ;;  %v1047_v42 = vld [vmem:[#allocation10 + $0xd60] sm:$0xff]  ;;  %v1044_v43 = vld [vmem:[#allocation10 + $0xd48] sm:$0xff] }
 0x2e6   :  { %7243 = vmatprep.subr.bf16.mxu0 %v9211_v44  ;;  %v1048_v44 = vld [vmem:[#allocation10 + $0xd68] sm:$0xff]  ;;  %v9265_v48 = vcombine.high %v1043_v41, %v1047_v42  ;;  %v1095_v36 = vld [vmem:[#allocation10 + $0xee0] sm:$0xff] }
 0x2e7   :  { %v9267_v49 = vcombine.high %v1044_v43, %v1048_v44  ;;  %v9266_v54 = vcombine.low %v1044_v43, %v1048_v44  ;;  %v1099_v43 = vld [vmem:[#allocation10 + $0xf00] sm:$0xff] }
 0x2e8   :  { %6916 = vmatpush1.bf16.msra.mxu1 %v9208_v51  ;;  %v1055_v51 = vld [vmem:[#allocation10 + $0xda0] sm:$0xff] }
 0x2e9   :  { %7244 = vmatpush1.bf16.msra.mxu0 %v9210_v52  ;;  %6917 = vmatprep.subr.bf16.mxu1 %v9217_v53  ;;  %v1052_v52 = vld [vmem:[#allocation10 + $0xd88] sm:$0xff]  ;;  %v9273_v55 = vcombine.high %v1051_v50, %v1055_v51  ;;  %v1103_v44 = vld [vmem:[#allocation10 + $0xf20] sm:$0xff] }
 0x2ea   :  { %7245 = vmatprep.subr.bf16.mxu0 %v9219_v16  ;;  %v1056_v53 = vld [vmem:[#allocation10 + $0xda8] sm:$0xff]  ;;  %v9264_v16 = vcombine.low %v1043_v41, %v1047_v42  ;;  %v9313_v41 = vcombine.high %v1091_v35, %v1095_v36 }
 0x2eb   :  { %v9275_v56 = vcombine.high %v1052_v52, %v1056_v53  ;;  %v9274_v63 = vcombine.low %v1052_v52, %v1056_v53  ;;  %v1107_v52 = vld [vmem:[#allocation10 + $0xf40] sm:$0xff] }
 0x2ec   :  { %6918 = vmatpush1.bf16.msra.mxu1 %v9216_v59  ;;  %v1063_v59 = vld [vmem:[#allocation10 + $0xde0] sm:$0xff] }
 0x2ed   :  { %7246 = vmatpush1.bf16.msra.mxu0 %v9218_v18  ;;  %6928 = vmatprep.subr.bf16.mxu1 %v9225_v61  ;;  %v1060_v18 = vld [vmem:[#allocation10 + $0xdc8] sm:$0xff]  ;;  %v9281_v1 = vcombine.high %v1059_v57, %v1063_v59  ;;  %v1111_v53 = vld [vmem:[#allocation10 + $0xf60] sm:$0xff] }
 0x2ee   :  { %7256 = vmatprep.subr.bf16.mxu0 %v9227_v62  ;;  %v1064_v61 = vld [vmem:[#allocation10 + $0xde8] sm:$0xff]  ;;  %v9272_v62 = vcombine.low %v1051_v50, %v1055_v51  ;;  %v9321_v50 = vcombine.high %v1099_v43, %v1103_v44 }
 0x2ef   :  { %6920 = vmatmul.mubr.bf16.vlgmr.msra.gmra.mrb[8].mxu1 %v10899_v6  ;;  %v9283_v2 = vcombine.high %v1060_v18, %v1064_v61  ;;  %v9282_v9 = vcombine.low %v1060_v18, %v1064_v61  ;;  %v1115_v18 = vld [vmem:[#allocation10 + $0xf80] sm:$0xff] }
 0x2f0   :  { %7248 = vmatmul.mubr.bf16.vlgmr.msra.gmra.mrb[12].mxu0 %v10899_v6  ;;  %6929 = vmatpush1.bf16.msra.mxu1 %v9224_v3  ;;  %v1067_v3 = vld [vmem:[#allocation10 + $0xe00] sm:$0xff] }
 0x2f1   :  { %6960 = vmatprep.mubr.bf16.mxu1 %v10902_v13  ;;  %7257 = vmatpush1.bf16.msra.mxu0 %v9226_v7  ;;  %v1072_v7 = vld [vmem:[#allocation10 + $0xe28] sm:$0xff]  ;;  %v9289_v12 = vcombine.high %v1067_v3, %v1071_v4  ;;  %v1119_v61 = vld [vmem:[#allocation10 + $0xfa0] sm:$0xff] }
 0x2f2   :  { %7288 = vmatprep.mubr.bf16.mxu0 %v10902_v13  ;;  %6930 = vmatprep.subr.bf16.mxu1 %v9233_v8  ;;  %v9280_v8 = vcombine.low %v1059_v57, %v1063_v59  ;;  %v9329_v57 = vcombine.high %v1107_v52, %v1111_v53 }
 0x2f3   :  { %7258 = vmatprep.subr.bf16.mxu0 %v9235_v14  ;;  %v9291_v14 = vcombine.high %v1068_v5, %v1072_v7 }
 0x2f4   :  { %6931 = vmatpush1.bf16.msra.mxu1 %v9232_v19  ;;  %v1076_v19 = vld [vmem:[#allocation10 + $0xe48] sm:$0xff] }
 0x2f5   :  { %7259 = vmatpush1.bf16.msra.mxu0 %v9234_v31  ;;  %6932 = vmatprep.subr.bf16.mxu1 %v9241_v20  ;;  %v1080_v31 = vld [vmem:[#allocation10 + $0xe68] sm:$0xff]  ;;  %v9288_v20 = vcombine.low %v1067_v3, %v1071_v4  ;;  %v9337_v3 = vcombine.high %v1115_v18, %v1119_v61 }
 0x2f6   :  { %7260 = vmatprep.subr.bf16.mxu0 %v9243_v0  ;;  %v9290_v0 = vcombine.low %v1068_v5, %v1072_v7  ;;  %v9299_v25 = vcombine.high %v1076_v19, %v1080_v31  ;;  %v1123_v5 = vld [vmem:[#allocation10 + $0xfc0] sm:$0xff] }
 0x2f7   :  { %v1127_v7 = vld [vmem:[#allocation10 + $0xfe0] sm:$0xff] }
 0x2f8   :  { %6933 = vmatpush1.bf16.msra.mxu1 %v9240_v28  ;;  %v1084_v28 = vld [vmem:[#allocation10 + $0xe88] sm:$0xff] }
 0x2f9   :  { %7261 = vmatpush1.bf16.msra.mxu0 %v9242_v29  ;;  %6934 = vmatprep.subr.bf16.mxu1 %v9249_v32  ;;  %v1088_v29 = vld [vmem:[#allocation10 + $0xea8] sm:$0xff]  ;;  %v9296_v32 = vcombine.low %v1075_v15, %v1079_v17  ;;  %v9345_v17 = vcombine.high %v1123_v5, %v1127_v7 }
 0x2fa   :  { %7262 = vmatprep.subr.bf16.mxu0 %v9251_v34  ;;  %v9298_v34 = vcombine.low %v1076_v19, %v1080_v31  ;;  %v9307_v33 = vcombine.high %v1084_v28, %v1088_v29  ;;  %v1131_v31 = vld [vmem:[#allocation10 + $0x1000] sm:$0xff] }
 0x2fc   :  { %6935 = vmatpush1.bf16.msra.mxu1 %v9248_v37  ;;  %v1092_v37 = vld [vmem:[#allocation10 + $0xec8] sm:$0xff] }
 0x2fd   :  { %7263 = vmatpush1.bf16.msra.mxu0 %v9250_v38  ;;  %6936 = vmatprep.subr.bf16.mxu1 %v9257_v39  ;;  %v1096_v38 = vld [vmem:[#allocation10 + $0xee8] sm:$0xff]  ;;  %v9304_v39 = vcombine.low %v1083_v26, %v1087_v27  ;;  %v9344_v26 = vcombine.low %v1123_v5, %v1127_v7 }
 0x2fe   :  { %7264 = vmatprep.subr.bf16.mxu0 %v9259_v40  ;;  %v9306_v40 = vcombine.low %v1084_v28, %v1088_v29  ;;  %v9315_v42 = vcombine.high %v1092_v37, %v1096_v38  ;;  %v1172_v5 = vld [vmem:[#allocation10 + $0x1148] sm:$0xff] }
 0x2ff   :  { %v1176_v7 = vld [vmem:[#allocation10 + $0x1168] sm:$0xff] }
 0x300   :  { %6937 = vmatpush1.bf16.msra.mxu1 %v9256_v60  ;;  %v1100_v60 = vld [vmem:[#allocation10 + $0xf08] sm:$0xff] }
 0x301   :  { %7265 = vmatpush1.bf16.msra.mxu0 %v9258_v46  ;;  %6938 = vmatprep.subr.bf16.mxu1 %v9265_v48  ;;  %v1104_v46 = vld [vmem:[#allocation10 + $0xf28] sm:$0xff]  ;;  %v9312_v48 = vcombine.low %v1091_v35, %v1095_v36 }
 0x302   :  { %7266 = vmatprep.subr.bf16.mxu0 %v9267_v49  ;;  %v9314_v49 = vcombine.low %v1092_v37, %v1096_v38  ;;  %v9323_v51 = vcombine.high %v1100_v60, %v1104_v46  ;;  %v1144_v35 = vld [vmem:[#allocation10 + $0x1068] sm:$0xff]  ;;  %v10917_v37 = vpack.c.bf16 %v10893_v58, %v10893_v58 }
 0x304   :  { %6939 = vmatpush1.bf16.msra.mxu1 %v9264_v16  ;;  %v1108_v16 = vld [vmem:[#allocation10 + $0xf48] sm:$0xff] }
 0x305   :  { %7267 = vmatpush1.bf16.msra.mxu0 %v9266_v54  ;;  %6940 = vmatprep.subr.bf16.mxu1 %v9273_v55  ;;  %v1112_v54 = vld [vmem:[#allocation10 + $0xf68] sm:$0xff]  ;;  %v9320_v55 = vcombine.low %v1099_v43, %v1103_v44 }
 0x306   :  { %7268 = vmatprep.subr.bf16.mxu0 %v9275_v56  ;;  %v9322_v56 = vcombine.low %v1100_v60, %v1104_v46  ;;  %v9331_v59 = vcombine.high %v1108_v16, %v1112_v54  ;;  %v1148_v44 = vld [vmem:[#allocation10 + $0x1088] sm:$0xff] }
 0x307   :  { %v1152_v60 = vld [vmem:[#allocation10 + $0x10a8] sm:$0xff] }
 0x308   :  { %6941 = vmatpush1.bf16.msra.mxu1 %v9272_v62  ;;  %v1116_v62 = vld [vmem:[#allocation10 + $0xf88] sm:$0xff] }
 0x309   :  { %7269 = vmatpush1.bf16.msra.mxu0 %v9274_v63  ;;  %6942 = vmatprep.subr.bf16.mxu1 %v9281_v1  ;;  %v1120_v63 = vld [vmem:[#allocation10 + $0xfa8] sm:$0xff]  ;;  %v9328_v1 = vcombine.low %v1107_v52, %v1111_v53 }
 0x30a   :  { %7270 = vmatprep.subr.bf16.mxu0 %v9283_v2  ;;  %v9330_v2 = vcombine.low %v1108_v16, %v1112_v54  ;;  %v9339_v4 = vcombine.high %v1116_v62, %v1120_v63  ;;  %v9338_v15 = vcombine.low %v1116_v62, %v1120_v63  ;;  %v1156_v52 = vld [vmem:[#allocation10 + $0x10c8] sm:$0xff]  ;;  %v9370_v54 = vcombine.low %v1148_v44, %v1152_v60 }
 0x30b   :  { %v1160_v53 = vld [vmem:[#allocation10 + $0x10e8] sm:$0xff] }
 0x30c   :  { %6943 = vmatpush1.bf16.msra.mxu1 %v9280_v8  ;;  %v1124_v8 = vld [vmem:[#allocation10 + $0xfc8] sm:$0xff]  ;;  %v9378_v63 = vcombine.low %v1156_v52, %v1160_v53 }
 0x30d   :  { %7271 = vmatpush1.bf16.msra.mxu0 %v9282_v9  ;;  %6944 = vmatprep.subr.bf16.mxu1 %v9289_v12  ;;  %v1128_v9 = vld [vmem:[#allocation10 + $0xfe8] sm:$0xff] }
 0x30e   :  { %7272 = vmatprep.subr.bf16.mxu0 %v9291_v14  ;;  %v10907_v12 = vld [vmem:[#allocation3 + $0x10] sm:$0xff]  ;;  %v9336_v14 = vcombine.low %v1115_v18, %v1119_v61  ;;  %v9347_v19 = vcombine.high %v1124_v8, %v1128_v9  ;;  %v9346_v27 = vcombine.low %v1124_v8, %v1128_v9 }
 0x30f   :  { %v1164_v18 = vld [vmem:[#allocation10 + $0x1108] sm:$0xff] }
 0x310   :  { %6945 = vmatpush1.bf16.msra.mxu1 %v9288_v20  ;;  %v1135_v20 = vld [vmem:[#allocation10 + $0x1020] sm:$0xff]  ;;  %v1168_v61 = vld [vmem:[#allocation10 + $0x1128] sm:$0xff] }
 0x311   :  { %7273 = vmatpush1.bf16.msra.mxu0 %v9290_v0  ;;  %6946 = vmatprep.subr.bf16.mxu1 %v9297_v23  ;;  %v10911_v0 = vrot.slane %v10907_v12, %v10850_v11  ;;  %v1132_v23 = vld [vmem:[#allocation10 + $0x1008] sm:$0xff]  ;;  %v9353_v28 = vcombine.high %v1131_v31, %v1135_v20  ;;  %v9352_v36 = vcombine.low %v1131_v31, %v1135_v20 }
 0x312   :  { %7274 = vmatprep.subr.bf16.mxu0 %v9299_v25  ;;  %v1136_v25 = vld [vmem:[#allocation10 + $0x1028] sm:$0xff]  ;;  %v9386_v9 = vcombine.low %v1164_v18, %v1168_v61 }
 0x313   :  { %v9355_v29 = vcombine.high %v1132_v23, %v1136_v25  ;;  %v9354_v38 = vcombine.low %v1132_v23, %v1136_v25  ;;  %v1180_v31 = vld [vmem:[#allocation10 + $0x1188] sm:$0xff]  ;;  %v9394_v25 = vcombine.low %v1172_v5, %v1176_v7 }
 0x314   :  { %6947 = vmatpush1.bf16.msra.mxu1 %v9296_v32  ;;  %v1139_v32 = vld [vmem:[#allocation10 + $0x1040] sm:$0xff]  ;;  %v1184_v20 = vld [vmem:[#allocation10 + $0x11a8] sm:$0xff] }
 0x315   :  { %7275 = vmatpush1.bf16.msra.mxu0 %v9298_v34  ;;  %6948 = vmatprep.subr.bf16.mxu1 %v9305_v30  ;;  %v1143_v34 = vld [vmem:[#allocation10 + $0x1060] sm:$0xff]  ;;  %v568_v30 = vcombine.high %v10911_v0, %v10911_v0 }
 0x316   :  { %7276 = vmatprep.subr.bf16.mxu0 %v9307_v33  ;;  %v1140_v33 = vld [vmem:[#allocation10 + $0x1048] sm:$0xff]  ;;  %v9360_v46 = vcombine.low %v1139_v32, %v1143_v34 }
 0x317   :  { %v10919_v43 = vpack.c.bf16 %v568_v30, %v568_v30  ;;  %v9362_v58 = vcombine.low %v1140_v33, %v1144_v35 }
 0x318   :  { %6949 = vmatpush1.bf16.msra.mxu1 %v9304_v39  ;;  %v9361_v39 = vcombine.high %v1139_v32, %v1143_v34  ;;  %v1188_v32 = vld [vmem:[#allocation10 + $0x11c8] sm:$0xff] }
 0x319   :  { %7277 = vmatpush1.bf16.msra.mxu0 %v9306_v40  ;;  %6950 = vmatprep.subr.bf16.mxu1 %v9313_v41  ;;  %v9363_v40 = vcombine.high %v1140_v33, %v1144_v35  ;;  %v1147_v41 = vld [vmem:[#allocation10 + $0x1080] sm:$0xff]  ;;  %v1192_v34 = vld [vmem:[#allocation10 + $0x11e8] sm:$0xff]  ;;  %v9402_v33 = vcombine.low %v1180_v31, %v1184_v20 }
 0x31a   :  { %7278 = vmatprep.subr.bf16.mxu0 %v9315_v42  ;;  %v1151_v42 = vld [vmem:[#allocation10 + $0x10a0] sm:$0xff] }
 0x31b   :  { %v9368_v16 = vcombine.low %v1147_v41, %v1151_v42 }
 0x31c   :  { %6951 = vmatpush1.bf16.msra.mxu1 %v9312_v48  ;;  %v9369_v48 = vcombine.high %v1147_v41, %v1151_v42  ;;  %v1200_v41 = vld [vmem:[#allocation10 + $0x1228] sm:$0xff] }
 0x31d   :  { %7279 = vmatpush1.bf16.msra.mxu0 %v9314_v49  ;;  %6952 = vmatprep.subr.bf16.mxu1 %v9321_v50  ;;  %v9371_v49 = vcombine.high %v1148_v44, %v1152_v60  ;;  %v1155_v50 = vld [vmem:[#allocation10 + $0x10c0] sm:$0xff]  ;;  %v9410_v44 = vcombine.low %v1188_v32, %v1192_v34 }
 0x31e   :  { %7280 = vmatprep.subr.bf16.mxu0 %v9323_v51  ;;  %v1159_v51 = vld [vmem:[#allocation10 + $0x10e0] sm:$0xff] }
 0x31f   :  { %v9376_v62 = vcombine.low %v1155_v50, %v1159_v51 }
 0x320   :  { %6953 = vmatpush1.bf16.msra.mxu1 %v9320_v55  ;;  %v9377_v55 = vcombine.high %v1155_v50, %v1159_v51  ;;  %v1208_v50 = vld [vmem:[#allocation10 + $0x1268] sm:$0xff] }
 0x321   :  { %7281 = vmatpush1.bf16.msra.mxu0 %v9322_v56  ;;  %6954 = vmatprep.subr.bf16.mxu1 %v9329_v57  ;;  %v9379_v56 = vcombine.high %v1156_v52, %v1160_v53  ;;  %v1163_v57 = vld [vmem:[#allocation10 + $0x1100] sm:$0xff] }
 0x322   :  { %7282 = vmatprep.subr.bf16.mxu0 %v9331_v59  ;;  %v1167_v59 = vld [vmem:[#allocation10 + $0x1120] sm:$0xff] }
 0x323   :  { %v9384_v8 = vcombine.low %v1163_v57, %v1167_v59 }
 0x324   :  { %6955 = vmatpush1.bf16.msra.mxu1 %v9328_v1  ;;  %v9385_v1 = vcombine.high %v1163_v57, %v1167_v59  ;;  %v1216_v57 = vld [vmem:[#allocation10 + $0x12a8] sm:$0xff] }
 0x325   :  { %7283 = vmatpush1.bf16.msra.mxu0 %v9330_v2  ;;  %6956 = vmatprep.subr.bf16.mxu1 %v9337_v3  ;;  %v9387_v2 = vcombine.high %v1164_v18, %v1168_v61  ;;  %v1171_v3 = vld [vmem:[#allocation10 + $0x1140] sm:$0xff] }
 0x326   :  { %7284 = vmatprep.subr.bf16.mxu0 %v9339_v4  ;;  %v1175_v4 = vld [vmem:[#allocation10 + $0x1160] sm:$0xff] }
 0x327   :  { %v9392_v23 = vcombine.low %v1171_v3, %v1175_v4 }
 0x328   :  { %6957 = vmatpush1.bf16.msra.mxu1 %v9336_v14  ;;  %v9393_v14 = vcombine.high %v1171_v3, %v1175_v4  ;;  %v1224_v3 = vld [vmem:[#allocation10 + $0x12e8] sm:$0xff] }
 0x329   :  { %7285 = vmatpush1.bf16.msra.mxu0 %v9338_v15  ;;  %6958 = vmatprep.subr.bf16.mxu1 %v9345_v17  ;;  %v9395_v15 = vcombine.high %v1172_v5, %v1176_v7  ;;  %v1179_v17 = vld [vmem:[#allocation10 + $0x1180] sm:$0xff] }
 0x32a   :  { %7286 = vmatprep.subr.bf16.mxu0 %v9347_v19  ;;  %v1183_v19 = vld [vmem:[#allocation10 + $0x11a0] sm:$0xff] }
 0x32b   :  { %v9400_v30 = vcombine.low %v1179_v17, %v1183_v19 }
 0x32c   :  { %6959 = vmatpush1.bf16.msra.mxu1 %v9344_v26  ;;  %v9401_v26 = vcombine.high %v1179_v17, %v1183_v19  ;;  %v1232_v17 = vld [vmem:[#allocation10 + $0x1328] sm:$0xff] }
 0x32d   :  { %7287 = vmatpush1.bf16.msra.mxu0 %v9346_v27  ;;  %6969 = vmatprep.subr.bf16.mxu1 %v9353_v28  ;;  %v9403_v27 = vcombine.high %v1180_v31, %v1184_v20  ;;  %v1187_v28 = vld [vmem:[#allocation10 + $0x11c0] sm:$0xff] }
 0x32e   :  { %7297 = vmatprep.subr.bf16.mxu0 %v9355_v29  ;;  %v1191_v29 = vld [vmem:[#allocation10 + $0x11e0] sm:$0xff] }
 0x32f   :  { %6961 = vmatmul.mubr.bf16.vlgmr.msra.gmra.mrb[8].mxu1 %v10917_v37  ;;  %v9409_v35 = vcombine.high %v1187_v28, %v1191_v29  ;;  %v9408_v42 = vcombine.low %v1187_v28, %v1191_v29  ;;  %v1240_v28 = vld [vmem:[#allocation10 + $0x1368] sm:$0xff] }
 0x330   :  { %7289 = vmatmul.mubr.bf16.vlgmr.msra.gmra.mrb[12].mxu0 %v10917_v37  ;;  %6970 = vmatpush1.bf16.msra.mxu1 %v9352_v36  ;;  %v9411_v36 = vcombine.high %v1188_v32, %v1192_v34 }
 0x331   :  { %7298 = vmatpush1.bf16.msra.mxu0 %v9354_v38  ;;  %6971 = vmatprep.subr.bf16.mxu1 %v9361_v39  ;;  %v1195_v38 = vld [vmem:[#allocation10 + $0x1200] sm:$0xff] }
 0x332   :  { %7299 = vmatprep.subr.bf16.mxu0 %v9363_v40  ;;  %7001 = vmatprep.mubr.bf16.mxu1 %v10919_v43  ;;  %v1199_v39 = vld [vmem:[#allocation10 + $0x1220] sm:$0xff]  ;;  %v1196_v40 = vld [vmem:[#allocation10 + $0x1208] sm:$0xff] }
 0x333   :  { %7329 = vmatprep.mubr.bf16.mxu0 %v10919_v43  ;;  %v9417_v60 = vcombine.high %v1195_v38, %v1199_v39  ;;  %v9416_v51 = vcombine.low %v1195_v38, %v1199_v39  ;;  %v9418_v52 = vcombine.low %v1196_v40, %v1200_v41  ;;  %v1248_v38 = vld [vmem:[#allocation10 + $0x13a8] sm:$0xff] }
 0x334   :  { %6972 = vmatpush1.bf16.msra.mxu1 %v9360_v46  ;;  %v9419_v46 = vcombine.high %v1196_v40, %v1200_v41 }
 0x335   :  { %7300 = vmatpush1.bf16.msra.mxu0 %v9362_v58  ;;  %6973 = vmatprep.subr.bf16.mxu1 %v9369_v48  ;;  %v1203_v58 = vld [vmem:[#allocation10 + $0x1240] sm:$0xff] }
 0x336   :  { %7301 = vmatprep.subr.bf16.mxu0 %v9371_v49  ;;  %v1207_v48 = vld [vmem:[#allocation10 + $0x1260] sm:$0xff]  ;;  %v1204_v49 = vld [vmem:[#allocation10 + $0x1248] sm:$0xff] }
 0x337   :  { %v9425_v53 = vcombine.high %v1203_v58, %v1207_v48  ;;  %v9424_v59 = vcombine.low %v1203_v58, %v1207_v48  ;;  %v9426_v18 = vcombine.low %v1204_v49, %v1208_v50  ;;  %v1256_v58 = vld [vmem:[#allocation10 + $0x13e8] sm:$0xff]  ;;  %v553_v48 = vcombine.high %v10907_v12, %v10907_v12 }
 0x338   :  { %6974 = vmatpush1.bf16.msra.mxu1 %v9368_v16  ;;  %v9427_v16 = vcombine.high %v1204_v49, %v1208_v50 }
 0x339   :  { %7302 = vmatpush1.bf16.msra.mxu0 %v9370_v54  ;;  %6975 = vmatprep.subr.bf16.mxu1 %v9377_v55  ;;  %v1211_v54 = vld [vmem:[#allocation10 + $0x1280] sm:$0xff] }
 0x33a   :  { %7303 = vmatprep.subr.bf16.mxu0 %v9379_v56  ;;  %v1215_v55 = vld [vmem:[#allocation10 + $0x12a0] sm:$0xff]  ;;  %v1212_v56 = vld [vmem:[#allocation10 + $0x1288] sm:$0xff] }
 0x33b   :  { %v9433_v61 = vcombine.high %v1211_v54, %v1215_v55  ;;  %v9432_v4 = vcombine.low %v1211_v54, %v1215_v55  ;;  %v9434_v5 = vcombine.low %v1212_v56, %v1216_v57  ;;  %v1260_v54 = vld [vmem:[#allocation10 + $0x1408] sm:$0xff] }
 0x33c   :  { %6976 = vmatpush1.bf16.msra.mxu1 %v9376_v62  ;;  %v9435_v62 = vcombine.high %v1212_v56, %v1216_v57  ;;  %v1264_v55 = vld [vmem:[#allocation10 + $0x1428] sm:$0xff]  ;;  %v10928_v56 = vrot.slane %v553_v48, %v10850_v11 }
 0x33d   :  { %7304 = vmatpush1.bf16.msra.mxu0 %v9378_v63  ;;  %6977 = vmatprep.subr.bf16.mxu1 %v9385_v1  ;;  %v1219_v63 = vld [vmem:[#allocation10 + $0x12c0] sm:$0xff] }
 0x33e   :  { %7305 = vmatprep.subr.bf16.mxu0 %v9387_v2  ;;  %v1223_v1 = vld [vmem:[#allocation10 + $0x12e0] sm:$0xff]  ;;  %v1220_v2 = vld [vmem:[#allocation10 + $0x12c8] sm:$0xff] }
 0x33f   :  { %v9441_v7 = vcombine.high %v1219_v63, %v1223_v1  ;;  %v9440_v19 = vcombine.low %v1219_v63, %v1223_v1  ;;  %v9442_v31 = vcombine.low %v1220_v2, %v1224_v3  ;;  %v1271_v63 = vld [vmem:[#allocation10 + $0x1460] sm:$0xff] }
 0x340   :  { %6978 = vmatpush1.bf16.msra.mxu1 %v9384_v8  ;;  %v9443_v8 = vcombine.high %v1220_v2, %v1224_v3  ;;  %v1268_v2 = vld [vmem:[#allocation10 + $0x1448] sm:$0xff] }
 0x341   :  { %7306 = vmatpush1.bf16.msra.mxu0 %v9386_v9  ;;  %6979 = vmatprep.subr.bf16.mxu1 %v9393_v14  ;;  %v1227_v9 = vld [vmem:[#allocation10 + $0x1300] sm:$0xff]  ;;  %v1272_v3 = vld [vmem:[#allocation10 + $0x1468] sm:$0xff] }
 0x342   :  { %7307 = vmatprep.subr.bf16.mxu0 %v9395_v15  ;;  %v1231_v14 = vld [vmem:[#allocation10 + $0x1320] sm:$0xff]  ;;  %v1228_v15 = vld [vmem:[#allocation10 + $0x1308] sm:$0xff] }
 0x343   :  { %v9449_v20 = vcombine.high %v1227_v9, %v1231_v14  ;;  %v9448_v29 = vcombine.low %v1227_v9, %v1231_v14  ;;  %v9450_v32 = vcombine.low %v1228_v15, %v1232_v17  ;;  %v1279_v9 = vld [vmem:[#allocation10 + $0x14a0] sm:$0xff] }
 0x344   :  { %6980 = vmatpush1.bf16.msra.mxu1 %v9392_v23  ;;  %v9451_v23 = vcombine.high %v1228_v15, %v1232_v17  ;;  %v9491_v15 = vcombine.high %v1268_v2, %v1272_v3  ;;  %v1276_v17 = vld [vmem:[#allocation10 + $0x1488] sm:$0xff] }
 0x345   :  { %7308 = vmatpush1.bf16.msra.mxu0 %v9394_v25  ;;  %6981 = vmatprep.subr.bf16.mxu1 %v9401_v26  ;;  %v1235_v25 = vld [vmem:[#allocation10 + $0x1340] sm:$0xff] }
 0x346   :  { %7309 = vmatprep.subr.bf16.mxu0 %v9403_v27  ;;  %v1239_v26 = vld [vmem:[#allocation10 + $0x1360] sm:$0xff]  ;;  %v1236_v27 = vld [vmem:[#allocation10 + $0x1348] sm:$0xff] }
 0x347   :  { %v9457_v34 = vcombine.high %v1235_v25, %v1239_v26  ;;  %v9456_v39 = vcombine.low %v1235_v25, %v1239_v26  ;;  %v9458_v40 = vcombine.low %v1236_v27, %v1240_v28  ;;  %v1283_v25 = vld [vmem:[#allocation10 + $0x14c0] sm:$0xff] }
 0x348   :  { %6982 = vmatpush1.bf16.msra.mxu1 %v9400_v30  ;;  %v9459_v30 = vcombine.high %v1236_v27, %v1240_v28  ;;  %v1287_v26 = vld [vmem:[#allocation10 + $0x14e0] sm:$0xff]  ;;  %v1284_v27 = vld [vmem:[#allocation10 + $0x14c8] sm:$0xff] }
 0x349   :  { %7310 = vmatpush1.bf16.msra.mxu0 %v9402_v33  ;;  %6983 = vmatprep.subr.bf16.mxu1 %v9409_v35  ;;  %v1243_v33 = vld [vmem:[#allocation10 + $0x1380] sm:$0xff]  ;;  %v1288_v28 = vld [vmem:[#allocation10 + $0x14e8] sm:$0xff] }
 0x34a   :  { %7311 = vmatprep.subr.bf16.mxu0 %v9411_v36  ;;  %v1247_v35 = vld [vmem:[#allocation10 + $0x13a0] sm:$0xff]  ;;  %v1244_v36 = vld [vmem:[#allocation10 + $0x1388] sm:$0xff] }
 0x34b   :  { %v9465_v41 = vcombine.high %v1243_v33, %v1247_v35  ;;  %v9464_v49 = vcombine.low %v1243_v33, %v1247_v35  ;;  %v9466_v50 = vcombine.low %v1244_v36, %v1248_v38  ;;  %v1291_v33 = vld [vmem:[#allocation10 + $0x1500] sm:$0xff] }
 0x34c   :  { %6984 = vmatpush1.bf16.msra.mxu1 %v9408_v42  ;;  %v9467_v42 = vcombine.high %v1244_v36, %v1248_v38  ;;  %v1295_v35 = vld [vmem:[#allocation10 + $0x1520] sm:$0xff]  ;;  %v1292_v36 = vld [vmem:[#allocation10 + $0x1508] sm:$0xff] }
 0x34d   :  { %7312 = vmatpush1.bf16.msra.mxu0 %v9410_v44  ;;  %6985 = vmatprep.subr.bf16.mxu1 %v9417_v60  ;;  %v1251_v44 = vld [vmem:[#allocation10 + $0x13c0] sm:$0xff]  ;;  %v1296_v38 = vld [vmem:[#allocation10 + $0x1528] sm:$0xff]  ;;  %v9512_v48 = vcombine.low %v1291_v33, %v1295_v35 }
 0x34e   :  { %7313 = vmatprep.subr.bf16.mxu0 %v9419_v46  ;;  %v1255_v60 = vld [vmem:[#allocation10 + $0x13e0] sm:$0xff]  ;;  %v1252_v46 = vld [vmem:[#allocation10 + $0x13c8] sm:$0xff] }
 0x34f   :  { %v9472_v57 = vcombine.low %v1251_v44, %v1255_v60  ;;  %v9474_v12 = vcombine.low %v1252_v46, %v1256_v58 }
 0x350   :  { %6986 = vmatpush1.bf16.msra.mxu1 %v9416_v51  ;;  %v9473_v51 = vcombine.high %v1251_v44, %v1255_v60  ;;  %v1299_v44 = vld [vmem:[#allocation10 + $0x1540] sm:$0xff] }
 0x351   :  { %7314 = vmatpush1.bf16.msra.mxu0 %v9418_v52  ;;  %6987 = vmatprep.subr.bf16.mxu1 %v9425_v53  ;;  %v9475_v52 = vcombine.high %v1252_v46, %v1256_v58  ;;  %v1259_v53 = vld [vmem:[#allocation10 + $0x1400] sm:$0xff]  ;;  %v1300_v46 = vld [vmem:[#allocation10 + $0x1548] sm:$0xff] }
 0x352   :  { %7315 = vmatprep.subr.bf16.mxu0 %v9427_v16  ;;  %v1263_v16 = vld [vmem:[#allocation10 + $0x1420] sm:$0xff]  ;;  %v1304_v58 = vld [vmem:[#allocation10 + $0x1568] sm:$0xff] }
 0x353   :  { %v9480_v1 = vcombine.low %v1259_v53, %v1263_v16  ;;  %v1303_v60 = vld [vmem:[#allocation10 + $0x1560] sm:$0xff] }
 0x354   :  { %6988 = vmatpush1.bf16.msra.mxu1 %v9424_v59  ;;  %v9481_v59 = vcombine.high %v1259_v53, %v1263_v16  ;;  %v1311_v53 = vld [vmem:[#allocation10 + $0x15a0] sm:$0xff]  ;;  %v1308_v16 = vld [vmem:[#allocation10 + $0x1588] sm:$0xff] }
 0x355   :  { %7316 = vmatpush1.bf16.msra.mxu0 %v9426_v18  ;;  %6989 = vmatprep.subr.bf16.mxu1 %v9433_v61  ;;  %v9483_v18 = vcombine.high %v1260_v54, %v1264_v55  ;;  %v569_v61 = vcombine.high %v10928_v56, %v10928_v56 }
 0x356   :  { %7317 = vmatprep.subr.bf16.mxu0 %v9435_v62  ;;  %v1267_v62 = vld [vmem:[#allocation10 + $0x1440] sm:$0xff] }
 0x357   :  { %v10937_v14 = vpack.c.bf16 %v569_v61, %v569_v61  ;;  %v1319_v61 = vld [vmem:[#allocation10 + $0x15e0] sm:$0xff] }
 0x358   :  { %6990 = vmatpush1.bf16.msra.mxu1 %v9432_v4  ;;  %v10934_v4 = vpack.c.bf16 %v10911_v0, %v10911_v0  ;;  %v9490_v0 = vcombine.low %v1268_v2, %v1272_v3 }
 0x359   :  { %7318 = vmatpush1.bf16.msra.mxu0 %v9434_v5  ;;  %6991 = vmatprep.subr.bf16.mxu1 %v9441_v7  ;;  %v9482_v5 = vcombine.low %v1260_v54, %v1264_v55  ;;  %v9489_v7 = vcombine.high %v1267_v62, %v1271_v63  ;;  %v1312_v54 = vld [vmem:[#allocation10 + $0x15a8] sm:$0xff]  ;;  %v9520_v55 = vcombine.low %v1299_v44, %v1303_v60 }
 0x35a   :  { %7319 = vmatprep.subr.bf16.mxu0 %v9443_v8  ;;  %v1275_v8 = vld [vmem:[#allocation10 + $0x1480] sm:$0xff]  ;;  %v9530_v2 = vcombine.low %v1308_v16, %v1312_v54 }
 0x35c   :  { %6992 = vmatpush1.bf16.msra.mxu1 %v9440_v19  ;;  %v1280_v19 = vld [vmem:[#allocation10 + $0x14a8] sm:$0xff] }
 0x35d   :  { %7320 = vmatpush1.bf16.msra.mxu0 %v9442_v31  ;;  %6993 = vmatprep.subr.bf16.mxu1 %v9449_v20  ;;  %v9488_v31 = vcombine.low %v1267_v62, %v1271_v63  ;;  %v9497_v20 = vcombine.high %v1275_v8, %v1279_v9  ;;  %v1316_v62 = vld [vmem:[#allocation10 + $0x15c8] sm:$0xff] }
 0x35e   :  { %7321 = vmatprep.subr.bf16.mxu0 %v9451_v23  ;;  %v9499_v23 = vcombine.high %v1276_v17, %v1280_v19  ;;  %v1320_v63 = vld [vmem:[#allocation10 + $0x15e8] sm:$0xff] }
 0x360   :  { %6994 = vmatpush1.bf16.msra.mxu1 %v9448_v29  ;;  %v9496_v29 = vcombine.low %v1275_v8, %v1279_v9  ;;  %v1327_v8 = vld [vmem:[#allocation10 + $0x1620] sm:$0xff]  ;;  %v1324_v9 = vld [vmem:[#allocation10 + $0x1608] sm:$0xff] }
 0x361   :  { %7322 = vmatpush1.bf16.msra.mxu0 %v9450_v32  ;;  %6995 = vmatprep.subr.bf16.mxu1 %v9457_v34  ;;  %v9498_v32 = vcombine.low %v1276_v17, %v1280_v19  ;;  %v9505_v34 = vcombine.high %v1283_v25, %v1287_v26  ;;  %v9538_v19 = vcombine.low %v1316_v62, %v1320_v63 }
 0x362   :  { %7323 = vmatprep.subr.bf16.mxu0 %v9459_v30  ;;  %v9507_v30 = vcombine.high %v1284_v27, %v1288_v28 }
 0x364   :  { %6996 = vmatpush1.bf16.msra.mxu1 %v9456_v39  ;;  %v9504_v39 = vcombine.low %v1283_v25, %v1287_v26  ;;  %v1332_v25 = vld [vmem:[#allocation10 + $0x1648] sm:$0xff] }
 0x365   :  { %7324 = vmatpush1.bf16.msra.mxu0 %v9458_v40  ;;  %6997 = vmatprep.subr.bf16.mxu1 %v9465_v41  ;;  %v9506_v40 = vcombine.low %v1284_v27, %v1288_v28  ;;  %v9513_v41 = vcombine.high %v1291_v33, %v1295_v35  ;;  %v1336_v26 = vld [vmem:[#allocation10 + $0x1668] sm:$0xff] }
 0x366   :  { %7325 = vmatprep.subr.bf16.mxu0 %v9467_v42  ;;  %v9515_v42 = vcombine.high %v1292_v36, %v1296_v38  ;;  %v1340_v33 = vld [vmem:[#allocation10 + $0x1688] sm:$0xff] }
 0x367   :  { %v1344_v35 = vld [vmem:[#allocation10 + $0x16a8] sm:$0xff] }
 0x368   :  { %6998 = vmatpush1.bf16.msra.mxu1 %v9464_v49  ;;  %v9514_v49 = vcombine.low %v1292_v36, %v1296_v38  ;;  %v9554_v38 = vcombine.low %v1332_v25, %v1336_v26 }
 0x369   :  { %7326 = vmatpush1.bf16.msra.mxu0 %v9466_v50  ;;  %6999 = vmatprep.subr.bf16.mxu1 %v9473_v51  ;;  %v9521_v50 = vcombine.high %v1299_v44, %v1303_v60  ;;  %v9523_v51 = vcombine.high %v1300_v46, %v1304_v58  ;;  %v1348_v44 = vld [vmem:[#allocation10 + $0x16c8] sm:$0xff] }
 0x36a   :  { %7327 = vmatprep.subr.bf16.mxu0 %v9475_v52  ;;  %v1307_v52 = vld [vmem:[#allocation10 + $0x1580] sm:$0xff]  ;;  %v1352_v60 = vld [vmem:[#allocation10 + $0x16e8] sm:$0xff] }
 0x36c   :  { %7000 = vmatpush1.bf16.msra.mxu1 %v9472_v57  ;;  %v9522_v57 = vcombine.low %v1300_v46, %v1304_v58  ;;  %v9562_v58 = vcombine.low %v1340_v33, %v1344_v35 }
 0x36d   :  { %7328 = vmatpush1.bf16.msra.mxu0 %v9474_v12  ;;  %7010 = vmatprep.subr.bf16.mxu1 %v9481_v59  ;;  %v9529_v12 = vcombine.high %v1307_v52, %v1311_v53  ;;  %v9531_v59 = vcombine.high %v1308_v16, %v1312_v54  ;;  %v9570_v54 = vcombine.low %v1348_v44, %v1352_v60 }
 0x36e   :  { %7338 = vmatprep.subr.bf16.mxu0 %v9483_v18  ;;  %v1315_v18 = vld [vmem:[#allocation10 + $0x15c0] sm:$0xff] }
 0x36f   :  { %7002 = vmatmul.mubr.bf16.vlgmr.msra.gmra.mrb[8].mxu1 %v10934_v4  ;;  %v9537_v3 = vcombine.high %v1315_v18, %v1319_v61  ;;  %v9536_v17 = vcombine.low %v1315_v18, %v1319_v61  ;;  %v1364_v18 = vld [vmem:[#allocation10 + $0x1748] sm:$0xff] }
 0x370   :  { %7330 = vmatmul.mubr.bf16.vlgmr.msra.gmra.mrb[12].mxu0 %v10934_v4  ;;  %7011 = vmatpush1.bf16.msra.mxu1 %v9480_v1  ;;  %v9528_v1 = vcombine.low %v1307_v52, %v1311_v53  ;;  %v1356_v52 = vld [vmem:[#allocation10 + $0x1708] sm:$0xff] }
 0x371   :  { %7042 = vmatprep.mubr.bf16.mxu1 %v10937_v14  ;;  %7339 = vmatpush1.bf16.msra.mxu0 %v9482_v5  ;;  %v9539_v5 = vcombine.high %v1316_v62, %v1320_v63  ;;  %v1360_v53 = vld [vmem:[#allocation10 + $0x1728] sm:$0xff] }
 0x372   :  { %7370 = vmatprep.mubr.bf16.mxu0 %v10937_v14  ;;  %7012 = vmatprep.subr.bf16.mxu1 %v9489_v7  ;;  %v1323_v7 = vld [vmem:[#allocation10 + $0x1600] sm:$0xff]  ;;  %v1368_v61 = vld [vmem:[#allocation10 + $0x1768] sm:$0xff]  ;;  %v9578_v63 = vcombine.low %v1356_v52, %v1360_v53 }
 0x373   :  { %7340 = vmatprep.subr.bf16.mxu0 %v9491_v15  ;;  %v1328_v15 = vld [vmem:[#allocation10 + $0x1628] sm:$0xff]  ;;  %v9544_v27 = vcombine.low %v1323_v7, %v1327_v8 }
 0x374   :  { %7013 = vmatpush1.bf16.msra.mxu1 %v9488_v31  ;;  %v9545_v31 = vcombine.high %v1323_v7, %v1327_v8  ;;  %v9546_v28 = vcombine.low %v1324_v9, %v1328_v15  ;;  %v1372_v7 = vld [vmem:[#allocation10 + $0x1788] sm:$0xff] }
 0x375   :  { %7341 = vmatpush1.bf16.msra.mxu0 %v9490_v0  ;;  %7014 = vmatprep.subr.bf16.mxu1 %v9497_v20  ;;  %v9547_v0 = vcombine.high %v1324_v9, %v1328_v15  ;;  %v1331_v20 = vld [vmem:[#allocation10 + $0x1640] sm:$0xff]  ;;  %v1376_v8 = vld [vmem:[#allocation10 + $0x17a8] sm:$0xff]  ;;  %v9586_v15 = vcombine.low %v1364_v18, %v1368_v61 }
 0x376   :  { %7342 = vmatprep.subr.bf16.mxu0 %v9499_v23  ;;  %v1335_v23 = vld [vmem:[#allocation10 + $0x1660] sm:$0xff] }
 0x377   :  { %v9552_v36 = vcombine.low %v1331_v20, %v1335_v23 }
 0x378   :  { %7015 = vmatpush1.bf16.msra.mxu1 %v9496_v29  ;;  %v9553_v29 = vcombine.high %v1331_v20, %v1335_v23  ;;  %v1380_v20 = vld [vmem:[#allocation10 + $0x17c8] sm:$0xff] }
 0x379   :  { %7343 = vmatpush1.bf16.msra.mxu0 %v9498_v32  ;;  %7016 = vmatprep.subr.bf16.mxu1 %v9505_v34  ;;  %v9555_v32 = vcombine.high %v1332_v25, %v1336_v26  ;;  %v1339_v34 = vld [vmem:[#allocation10 + $0x1680] sm:$0xff]  ;;  %v1384_v23 = vld [vmem:[#allocation10 + $0x17e8] sm:$0xff] }
 0x37a   :  { %7344 = vmatprep.subr.bf16.mxu0 %v9507_v30  ;;  %v1343_v30 = vld [vmem:[#allocation10 + $0x16a0] sm:$0xff]  ;;  %v10942_v26 = vld [vmem:[#allocation3 + $0x18] sm:$0xff] }
 0x37b   :  { %v9560_v46 = vcombine.low %v1339_v34, %v1343_v30 }
 0x37c   :  { %7017 = vmatpush1.bf16.msra.mxu1 %v9504_v39  ;;  %v9561_v39 = vcombine.high %v1339_v34, %v1343_v30  ;;  %v1391_v34 = vld [vmem:[#allocation10 + $0x1820] sm:$0xff]  ;;  %v1388_v30 = vld [vmem:[#allocation10 + $0x1808] sm:$0xff] }
 0x37d   :  { %7345 = vmatpush1.bf16.msra.mxu0 %v9506_v40  ;;  %7018 = vmatprep.subr.bf16.mxu1 %v9513_v41  ;;  %v9563_v40 = vcombine.high %v1340_v33, %v1344_v35  ;;  %v1347_v41 = vld [vmem:[#allocation10 + $0x16c0] sm:$0xff]  ;;  %v1392_v33 = vld [vmem:[#allocation10 + $0x1828] sm:$0xff]  ;;  %v10946_v35 = vrot.slane %v10942_v26, %v10850_v11 }
 0x37e   :  { %7346 = vmatprep.subr.bf16.mxu0 %v9515_v42  ;;  %v1351_v42 = vld [vmem:[#allocation10 + $0x16e0] sm:$0xff] }
 0x37f   :  { %v9568_v16 = vcombine.low %v1347_v41, %v1351_v42 }
 0x380   :  { %7019 = vmatpush1.bf16.msra.mxu1 %v9512_v48  ;;  %v9569_v48 = vcombine.high %v1347_v41, %v1351_v42  ;;  %v585_v41 = vcombine.high %v10946_v35, %v10946_v35  ;;  %v1395_v42 = vld [vmem:[#allocation10 + $0x1840] sm:$0xff] }
 0x381   :  { %7347 = vmatpush1.bf16.msra.mxu0 %v9514_v49  ;;  %7020 = vmatprep.subr.bf16.mxu1 %v9521_v50  ;;  %v9571_v49 = vcombine.high %v1348_v44, %v1352_v60  ;;  %v1355_v50 = vld [vmem:[#allocation10 + $0x1700] sm:$0xff] }
 0x382   :  { %7348 = vmatprep.subr.bf16.mxu0 %v9523_v51  ;;  %v1359_v51 = vld [vmem:[#allocation10 + $0x1720] sm:$0xff] }
 0x383   :  { %v9576_v62 = vcombine.low %v1355_v50, %v1359_v51  ;;  %v1399_v44 = vld [vmem:[#allocation10 + $0x1860] sm:$0xff] }
 0x384   :  { %7021 = vmatpush1.bf16.msra.mxu1 %v9520_v55  ;;  %v9577_v55 = vcombine.high %v1355_v50, %v1359_v51  ;;  %v9617_v50 = vcombine.high %v1395_v42, %v1399_v44  ;;  %v1403_v51 = vld [vmem:[#allocation10 + $0x1880] sm:$0xff] }
 0x385   :  { %7349 = vmatpush1.bf16.msra.mxu0 %v9522_v57  ;;  %7022 = vmatprep.subr.bf16.mxu1 %v9529_v12  ;;  %v9579_v57 = vcombine.high %v1356_v52, %v1360_v53  ;;  %v1363_v12 = vld [vmem:[#allocation10 + $0x1740] sm:$0xff]  ;;  %v10955_v53 = vpack.c.bf16 %v585_v41, %v585_v41 }
 0x386   :  { %7350 = vmatprep.subr.bf16.mxu0 %v9531_v59  ;;  %v1367_v59 = vld [vmem:[#allocation10 + $0x1760] sm:$0xff] }
 0x387   :  { %v9584_v9 = vcombine.low %v1363_v12, %v1367_v59  ;;  %v1407_v52 = vld [vmem:[#allocation10 + $0x18a0] sm:$0xff] }
 0x388   :  { %7023 = vmatpush1.bf16.msra.mxu1 %v9528_v1  ;;  %v9585_v1 = vcombine.high %v1363_v12, %v1367_v59  ;;  %v9625_v12 = vcombine.high %v1403_v51, %v1407_v52 }
 0x389   :  { %7351 = vmatpush1.bf16.msra.mxu0 %v9530_v2  ;;  %7024 = vmatprep.subr.bf16.mxu1 %v9537_v3  ;;  %v9587_v2 = vcombine.high %v1364_v18, %v1368_v61  ;;  %v1371_v3 = vld [vmem:[#allocation10 + $0x1780] sm:$0xff] }
 0x38a   :  { %7352 = vmatprep.subr.bf16.mxu0 %v9539_v5  ;;  %v1375_v5 = vld [vmem:[#allocation10 + $0x17a0] sm:$0xff] }
 0x38b   :  { %v9592_v25 = vcombine.low %v1371_v3, %v1375_v5  ;;  %v1411_v18 = vld [vmem:[#allocation10 + $0x18c0] sm:$0xff] }
 0x38c   :  { %7025 = vmatpush1.bf16.msra.mxu1 %v9536_v17  ;;  %v9593_v17 = vcombine.high %v1371_v3, %v1375_v5  ;;  %v1415_v61 = vld [vmem:[#allocation10 + $0x18e0] sm:$0xff] }
 0x38d   :  { %7353 = vmatpush1.bf16.msra.mxu0 %v9538_v19  ;;  %7026 = vmatprep.subr.bf16.mxu1 %v9545_v31  ;;  %v9595_v19 = vcombine.high %v1372_v7, %v1376_v8  ;;  %v1379_v31 = vld [vmem:[#allocation10 + $0x17c0] sm:$0xff]  ;;  %v9633_v3 = vcombine.high %v1411_v18, %v1415_v61 }
 0x38e   :  { %7354 = vmatprep.subr.bf16.mxu0 %v9547_v0  ;;  %v1383_v0 = vld [vmem:[#allocation10 + $0x17e0] sm:$0xff] }
 0x390   :  { %7027 = vmatpush1.bf16.msra.mxu1 %v9544_v27  ;;  %v9594_v27 = vcombine.low %v1372_v7, %v1376_v8  ;;  %v1419_v7 = vld [vmem:[#allocation10 + $0x1900] sm:$0xff] }
 0x391   :  { %7355 = vmatpush1.bf16.msra.mxu0 %v9546_v28  ;;  %7028 = vmatprep.subr.bf16.mxu1 %v9553_v29  ;;  %v9601_v28 = vcombine.high %v1379_v31, %v1383_v0  ;;  %v9603_v29 = vcombine.high %v1380_v20, %v1384_v23  ;;  %v1423_v8 = vld [vmem:[#allocation10 + $0x1920] sm:$0xff] }
 0x392   :  { %7356 = vmatprep.subr.bf16.mxu0 %v9555_v32  ;;  %v1387_v32 = vld [vmem:[#allocation10 + $0x1800] sm:$0xff] }
 0x393   :  { %v9608_v60 = vcombine.low %v1387_v32, %v1391_v34 }
 0x394   :  { %7029 = vmatpush1.bf16.msra.mxu1 %v9552_v36  ;;  %v9600_v36 = vcombine.low %v1379_v31, %v1383_v0  ;;  %v9641_v31 = vcombine.high %v1419_v7, %v1423_v8 }
 0x395   :  { %7357 = vmatpush1.bf16.msra.mxu0 %v9554_v38  ;;  %7030 = vmatprep.subr.bf16.mxu1 %v9561_v39  ;;  %v9602_v38 = vcombine.low %v1380_v20, %v1384_v23  ;;  %v9609_v39 = vcombine.high %v1387_v32, %v1391_v34  ;;  %v1427_v20 = vld [vmem:[#allocation10 + $0x1940] sm:$0xff] }
 0x396   :  { %7358 = vmatprep.subr.bf16.mxu0 %v9563_v40  ;;  %v9611_v40 = vcombine.high %v1388_v30, %v1392_v33  ;;  %v1431_v23 = vld [vmem:[#allocation10 + $0x1960] sm:$0xff] }
 0x397   :  { %v9649_v32 = vcombine.high %v1427_v20, %v1431_v23 }
 0x398   :  { %7031 = vmatpush1.bf16.msra.mxu1 %v9560_v46  ;;  %v1396_v46 = vld [vmem:[#allocation10 + $0x1848] sm:$0xff] }
 0x399   :  { %7359 = vmatpush1.bf16.msra.mxu0 %v9562_v58  ;;  %7032 = vmatprep.subr.bf16.mxu1 %v9569_v48  ;;  %v1400_v58 = vld [vmem:[#allocation10 + $0x1868] sm:$0xff]  ;;  %v10952_v48 = vpack.c.bf16 %v10928_v56, %v10928_v56 }
 0x39a   :  { %7360 = vmatprep.subr.bf16.mxu0 %v9571_v49  ;;  %v9610_v49 = vcombine.low %v1388_v30, %v1392_v33  ;;  %v9618_v56 = vcombine.low %v1396_v46, %v1400_v58  ;;  %v1435_v30 = vld [vmem:[#allocation10 + $0x1980] sm:$0xff] }
 0x39b   :  { %v1439_v33 = vld [vmem:[#allocation10 + $0x19a0] sm:$0xff] }
 0x39c   :  { %7033 = vmatpush1.bf16.msra.mxu1 %v9568_v16  ;;  %v9619_v16 = vcombine.high %v1396_v46, %v1400_v58  ;;  %v9657_v41 = vcombine.high %v1435_v30, %v1439_v33  ;;  %v1444_v46 = vld [vmem:[#allocation10 + $0x19c8] sm:$0xff] }
 0x39d   :  { %7361 = vmatpush1.bf16.msra.mxu0 %v9570_v54  ;;  %7034 = vmatprep.subr.bf16.mxu1 %v9577_v55  ;;  %v1404_v54 = vld [vmem:[#allocation10 + $0x1888] sm:$0xff] }
 0x39e   :  { %7362 = vmatprep.subr.bf16.mxu0 %v9579_v57  ;;  %v1408_v55 = vld [vmem:[#allocation10 + $0x18a8] sm:$0xff]  ;;  %v9616_v57 = vcombine.low %v1395_v42, %v1399_v44  ;;  %v1443_v44 = vld [vmem:[#allocation10 + $0x19c0] sm:$0xff] }
 0x39f   :  { %v9627_v59 = vcombine.high %v1404_v54, %v1408_v55  ;;  %v1448_v58 = vld [vmem:[#allocation10 + $0x19e8] sm:$0xff] }
 0x3a0   :  { %7035 = vmatpush1.bf16.msra.mxu1 %v9576_v62  ;;  %v1412_v62 = vld [vmem:[#allocation10 + $0x18c8] sm:$0xff] }
 0x3a1   :  { %7363 = vmatpush1.bf16.msra.mxu0 %v9578_v63  ;;  %7036 = vmatprep.subr.bf16.mxu1 %v9585_v1  ;;  %v1416_v63 = vld [vmem:[#allocation10 + $0x18e8] sm:$0xff]  ;;  %v9624_v1 = vcombine.low %v1403_v51, %v1407_v52  ;;  %v9667_v52 = vcombine.high %v1444_v46, %v1448_v58 }
 0x3a2   :  { %7364 = vmatprep.subr.bf16.mxu0 %v9587_v2  ;;  %v9626_v2 = vcombine.low %v1404_v54, %v1408_v55  ;;  %v9635_v5 = vcombine.high %v1412_v62, %v1416_v63  ;;  %v1455_v54 = vld [vmem:[#allocation10 + $0x1a20] sm:$0xff]  ;;  %v1452_v55 = vld [vmem:[#allocation10 + $0x1a08] sm:$0xff] }
 0x3a4   :  { %7037 = vmatpush1.bf16.msra.mxu1 %v9584_v9  ;;  %v1420_v9 = vld [vmem:[#allocation10 + $0x1908] sm:$0xff] }
 0x3a5   :  { %7365 = vmatpush1.bf16.msra.mxu0 %v9586_v15  ;;  %7038 = vmatprep.subr.bf16.mxu1 %v9593_v17  ;;  %v1424_v15 = vld [vmem:[#allocation10 + $0x1928] sm:$0xff]  ;;  %v9632_v17 = vcombine.low %v1411_v18, %v1415_v61  ;;  %v1459_v61 = vld [vmem:[#allocation10 + $0x1a40] sm:$0xff] }
 0x3a6   :  { %7366 = vmatprep.subr.bf16.mxu0 %v9595_v19  ;;  %v9634_v19 = vcombine.low %v1412_v62, %v1416_v63  ;;  %v9643_v0 = vcombine.high %v1420_v9, %v1424_v15  ;;  %v1463_v62 = vld [vmem:[#allocation10 + $0x1a60] sm:$0xff]  ;;  %v1460_v63 = vld [vmem:[#allocation10 + $0x1a48] sm:$0xff] }
 0x3a8   :  { %7039 = vmatpush1.bf16.msra.mxu1 %v9592_v25  ;;  %v1428_v25 = vld [vmem:[#allocation10 + $0x1948] sm:$0xff] }
 0x3a9   :  { %7367 = vmatpush1.bf16.msra.mxu0 %v9594_v27  ;;  %7040 = vmatprep.subr.bf16.mxu1 %v9601_v28  ;;  %v1432_v27 = vld [vmem:[#allocation10 + $0x1968] sm:$0xff]  ;;  %v9640_v28 = vcombine.low %v1419_v7, %v1423_v8  ;;  %v1467_v8 = vld [vmem:[#allocation10 + $0x1a80] sm:$0xff] }
 0x3aa   :  { %7368 = vmatprep.subr.bf16.mxu0 %v9603_v29  ;;  %v9642_v29 = vcombine.low %v1420_v9, %v1424_v15  ;;  %v9651_v34 = vcombine.high %v1428_v25, %v1432_v27  ;;  %v1471_v9 = vld [vmem:[#allocation10 + $0x1aa0] sm:$0xff]  ;;  %v1468_v15 = vld [vmem:[#allocation10 + $0x1a88] sm:$0xff] }
 0x3ac   :  { %7041 = vmatpush1.bf16.msra.mxu1 %v9600_v36  ;;  %v1436_v36 = vld [vmem:[#allocation10 + $0x1988] sm:$0xff] }
 0x3ad   :  { %7369 = vmatpush1.bf16.msra.mxu0 %v9602_v38  ;;  %7051 = vmatprep.subr.bf16.mxu1 %v9609_v39  ;;  %v1440_v38 = vld [vmem:[#allocation10 + $0x19a8] sm:$0xff]  ;;  %v9648_v39 = vcombine.low %v1427_v20, %v1431_v23  ;;  %v1475_v23 = vld [vmem:[#allocation10 + $0x1ac0] sm:$0xff] }
 0x3ae   :  { %7379 = vmatprep.subr.bf16.mxu0 %v9611_v40  ;;  %v9650_v40 = vcombine.low %v1428_v25, %v1432_v27  ;;  %v9659_v42 = vcombine.high %v1436_v36, %v1440_v38  ;;  %v1479_v25 = vld [vmem:[#allocation10 + $0x1ae0] sm:$0xff]  ;;  %v1476_v27 = vld [vmem:[#allocation10 + $0x1ac8] sm:$0xff] }
 0x3af   :  { %7043 = vmatmul.mubr.bf16.vlgmr.msra.gmra.mrb[8].mxu1 %v10952_v48 }
 0x3b0   :  { %7371 = vmatmul.mubr.bf16.vlgmr.msra.gmra.mrb[12].mxu0 %v10952_v48  ;;  %7052 = vmatpush1.bf16.msra.mxu1 %v9608_v60  ;;  %v1447_v60 = vld [vmem:[#allocation10 + $0x19e0] sm:$0xff] }
 0x3b1   :  { %7083 = vmatprep.mubr.bf16.mxu1 %v10955_v53  ;;  %7380 = vmatpush1.bf16.msra.mxu0 %v9610_v49  ;;  %v9656_v49 = vcombine.low %v1435_v30, %v1439_v33  ;;  %v9665_v51 = vcombine.high %v1443_v44, %v1447_v60  ;;  %v1483_v33 = vld [vmem:[#allocation10 + $0x1b00] sm:$0xff] }
 0x3b2   :  { %7411 = vmatprep.mubr.bf16.mxu0 %v10955_v53  ;;  %7053 = vmatprep.subr.bf16.mxu1 %v9617_v50  ;;  %v9658_v50 = vcombine.low %v1436_v36, %v1440_v38  ;;  %v1487_v36 = vld [vmem:[#allocation10 + $0x1b20] sm:$0xff]  ;;  %v1484_v38 = vld [vmem:[#allocation10 + $0x1b08] sm:$0xff] }
 0x3b3   :  { %7381 = vmatprep.subr.bf16.mxu0 %v9619_v16  ;;  %v1451_v16 = vld [vmem:[#allocation10 + $0x1a00] sm:$0xff] }
 0x3b4   :  { %7054 = vmatpush1.bf16.msra.mxu1 %v9616_v57  ;;  %v1456_v57 = vld [vmem:[#allocation10 + $0x1a28] sm:$0xff] }
 0x3b5   :  { %7382 = vmatpush1.bf16.msra.mxu0 %v9618_v56  ;;  %7055 = vmatprep.subr.bf16.mxu1 %v9625_v12  ;;  %v9664_v56 = vcombine.low %v1443_v44, %v1447_v60  ;;  %v9666_v12 = vcombine.low %v1444_v46, %v1448_v58  ;;  %v9675_v18 = vcombine.high %v1452_v55, %v1456_v57  ;;  %v1491_v60 = vld [vmem:[#allocation10 + $0x1b40] sm:$0xff]  ;;  %v1492_v58 = vld [vmem:[#allocation10 + $0x1b48] sm:$0xff] }
 0x3b6   :  { %7383 = vmatprep.subr.bf16.mxu0 %v9627_v59  ;;  %v9673_v59 = vcombine.high %v1451_v16, %v1455_v54  ;;  %v1495_v46 = vld [vmem:[#allocation10 + $0x1b60] sm:$0xff] }
 0x3b8   :  { %7056 = vmatpush1.bf16.msra.mxu1 %v9624_v1  ;;  %v1464_v1 = vld [vmem:[#allocation10 + $0x1a68] sm:$0xff] }
 0x3b9   :  { %7384 = vmatpush1.bf16.msra.mxu0 %v9626_v2  ;;  %7057 = vmatprep.subr.bf16.mxu1 %v9633_v3  ;;  %v9672_v2 = vcombine.low %v1451_v16, %v1455_v54  ;;  %v9674_v3 = vcombine.low %v1452_v55, %v1456_v57  ;;  %v9683_v7 = vcombine.high %v1460_v63, %v1464_v1  ;;  %v1499_v54 = vld [vmem:[#allocation10 + $0x1b80] sm:$0xff]  ;;  %v1500_v57 = vld [vmem:[#allocation10 + $0x1b88] sm:$0xff] }
 0x3ba   :  { %7385 = vmatprep.subr.bf16.mxu0 %v9635_v5  ;;  %v9681_v5 = vcombine.high %v1459_v61, %v1463_v62  ;;  %v1503_v55 = vld [vmem:[#allocation10 + $0x1ba0] sm:$0xff] }
 0x3bc   :  { %7058 = vmatpush1.bf16.msra.mxu1 %v9632_v17  ;;  %v1472_v17 = vld [vmem:[#allocation10 + $0x1aa8] sm:$0xff] }
 0x3bd   :  { %7386 = vmatpush1.bf16.msra.mxu0 %v9634_v19  ;;  %7059 = vmatprep.subr.bf16.mxu1 %v9641_v31  ;;  %v9680_v19 = vcombine.low %v1459_v61, %v1463_v62  ;;  %v9682_v31 = vcombine.low %v1460_v63, %v1464_v1  ;;  %v9691_v20 = vcombine.high %v1468_v15, %v1472_v17  ;;  %v1507_v62 = vld [vmem:[#allocation10 + $0x1bc0] sm:$0xff]  ;;  %v1508_v1 = vld [vmem:[#allocation10 + $0x1bc8] sm:$0xff] }
 0x3be   :  { %7387 = vmatprep.subr.bf16.mxu0 %v9643_v0  ;;  %v9689_v0 = vcombine.high %v1467_v8, %v1471_v9  ;;  %v1511_v63 = vld [vmem:[#allocation10 + $0x1be0] sm:$0xff] }
 0x3c0   :  { %7060 = vmatpush1.bf16.msra.mxu1 %v9640_v28  ;;  %v1480_v28 = vld [vmem:[#allocation10 + $0x1ae8] sm:$0xff] }
 0x3c1   :  { %7388 = vmatpush1.bf16.msra.mxu0 %v9642_v29  ;;  %7061 = vmatprep.subr.bf16.mxu1 %v9649_v32  ;;  %v9688_v29 = vcombine.low %v1467_v8, %v1471_v9  ;;  %v9690_v32 = vcombine.low %v1468_v15, %v1472_v17  ;;  %v9699_v30 = vcombine.high %v1476_v27, %v1480_v28  ;;  %v1515_v15 = vld [vmem:[#allocation10 + $0x1c00] sm:$0xff] }
 0x3c2   :  { %7389 = vmatprep.subr.bf16.mxu0 %v9651_v34  ;;  %v9697_v34 = vcombine.high %v1475_v23, %v1479_v25  ;;  %v9729_v8 = vcombine.high %v1507_v62, %v1511_v63  ;;  %v1519_v17 = vld [vmem:[#allocation10 + $0x1c20] sm:$0xff] }
 0x3c4   :  { %7062 = vmatpush1.bf16.msra.mxu1 %v9648_v39  ;;  %v1488_v39 = vld [vmem:[#allocation10 + $0x1b28] sm:$0xff] }
 0x3c5   :  { %7390 = vmatpush1.bf16.msra.mxu0 %v9650_v40  ;;  %7063 = vmatprep.subr.bf16.mxu1 %v9657_v41  ;;  %v9696_v40 = vcombine.low %v1475_v23, %v1479_v25  ;;  %v9698_v41 = vcombine.low %v1476_v27, %v1480_v28  ;;  %v9707_v44 = vcombine.high %v1484_v38, %v1488_v39  ;;  %v1523_v28 = vld [vmem:[#allocation10 + $0x1c40] sm:$0xff] }
 0x3c6   :  { %7391 = vmatprep.subr.bf16.mxu0 %v9659_v42  ;;  %v9705_v42 = vcombine.high %v1483_v33, %v1487_v36  ;;  %v9737_v23 = vcombine.high %v1515_v15, %v1519_v17 }
 0x3c8   :  { %7064 = vmatpush1.bf16.msra.mxu1 %v9656_v49  ;;  %v1496_v49 = vld [vmem:[#allocation10 + $0x1b68] sm:$0xff] }
 0x3c9   :  { %7392 = vmatpush1.bf16.msra.mxu0 %v9658_v50  ;;  %7065 = vmatprep.subr.bf16.mxu1 %v9665_v51  ;;  %v9704_v50 = vcombine.low %v1483_v33, %v1487_v36  ;;  %v9706_v51 = vcombine.low %v1484_v38, %v1488_v39  ;;  %v9715_v16 = vcombine.high %v1492_v58, %v1496_v49  ;;  %v1531_v38 = vld [vmem:[#allocation10 + $0x1c80] sm:$0xff] }
 0x3ca   :  { %7393 = vmatprep.subr.bf16.mxu0 %v9667_v52  ;;  %v9713_v52 = vcombine.high %v1491_v60, %v1495_v46  ;;  %v1535_v39 = vld [vmem:[#allocation10 + $0x1ca0] sm:$0xff] }
 0x3cc   :  { %7066 = vmatpush1.bf16.msra.mxu1 %v9664_v56  ;;  %v1504_v56 = vld [vmem:[#allocation10 + $0x1ba8] sm:$0xff] }
 0x3cd   :  { %7394 = vmatpush1.bf16.msra.mxu0 %v9666_v12  ;;  %7067 = vmatprep.subr.bf16.mxu1 %v9673_v59  ;;  %v9712_v12 = vcombine.low %v1491_v60, %v1495_v46  ;;  %v9714_v59 = vcombine.low %v1492_v58, %v1496_v49  ;;  %v9723_v61 = vcombine.high %v1500_v57, %v1504_v56  ;;  %v1539_v49 = vld [vmem:[#allocation10 + $0x1cc0] sm:$0xff] }
 0x3ce   :  { %7395 = vmatprep.subr.bf16.mxu0 %v9675_v18  ;;  %v9721_v18 = vcombine.high %v1499_v54, %v1503_v55  ;;  %v9753_v46 = vcombine.high %v1531_v38, %v1535_v39 }
 0x3d0   :  { %7068 = vmatpush1.bf16.msra.mxu1 %v9672_v2  ;;  %v1512_v2 = vld [vmem:[#allocation10 + $0x1be8] sm:$0xff] }
 0x3d1   :  { %7396 = vmatpush1.bf16.msra.mxu0 %v9674_v3  ;;  %7069 = vmatprep.subr.bf16.mxu1 %v9681_v5  ;;  %v570_v3 = vcombine.high %v10942_v26, %v10942_v26  ;;  %v9720_v5 = vcombine.low %v1499_v54, %v1503_v55  ;;  %v9731_v9 = vcombine.high %v1508_v1, %v1512_v2 }
 0x3d2   :  { %7397 = vmatprep.subr.bf16.mxu0 %v9683_v7  ;;  %v9722_v7 = vcombine.low %v1500_v57, %v1504_v56  ;;  %v9730_v26 = vcombine.low %v1508_v1, %v1512_v2  ;;  %v1547_v56 = vld [vmem:[#allocation10 + $0x1d00] sm:$0xff] }
 0x3d3   :  { %v1555_v2 = vld [vmem:[#allocation10 + $0x1d40] sm:$0xff] }
 0x3d4   :  { %7070 = vmatpush1.bf16.msra.mxu1 %v9680_v19  ;;  %v1516_v19 = vld [vmem:[#allocation10 + $0x1c08] sm:$0xff] }
 0x3d5   :  { %7398 = vmatpush1.bf16.msra.mxu0 %v9682_v31  ;;  %7071 = vmatprep.subr.bf16.mxu1 %v9689_v0  ;;  %v1520_v31 = vld [vmem:[#allocation10 + $0x1c28] sm:$0xff]  ;;  %v10963_v0 = vrot.slane %v570_v3, %v10850_v11  ;;  %v10969_v11 = vpack.c.bf16 %v10946_v35, %v10946_v35  ;;  %v1559_v3 = vld [vmem:[#allocation10 + $0x1d60] sm:$0xff] }
 0x3d6   :  { %7399 = vmatprep.subr.bf16.mxu0 %v9691_v20  ;;  %v9728_v20 = vcombine.low %v1507_v62, %v1511_v63  ;;  %v9739_v25 = vcombine.high %v1516_v19, %v1520_v31  ;;  %v9738_v33 = vcombine.low %v1516_v19, %v1520_v31  ;;  %v1563_v19 = vld [vmem:[#allocation10 + $0x1d80] sm:$0xff] }
 0x3d7   :  { %v586_v27 = vcombine.high %v10963_v0, %v10963_v0  ;;  %v1567_v31 = vld [vmem:[#allocation10 + $0x1da0] sm:$0xff] }
 0x3d8   :  { %7072 = vmatpush1.bf16.msra.mxu1 %v9688_v29  ;;  %v1527_v29 = vld [vmem:[#allocation10 + $0x1c60] sm:$0xff] }
 0x3d9   :  { %7400 = vmatpush1.bf16.msra.mxu0 %v9690_v32  ;;  %7073 = vmatprep.subr.bf16.mxu1 %v9697_v34  ;;  %v9736_v32 = vcombine.low %v1515_v15, %v1519_v17  ;;  %v1524_v34 = vld [vmem:[#allocation10 + $0x1c48] sm:$0xff]  ;;  %v9745_v36 = vcombine.high %v1523_v28, %v1527_v29  ;;  %v9744_v60 = vcombine.low %v1523_v28, %v1527_v29  ;;  %v1571_v29 = vld [vmem:[#allocation10 + $0x1dc0] sm:$0xff] }
 0x3da   :  { %7401 = vmatprep.subr.bf16.mxu0 %v9699_v30  ;;  %v1528_v30 = vld [vmem:[#allocation10 + $0x1c68] sm:$0xff]  ;;  %v9777_v15 = vcombine.high %v1555_v2, %v1559_v3 }
 0x3db   :  { %v9746_v35 = vcombine.low %v1524_v34, %v1528_v30 }
 0x3dc   :  { %7074 = vmatpush1.bf16.msra.mxu1 %v9696_v40  ;;  %v10972_v40 = vpack.c.bf16 %v586_v27, %v586_v27  ;;  %v9785_v27 = vcombine.high %v1563_v19, %v1567_v31 }
 0x3dd   :  { %7402 = vmatpush1.bf16.msra.mxu0 %v9698_v41  ;;  %7075 = vmatprep.subr.bf16.mxu1 %v9705_v42  ;;  %v9747_v41 = vcombine.high %v1524_v34, %v1528_v30  ;;  %v1532_v42 = vld [vmem:[#allocation10 + $0x1c88] sm:$0xff] }
 0x3de   :  { %7403 = vmatprep.subr.bf16.mxu0 %v9707_v44  ;;  %v1536_v44 = vld [vmem:[#allocation10 + $0x1ca8] sm:$0xff] }
 0x3df   :  { %v9755_v58 = vcombine.high %v1532_v42, %v1536_v44  ;;  %v9754_v54 = vcombine.low %v1532_v42, %v1536_v44  ;;  %v1572_v34 = vld [vmem:[#allocation10 + $0x1dc8] sm:$0xff]  ;;  %v1583_v42 = vld [vmem:[#allocation10 + $0x1e20] sm:$0xff] }
 0x3e0   :  { %7076 = vmatpush1.bf16.msra.mxu1 %v9704_v50  ;;  %v1543_v50 = vld [vmem:[#allocation10 + $0x1ce0] sm:$0xff]  ;;  %v1576_v30 = vld [vmem:[#allocation10 + $0x1de8] sm:$0xff] }
 0x3e1   :  { %7404 = vmatpush1.bf16.msra.mxu0 %v9706_v51  ;;  %7077 = vmatprep.subr.bf16.mxu1 %v9713_v52  ;;  %v1540_v51 = vld [vmem:[#allocation10 + $0x1cc8] sm:$0xff]  ;;  %v9761_v55 = vcombine.high %v1539_v49, %v1543_v50 }
 0x3e2   :  { %7405 = vmatprep.subr.bf16.mxu0 %v9715_v16  ;;  %v1544_v52 = vld [vmem:[#allocation10 + $0x1ce8] sm:$0xff]  ;;  %v9752_v16 = vcombine.low %v1531_v38, %v1535_v39  ;;  %v9795_v39 = vcombine.high %v1572_v34, %v1576_v30 }
 0x3e3   :  { %v9763_v57 = vcombine.high %v1540_v51, %v1544_v52  ;;  %v9762_v62 = vcombine.low %v1540_v51, %v1544_v52  ;;  %v1580_v44 = vld [vmem:[#allocation10 + $0x1e08] sm:$0xff]  ;;  %v1591_v51 = vld [vmem:[#allocation10 + $0x1e60] sm:$0xff] }
 0x3e4   :  { %7078 = vmatpush1.bf16.msra.mxu1 %v9712_v12  ;;  %v1551_v12 = vld [vmem:[#allocation10 + $0x1d20] sm:$0xff]  ;;  %v1588_v52 = vld [vmem:[#allocation10 + $0x1e48] sm:$0xff] }
 0x3e5   :  { %7406 = vmatpush1.bf16.msra.mxu0 %v9714_v59  ;;  %7079 = vmatprep.subr.bf16.mxu1 %v9721_v18  ;;  %v1548_v59 = vld [vmem:[#allocation10 + $0x1d08] sm:$0xff]  ;;  %v9769_v63 = vcombine.high %v1547_v56, %v1551_v12 }
 0x3e6   :  { %7407 = vmatprep.subr.bf16.mxu0 %v9723_v61  ;;  %v1552_v18 = vld [vmem:[#allocation10 + $0x1d28] sm:$0xff]  ;;  %v9760_v61 = vcombine.low %v1539_v49, %v1543_v50  ;;  %v1587_v50 = vld [vmem:[#allocation10 + $0x1e40] sm:$0xff] }
 0x3e7   :  { %v9771_v1 = vcombine.high %v1548_v59, %v1552_v18 }
 0x3e8   :  { %7080 = vmatpush1.bf16.msra.mxu1 %v9720_v5  ;;  %v1556_v5 = vld [vmem:[#allocation10 + $0x1d48] sm:$0xff] }
 0x3e9   :  { %7408 = vmatpush1.bf16.msra.mxu0 %v9722_v7  ;;  %7081 = vmatprep.subr.bf16.mxu1 %v9729_v8  ;;  %v1560_v7 = vld [vmem:[#allocation10 + $0x1d68] sm:$0xff]  ;;  %v9768_v8 = vcombine.low %v1547_v56, %v1551_v12  ;;  %v1595_v12 = vld [vmem:[#allocation10 + $0x1e80] sm:$0xff] }
 0x3ea   :  { %7409 = vmatprep.subr.bf16.mxu0 %v9731_v9  ;;  %v9770_v9 = vcombine.low %v1548_v59, %v1552_v18  ;;  %v9779_v17 = vcombine.high %v1556_v5, %v1560_v7  ;;  %v1599_v59 = vld [vmem:[#allocation10 + $0x1ea0] sm:$0xff]  ;;  %v1596_v18 = vld [vmem:[#allocation10 + $0x1e88] sm:$0xff] }
 0x3ec   :  { %7082 = vmatpush1.bf16.msra.mxu1 %v9728_v20  ;;  %v1564_v20 = vld [vmem:[#allocation10 + $0x1d88] sm:$0xff] }
 0x3ed   :  { %7410 = vmatpush1.bf16.msra.mxu0 %v9730_v26  ;;  %7092 = vmatprep.subr.bf16.mxu1 %v9737_v23  ;;  %v1568_v26 = vld [vmem:[#allocation10 + $0x1da8] sm:$0xff]  ;;  %v9776_v23 = vcombine.low %v1555_v2, %v1559_v3  ;;  %v1603_v3 = vld [vmem:[#allocation10 + $0x1ec0] sm:$0xff] }
 0x3ee   :  { %7420 = vmatprep.subr.bf16.mxu0 %v9739_v25  ;;  %v9778_v25 = vcombine.low %v1556_v5, %v1560_v7  ;;  %v9787_v28 = vcombine.high %v1564_v20, %v1568_v26  ;;  %v1607_v5 = vld [vmem:[#allocation10 + $0x1ee0] sm:$0xff]  ;;  %v1604_v7 = vld [vmem:[#allocation10 + $0x1ec8] sm:$0xff] }
 0x3ef   :  { %7084 = vmatmul.mubr.bf16.vlgmr.msra.gmra.mrb[8].mxu1 %v10969_v11 }
 0x3f0   :  { %7412 = vmatmul.mubr.bf16.vlgmr.msra.gmra.mrb[12].mxu0 %v10969_v11  ;;  %7093 = vmatpush1.bf16.msra.mxu1 %v9736_v32  ;;  %v1575_v32 = vld [vmem:[#allocation10 + $0x1de0] sm:$0xff] }
 0x3f1   :  { %7124 = vmatprep.mubr.bf16.mxu1 %v10972_v40  ;;  %7421 = vmatpush1.bf16.msra.mxu0 %v9738_v33  ;;  %v9784_v33 = vcombine.low %v1563_v19, %v1567_v31  ;;  %v9793_v38 = vcombine.high %v1571_v29, %v1575_v32  ;;  %v1611_v31 = vld [vmem:[#allocation10 + $0x1f00] sm:$0xff] }
 0x3f2   :  { %7452 = vmatprep.mubr.bf16.mxu0 %v10972_v40  ;;  %7094 = vmatprep.subr.bf16.mxu1 %v9745_v36  ;;  %v9786_v36 = vcombine.low %v1564_v20, %v1568_v26  ;;  %v1615_v20 = vld [vmem:[#allocation10 + $0x1f20] sm:$0xff]  ;;  %v1612_v26 = vld [vmem:[#allocation10 + $0x1f08] sm:$0xff] }
 0x3f3   :  { %7422 = vmatprep.subr.bf16.mxu0 %v9747_v41  ;;  %v1579_v41 = vld [vmem:[#allocation10 + $0x1e00] sm:$0xff] }
 0x3f4   :  { %7095 = vmatpush1.bf16.msra.mxu1 %v9744_v60  ;;  %v1584_v60 = vld [vmem:[#allocation10 + $0x1e28] sm:$0xff] }
 0x3f5   :  { %7423 = vmatpush1.bf16.msra.mxu0 %v9746_v35  ;;  %7096 = vmatprep.subr.bf16.mxu1 %v9753_v46  ;;  %v9792_v35 = vcombine.low %v1571_v29, %v1575_v32  ;;  %v9794_v46 = vcombine.low %v1572_v34, %v1576_v30  ;;  %v9803_v49 = vcombine.high %v1580_v44, %v1584_v60  ;;  %v1619_v32 = vld [vmem:[#allocation10 + $0x1f40] sm:$0xff]  ;;  %v1620_v30 = vld [vmem:[#allocation10 + $0x1f48] sm:$0xff] }
 0x3f6   :  { %7424 = vmatprep.subr.bf16.mxu0 %v9755_v58  ;;  %v9801_v58 = vcombine.high %v1579_v41, %v1583_v42  ;;  %v1623_v34 = vld [vmem:[#allocation10 + $0x1f60] sm:$0xff] }
 0x3f8   :  { %7097 = vmatpush1.bf16.msra.mxu1 %v9752_v16  ;;  %v1592_v16 = vld [vmem:[#allocation10 + $0x1e68] sm:$0xff] }
 0x3f9   :  { %7425 = vmatpush1.bf16.msra.mxu0 %v9754_v54  ;;  %7098 = vmatprep.subr.bf16.mxu1 %v9761_v55  ;;  %v9800_v54 = vcombine.low %v1579_v41, %v1583_v42  ;;  %v9802_v55 = vcombine.low %v1580_v44, %v1584_v60  ;;  %v9811_v56 = vcombine.high %v1588_v52, %v1592_v16  ;;  %v1627_v42 = vld [vmem:[#allocation10 + $0x1f80] sm:$0xff]  ;;  %v1628_v60 = vld [vmem:[#allocation10 + $0x1f88] sm:$0xff] }
 0x3fa   :  { %7426 = vmatprep.subr.bf16.mxu0 %v9763_v57  ;;  %v9809_v57 = vcombine.high %v1587_v50, %v1591_v51  ;;  %v1631_v44 = vld [vmem:[#allocation10 + $0x1fa0] sm:$0xff] }
 0x3fc   :  { %7099 = vmatpush1.bf16.msra.mxu1 %v9760_v61  ;;  %v1600_v61 = vld [vmem:[#allocation10 + $0x1ea8] sm:$0xff] }
 0x3fd   :  { %7427 = vmatpush1.bf16.msra.mxu0 %v9762_v62  ;;  %7100 = vmatprep.subr.bf16.mxu1 %v9769_v63  ;;  %v9808_v62 = vcombine.low %v1587_v50, %v1591_v51  ;;  %v9810_v63 = vcombine.low %v1588_v52, %v1592_v16  ;;  %v9819_v2 = vcombine.high %v1596_v18, %v1600_v61  ;;  %v1635_v51 = vld [vmem:[#allocation10 + $0x1fc0] sm:$0xff]  ;;  %v1636_v16 = vld [vmem:[#allocation10 + $0x1fc8] sm:$0xff] }
 0x3fe   :  { %7428 = vmatprep.subr.bf16.mxu0 %v9771_v1  ;;  %v9817_v1 = vcombine.high %v1595_v12, %v1599_v59  ;;  %v1639_v52 = vld [vmem:[#allocation10 + $0x1fe0] sm:$0xff] }
 0x400   :  { %7101 = vmatpush1.bf16.msra.mxu1 %v9768_v8  ;;  %v1608_v8 = vld [vmem:[#allocation10 + $0x1ee8] sm:$0xff] }
 0x401   :  { %7429 = vmatpush1.bf16.msra.mxu0 %v9770_v9  ;;  %7102 = vmatprep.subr.bf16.mxu1 %v9777_v15  ;;  %v9816_v9 = vcombine.low %v1595_v12, %v1599_v59  ;;  %v9818_v15 = vcombine.low %v1596_v18, %v1600_v61  ;;  %v9827_v19 = vcombine.high %v1604_v7, %v1608_v8  ;;  %v621_v59 = vld [vmem:[#allocation10 + $0x10] sm:$0xff]  ;;  %v622_v61 = vld [vmem:[#allocation10 + $0x18] sm:$0xff] }
 0x402   :  { %7430 = vmatprep.subr.bf16.mxu0 %v9779_v17  ;;  %v9825_v17 = vcombine.high %v1603_v3, %v1607_v5  ;;  %v625_v18 = vld [vmem:[#allocation10 + $0x30] sm:$0xff] }
 0x404   :  { %7103 = vmatpush1.bf16.msra.mxu1 %v9776_v23  ;;  %v1616_v23 = vld [vmem:[#allocation10 + $0x1f28] sm:$0xff] }
 0x405   :  { %7431 = vmatpush1.bf16.msra.mxu0 %v9778_v25  ;;  %7104 = vmatprep.subr.bf16.mxu1 %v9785_v27  ;;  %v9824_v25 = vcombine.low %v1603_v3, %v1607_v5  ;;  %v9826_v27 = vcombine.low %v1604_v7, %v1608_v8  ;;  %v9835_v29 = vcombine.high %v1612_v26, %v1616_v23  ;;  %v629_v5 = vld [vmem:[#allocation10 + $0x50] sm:$0xff] }
 0x406   :  { %7432 = vmatprep.subr.bf16.mxu0 %v9787_v28  ;;  %v9833_v28 = vcombine.high %v1611_v31, %v1615_v20  ;;  %v633_v7 = vld [vmem:[#allocation10 + $0x70] sm:$0xff]  ;;  %v8844_v8 = vcombine.low %v621_v59, %v625_v18 }
 0x408   :  { %7105 = vmatpush1.bf16.msra.mxu1 %v9784_v33  ;;  %v1624_v33 = vld [vmem:[#allocation10 + $0x1f68] sm:$0xff] }
 0x409   :  { %7433 = vmatpush1.bf16.msra.mxu0 %v9786_v36  ;;  %7106 = vmatprep.subr.bf16.mxu1 %v9793_v38  ;;  %v9832_v36 = vcombine.low %v1611_v31, %v1615_v20  ;;  %v9834_v38 = vcombine.low %v1612_v26, %v1616_v23  ;;  %v9843_v41 = vcombine.high %v1620_v30, %v1624_v33  ;;  %v637_v20 = vld [vmem:[#allocation10 + $0x90] sm:$0xff] }
 0x40a   :  { %7434 = vmatprep.subr.bf16.mxu0 %v9795_v39  ;;  %v9841_v39 = vcombine.high %v1619_v32, %v1623_v34  ;;  %v8853_v31 = vcombine.high %v629_v5, %v633_v7  ;;  %v641_v26 = vld [vmem:[#allocation10 + $0xb0] sm:$0xff] }
 0x40c   :  { %7107 = vmatpush1.bf16.msra.mxu1 %v9792_v35  ;;  %v1632_v35 = vld [vmem:[#allocation10 + $0x1fa8] sm:$0xff] }
 0x40d   :  { %7435 = vmatpush1.bf16.msra.mxu0 %v9794_v46  ;;  %7108 = vmatprep.subr.bf16.mxu1 %v9801_v58  ;;  %v9840_v46 = vcombine.low %v1619_v32, %v1623_v34  ;;  %v9842_v58 = vcombine.low %v1620_v30, %v1624_v33  ;;  %v9851_v50 = vcombine.high %v1628_v60, %v1632_v35  ;;  %v645_v34 = vld [vmem:[#allocation10 + $0xd0] sm:$0xff]  ;;  %v646_v33 = vld [vmem:[#allocation10 + $0xd8] sm:$0xff] }
 0x40e   :  { %7436 = vmatprep.subr.bf16.mxu0 %v9803_v49  ;;  %v9849_v49 = vcombine.high %v1627_v42, %v1631_v44  ;;  %v649_v30 = vld [vmem:[#allocation10 + $0xf0] sm:$0xff] }
 0x410   :  { %7109 = vmatpush1.bf16.msra.mxu1 %v9800_v54  ;;  %v1640_v54 = vld [vmem:[#allocation10 + $0x1fe8] sm:$0xff] }
 0x411   :  { %7437 = vmatpush1.bf16.msra.mxu0 %v9802_v55  ;;  %7110 = vmatprep.subr.bf16.mxu1 %v9809_v57  ;;  %v9848_v55 = vcombine.low %v1627_v42, %v1631_v44  ;;  %v9850_v57 = vcombine.low %v1628_v60, %v1632_v35  ;;  %v9859_v12 = vcombine.high %v1636_v16, %v1640_v54  ;;  %v653_v44 = vld [vmem:[#allocation10 + $0x110] sm:$0xff]  ;;  %v654_v35 = vld [vmem:[#allocation10 + $0x118] sm:$0xff] }
 0x412   :  { %7438 = vmatprep.subr.bf16.mxu0 %v9811_v56  ;;  %v9857_v56 = vcombine.high %v1635_v51, %v1639_v52  ;;  %v657_v60 = vld [vmem:[#allocation10 + $0x130] sm:$0xff] }
 0x414   :  { %7111 = vmatpush1.bf16.msra.mxu1 %v9808_v62  ;;  %v626_v62 = vld [vmem:[#allocation10 + $0x38] sm:$0xff] }
 0x415   :  { %7439 = vmatpush1.bf16.msra.mxu0 %v9810_v63  ;;  %7112 = vmatprep.subr.bf16.mxu1 %v9817_v1  ;;  %v9856_v63 = vcombine.low %v1635_v51, %v1639_v52  ;;  %v9858_v1 = vcombine.low %v1636_v16, %v1640_v54  ;;  %v8847_v3 = vcombine.high %v622_v61, %v626_v62  ;;  %v661_v51 = vld [vmem:[#allocation10 + $0x150] sm:$0xff]  ;;  %v662_v16 = vld [vmem:[#allocation10 + $0x158] sm:$0xff] }
 0x416   :  { %7440 = vmatprep.subr.bf16.mxu0 %v9819_v2  ;;  %v8845_v2 = vcombine.high %v621_v59, %v625_v18  ;;  %v665_v52 = vld [vmem:[#allocation10 + $0x170] sm:$0xff]  ;;  %v666_v54 = vld [vmem:[#allocation10 + $0x178] sm:$0xff] }
 0x417   :  { %v669_v59 = vld [vmem:[#allocation10 + $0x190] sm:$0xff] }
 0x418   :  { %7113 = vmatpush1.bf16.msra.mxu1 %v9816_v9  ;;  %v630_v9 = vld [vmem:[#allocation10 + $0x58] sm:$0xff]  ;;  %v673_v18 = vld [vmem:[#allocation10 + $0x1b0] sm:$0xff] }
 0x419   :  { %7441 = vmatpush1.bf16.msra.mxu0 %v9818_v15  ;;  %7114 = vmatprep.subr.bf16.mxu1 %v9825_v17  ;;  %v634_v15 = vld [vmem:[#allocation10 + $0x78] sm:$0xff]  ;;  %v10979_v17 = vpack.c.bf16 %v10963_v0, %v10963_v0 }
 0x41a   :  { %7442 = vmatprep.subr.bf16.mxu0 %v9827_v19  ;;  %v8846_v19 = vcombine.low %v622_v61, %v626_v62  ;;  %v8855_v23 = vcombine.high %v630_v9, %v634_v15  ;;  %v8854_v0 = vcombine.low %v630_v9, %v634_v15  ;;  %v670_v61 = vld [vmem:[#allocation10 + $0x198] sm:$0xff]  ;;  %v8892_v15 = vcombine.low %v669_v59, %v673_v18 }
 0x41b   :  { %v674_v62 = vld [vmem:[#allocation10 + $0x1b8] sm:$0xff] }
 0x41c   :  { %7115 = vmatpush1.bf16.msra.mxu1 %v9824_v25  ;;  %v638_v25 = vld [vmem:[#allocation10 + $0x98] sm:$0xff] }
 0x41d   :  { %7443 = vmatpush1.bf16.msra.mxu0 %v9826_v27  ;;  %7116 = vmatprep.subr.bf16.mxu1 %v9833_v28  ;;  %v642_v27 = vld [vmem:[#allocation10 + $0xb8] sm:$0xff]  ;;  %v8852_v28 = vcombine.low %v629_v5, %v633_v7  ;;  %v677_v5 = vld [vmem:[#allocation10 + $0x1d0] sm:$0xff] }
 0x41e   :  { %7444 = vmatprep.subr.bf16.mxu0 %v9835_v29  ;;  %v8861_v29 = vcombine.high %v637_v20, %v641_v26  ;;  %v8863_v32 = vcombine.high %v638_v25, %v642_v27  ;;  %v681_v7 = vld [vmem:[#allocation10 + $0x1f0] sm:$0xff]  ;;  %v682_v9 = vld [vmem:[#allocation10 + $0x1f8] sm:$0xff] }
 0x420   :  { %7117 = vmatpush1.bf16.msra.mxu1 %v9832_v36  ;;  %v650_v36 = vld [vmem:[#allocation10 + $0xf8] sm:$0xff] }
 0x421   :  { %7445 = vmatpush1.bf16.msra.mxu0 %v9834_v38  ;;  %7118 = vmatprep.subr.bf16.mxu1 %v9841_v39  ;;  %v8860_v38 = vcombine.low %v637_v20, %v641_v26  ;;  %v8862_v39 = vcombine.low %v638_v25, %v642_v27  ;;  %v8871_v42 = vcombine.high %v646_v33, %v650_v36  ;;  %v685_v26 = vld [vmem:[#allocation10 + $0x210] sm:$0xff]  ;;  %v686_v25 = vld [vmem:[#allocation10 + $0x218] sm:$0xff] }
 0x422   :  { %7446 = vmatprep.subr.bf16.mxu0 %v9843_v41  ;;  %v8869_v41 = vcombine.high %v645_v34, %v649_v30  ;;  %v690_v27 = vld [vmem:[#allocation10 + $0x238] sm:$0xff] }
 0x424   :  { %7119 = vmatpush1.bf16.msra.mxu1 %v9840_v46  ;;  %v658_v46 = vld [vmem:[#allocation10 + $0x138] sm:$0xff] }
 0x425   :  { %7447 = vmatpush1.bf16.msra.mxu0 %v9842_v58  ;;  %7120 = vmatprep.subr.bf16.mxu1 %v9849_v49  ;;  %v8870_v58 = vcombine.low %v646_v33, %v650_v36  ;;  %v8877_v49 = vcombine.high %v653_v44, %v657_v60  ;;  %v694_v33 = vld [vmem:[#allocation10 + $0x258] sm:$0xff] }
 0x426   :  { %7448 = vmatprep.subr.bf16.mxu0 %v9851_v50  ;;  %v8879_v50 = vcombine.high %v654_v35, %v658_v46  ;;  %v698_v36 = vld [vmem:[#allocation10 + $0x278] sm:$0xff] }
 0x428   :  { %7121 = vmatpush1.bf16.msra.mxu1 %v9848_v55  ;;  %v8876_v55 = vcombine.low %v653_v44, %v657_v60  ;;  %v701_v44 = vld [vmem:[#allocation10 + $0x290] sm:$0xff] }
 0x429   :  { %7449 = vmatpush1.bf16.msra.mxu0 %v9850_v57  ;;  %7122 = vmatprep.subr.bf16.mxu1 %v9857_v56  ;;  %v8878_v57 = vcombine.low %v654_v35, %v658_v46  ;;  %v8885_v56 = vcombine.high %v661_v51, %v665_v52  ;;  %v705_v60 = vld [vmem:[#allocation10 + $0x2b0] sm:$0xff]  ;;  %v702_v35 = vld [vmem:[#allocation10 + $0x298] sm:$0xff] }
 0x42a   :  { %7450 = vmatprep.subr.bf16.mxu0 %v9859_v12  ;;  %v8887_v12 = vcombine.high %v662_v16, %v666_v54  ;;  %v706_v46 = vld [vmem:[#allocation10 + $0x2b8] sm:$0xff] }
 0x42c   :  { %7123 = vmatpush1.bf16.msra.mxu1 %v9856_v63  ;;  %v8884_v63 = vcombine.low %v661_v51, %v665_v52  ;;  %v709_v51 = vld [vmem:[#allocation10 + $0x2d0] sm:$0xff] }
 0x42d   :  { %7451 = vmatpush1.bf16.msra.mxu0 %v9858_v1  ;;  %7461 = vmatprep.subr.bf16.mxu1 %v8845_v2  ;;  %v8886_v1 = vcombine.low %v662_v16, %v666_v54  ;;  %v8893_v2 = vcombine.high %v669_v59, %v673_v18  ;;  %v713_v52 = vld [vmem:[#allocation10 + $0x2f0] sm:$0xff]  ;;  %v710_v16 = vld [vmem:[#allocation10 + $0x2d8] sm:$0xff] }
 0x42e   :  { %7789 = vmatprep.subr.bf16.mxu0 %v8847_v3  ;;  %v8895_v3 = vcombine.high %v670_v61, %v674_v62  ;;  %v714_v54 = vld [vmem:[#allocation10 + $0x2f8] sm:$0xff]  ;;  %v717_v59 = vld [vmem:[#allocation10 + $0x310] sm:$0xff] }
 0x42f   :  { %7125 = vmatmul.mubr.bf16.vlgmr.msra.gmra.mrb[8].mxu1 %v10979_v17  ;;  %v721_v18 = vld [vmem:[#allocation10 + $0x330] sm:$0xff] }
 0x430   :  { %7453 = vmatmul.mubr.bf16.vlgmr.msra.gmra.mrb[12].mxu0 %v10979_v17  ;;  %7462 = vmatpush1.bf16.msra.mxu1 %v8844_v8  ;;  %v678_v8 = vld [vmem:[#allocation10 + $0x1d8] sm:$0xff] }
 0x431   :  { %7493 = vmatprep.mubr.bf16.mxu1 %v10856_v21  ;;  %7790 = vmatpush1.bf16.msra.mxu0 %v8846_v19  ;;  %v8894_v19 = vcombine.low %v670_v61, %v674_v62  ;;  %v8903_v20 = vcombine.high %v678_v8, %v682_v9  ;;  %v718_v61 = vld [vmem:[#allocation10 + $0x318] sm:$0xff] }
 0x432   :  { %7821 = vmatprep.mubr.bf16.mxu0 %v10856_v21  ;;  %7463 = vmatprep.subr.bf16.mxu1 %v8853_v31  ;;  %v8868_v21 = vcombine.low %v645_v34, %v649_v30  ;;  %v8901_v31 = vcombine.high %v677_v5, %v681_v7  ;;  %v693_v34 = vld [vmem:[#allocation10 + $0x250] sm:$0xff]  ;;  %v722_v62 = vld [vmem:[#allocation10 + $0x338] sm:$0xff] }
 0x433   :  { %7791 = vmatprep.subr.bf16.mxu0 %v8855_v23  ;;  %v689_v23 = vld [vmem:[#allocation10 + $0x230] sm:$0xff] }
 0x434   :  { %7464 = vmatpush1.bf16.msra.mxu1 %v8852_v28  ;;  %v8900_v28 = vcombine.low %v677_v5, %v681_v7  ;;  %v697_v30 = vld [vmem:[#allocation10 + $0x270] sm:$0xff] }
 0x435   :  { %7792 = vmatpush1.bf16.msra.mxu0 %v8854_v0  ;;  %7465 = vmatprep.subr.bf16.mxu1 %v8861_v29  ;;  %v8902_v0 = vcombine.low %v678_v8, %v682_v9  ;;  %v8909_v29 = vcombine.high %v685_v26, %v689_v23  ;;  %v725_v5 = vld [vmem:[#allocation10 + $0x350] sm:$0xff]  ;;  %v726_v8 = vld [vmem:[#allocation10 + $0x358] sm:$0xff] }
 0x436   :  { %7793 = vmatprep.subr.bf16.mxu0 %v8863_v32  ;;  %v8911_v32 = vcombine.high %v686_v25, %v690_v27  ;;  %v729_v7 = vld [vmem:[#allocation10 + $0x370] sm:$0xff]  ;;  %v730_v9 = vld [vmem:[#allocation10 + $0x378] sm:$0xff] }
 0x438   :  { %7466 = vmatpush1.bf16.msra.mxu1 %v8860_v38  ;;  %v8908_v38 = vcombine.low %v685_v26, %v689_v23  ;;  %v733_v26 = vld [vmem:[#allocation10 + $0x390] sm:$0xff] }
 0x439   :  { %7794 = vmatpush1.bf16.msra.mxu0 %v8862_v39  ;;  %7467 = vmatprep.subr.bf16.mxu1 %v8869_v41  ;;  %v8910_v39 = vcombine.low %v686_v25, %v690_v27  ;;  %v8917_v41 = vcombine.high %v693_v34, %v697_v30  ;;  %v737_v23 = vld [vmem:[#allocation10 + $0x3b0] sm:$0xff]  ;;  %v734_v25 = vld [vmem:[#allocation10 + $0x398] sm:$0xff] }
 0x43a   :  { %7795 = vmatprep.subr.bf16.mxu0 %v8871_v42  ;;  %v8919_v42 = vcombine.high %v694_v33, %v698_v36  ;;  %v738_v27 = vld [vmem:[#allocation10 + $0x3b8] sm:$0xff] }
 0x43c   :  { %7468 = vmatpush1.bf16.msra.mxu1 %v8868_v21  ;;  %v8916_v21 = vcombine.low %v693_v34, %v697_v30  ;;  %v741_v34 = vld [vmem:[#allocation10 + $0x3d0] sm:$0xff] }
 0x43d   :  { %7796 = vmatpush1.bf16.msra.mxu0 %v8870_v58  ;;  %7469 = vmatprep.subr.bf16.mxu1 %v8877_v49  ;;  %v8918_v58 = vcombine.low %v694_v33, %v698_v36  ;;  %v8925_v49 = vcombine.high %v701_v44, %v705_v60  ;;  %v745_v30 = vld [vmem:[#allocation10 + $0x3f0] sm:$0xff]  ;;  %v742_v33 = vld [vmem:[#allocation10 + $0x3d8] sm:$0xff] }
 0x43e   :  { %7797 = vmatprep.subr.bf16.mxu0 %v8879_v50  ;;  %v8927_v50 = vcombine.high %v702_v35, %v706_v46  ;;  %v746_v36 = vld [vmem:[#allocation10 + $0x3f8] sm:$0xff] }
 0x440   :  { %7470 = vmatpush1.bf16.msra.mxu1 %v8876_v55  ;;  %v8924_v55 = vcombine.low %v701_v44, %v705_v60  ;;  %v749_v44 = vld [vmem:[#allocation10 + $0x410] sm:$0xff] }
 0x441   :  { %7798 = vmatpush1.bf16.msra.mxu0 %v8878_v57  ;;  %7471 = vmatprep.subr.bf16.mxu1 %v8885_v56  ;;  %v8926_v57 = vcombine.low %v702_v35, %v706_v46  ;;  %v8933_v56 = vcombine.high %v709_v51, %v713_v52  ;;  %v753_v60 = vld [vmem:[#allocation10 + $0x430] sm:$0xff]  ;;  %v750_v35 = vld [vmem:[#allocation10 + $0x418] sm:$0xff] }
 0x442   :  { %7799 = vmatprep.subr.bf16.mxu0 %v8887_v12  ;;  %v8935_v12 = vcombine.high %v710_v16, %v714_v54  ;;  %v754_v46 = vld [vmem:[#allocation10 + $0x438] sm:$0xff] }
 0x444   :  { %7472 = vmatpush1.bf16.msra.mxu1 %v8884_v63  ;;  %v8932_v63 = vcombine.low %v709_v51, %v713_v52  ;;  %v757_v51 = vld [vmem:[#allocation10 + $0x450] sm:$0xff] }
 0x445   :  { %7800 = vmatpush1.bf16.msra.mxu0 %v8886_v1  ;;  %7473 = vmatprep.subr.bf16.mxu1 %v8893_v2  ;;  %v8934_v1 = vcombine.low %v710_v16, %v714_v54  ;;  %v8941_v2 = vcombine.high %v717_v59, %v721_v18  ;;  %v761_v52 = vld [vmem:[#allocation10 + $0x470] sm:$0xff]  ;;  %v8972_v16 = vcombine.low %v749_v44, %v753_v60  ;;  %v758_v54 = vld [vmem:[#allocation10 + $0x458] sm:$0xff] }
 0x446   :  { %7801 = vmatprep.subr.bf16.mxu0 %v8895_v3  ;;  %v8943_v3 = vcombine.high %v718_v61, %v722_v62 }
 0x448   :  { %7474 = vmatpush1.bf16.msra.mxu1 %v8892_v15  ;;  %v8940_v15 = vcombine.low %v717_v59, %v721_v18  ;;  %v769_v59 = vld [vmem:[#allocation10 + $0x4b0] sm:$0xff] }
 0x449   :  { %7802 = vmatpush1.bf16.msra.mxu0 %v8894_v19  ;;  %7475 = vmatprep.subr.bf16.mxu1 %v8901_v31  ;;  %v8942_v19 = vcombine.low %v718_v61, %v722_v62  ;;  %v8949_v31 = vcombine.high %v725_v5, %v729_v7  ;;  %v766_v61 = vld [vmem:[#allocation10 + $0x498] sm:$0xff] }
 0x44a   :  { %7803 = vmatprep.subr.bf16.mxu0 %v8903_v20  ;;  %v8951_v20 = vcombine.high %v726_v8, %v730_v9  ;;  %v770_v62 = vld [vmem:[#allocation10 + $0x4b8] sm:$0xff] }
 0x44c   :  { %7476 = vmatpush1.bf16.msra.mxu1 %v8900_v28  ;;  %v8948_v28 = vcombine.low %v725_v5, %v729_v7  ;;  %v773_v5 = vld [vmem:[#allocation10 + $0x4d0] sm:$0xff] }
 0x44d   :  { %7804 = vmatpush1.bf16.msra.mxu0 %v8902_v0  ;;  %7477 = vmatprep.subr.bf16.mxu1 %v8909_v29  ;;  %v8950_v0 = vcombine.low %v726_v8, %v730_v9  ;;  %v8957_v29 = vcombine.high %v733_v26, %v737_v23  ;;  %v777_v7 = vld [vmem:[#allocation10 + $0x4f0] sm:$0xff]  ;;  %v774_v8 = vld [vmem:[#allocation10 + $0x4d8] sm:$0xff] }
 0x44e   :  { %7805 = vmatprep.subr.bf16.mxu0 %v8911_v32  ;;  %v8959_v32 = vcombine.high %v734_v25, %v738_v27  ;;  %v778_v9 = vld [vmem:[#allocation10 + $0x4f8] sm:$0xff] }
 0x450   :  { %7478 = vmatpush1.bf16.msra.mxu1 %v8908_v38  ;;  %v8956_v38 = vcombine.low %v733_v26, %v737_v23  ;;  %v785_v26 = vld [vmem:[#allocation10 + $0x530] sm:$0xff]  ;;  %v782_v23 = vld [vmem:[#allocation10 + $0x518] sm:$0xff] }
 0x451   :  { %7806 = vmatpush1.bf16.msra.mxu0 %v8910_v39  ;;  %7479 = vmatprep.subr.bf16.mxu1 %v8917_v41  ;;  %v8958_v39 = vcombine.low %v734_v25, %v738_v27  ;;  %v8965_v41 = vcombine.high %v741_v34, %v745_v30  ;;  %v786_v25 = vld [vmem:[#allocation10 + $0x538] sm:$0xff]  ;;  %v8998_v27 = vcombine.low %v774_v8, %v778_v9 }
 0x452   :  { %7807 = vmatprep.subr.bf16.mxu0 %v8919_v42  ;;  %v8967_v42 = vcombine.high %v742_v33, %v746_v36 }
 0x454   :  { %7480 = vmatpush1.bf16.msra.mxu1 %v8916_v21  ;;  %v8964_v21 = vcombine.low %v741_v34, %v745_v30  ;;  %v790_v34 = vld [vmem:[#allocation10 + $0x558] sm:$0xff] }
 0x455   :  { %7808 = vmatpush1.bf16.msra.mxu0 %v8918_v58  ;;  %7481 = vmatprep.subr.bf16.mxu1 %v8925_v49  ;;  %v8966_v58 = vcombine.low %v742_v33, %v746_v36  ;;  %v8973_v49 = vcombine.high %v749_v44, %v753_v60  ;;  %v794_v30 = vld [vmem:[#allocation10 + $0x578] sm:$0xff]  ;;  %v9006_v36 = vcombine.low %v782_v23, %v786_v25 }
 0x456   :  { %7809 = vmatprep.subr.bf16.mxu0 %v8927_v50  ;;  %v8975_v50 = vcombine.high %v750_v35, %v754_v46  ;;  %v798_v44 = vld [vmem:[#allocation10 + $0x598] sm:$0xff] }
 0x457   :  { %v802_v60 = vld [vmem:[#allocation10 + $0x5b8] sm:$0xff] }
 0x458   :  { %7482 = vmatpush1.bf16.msra.mxu1 %v8924_v55  ;;  %v762_v55 = vld [vmem:[#allocation10 + $0x478] sm:$0xff] }
 0x459   :  { %7810 = vmatpush1.bf16.msra.mxu0 %v8926_v57  ;;  %7483 = vmatprep.subr.bf16.mxu1 %v8933_v56  ;;  %v8974_v57 = vcombine.low %v750_v35, %v754_v46  ;;  %v8981_v56 = vcombine.high %v757_v51, %v761_v52  ;;  %v8983_v18 = vcombine.high %v758_v54, %v762_v55 }
 0x45a   :  { %7811 = vmatprep.subr.bf16.mxu0 %v8935_v12  ;;  %v765_v12 = vld [vmem:[#allocation10 + $0x490] sm:$0xff]  ;;  %v9014_v46 = vcombine.low %v790_v34, %v794_v30 }
 0x45c   :  { %7484 = vmatpush1.bf16.msra.mxu1 %v8932_v63  ;;  %v8980_v63 = vcombine.low %v757_v51, %v761_v52  ;;  %v806_v51 = vld [vmem:[#allocation10 + $0x5d8] sm:$0xff] }
 0x45d   :  { %7812 = vmatpush1.bf16.msra.mxu0 %v8934_v1  ;;  %7485 = vmatprep.subr.bf16.mxu1 %v8941_v2  ;;  %v8982_v1 = vcombine.low %v758_v54, %v762_v55  ;;  %v8989_v2 = vcombine.high %v765_v12, %v769_v59  ;;  %v810_v52 = vld [vmem:[#allocation10 + $0x5f8] sm:$0xff]  ;;  %v9022_v54 = vcombine.low %v798_v44, %v802_v60 }
 0x45e   :  { %7813 = vmatprep.subr.bf16.mxu0 %v8943_v3  ;;  %v8991_v3 = vcombine.high %v766_v61, %v770_v62 }
 0x460   :  { %7486 = vmatpush1.bf16.msra.mxu1 %v8940_v15  ;;  %v8988_v15 = vcombine.low %v765_v12, %v769_v59  ;;  %v817_v12 = vld [vmem:[#allocation10 + $0x630] sm:$0xff]  ;;  %v814_v59 = vld [vmem:[#allocation10 + $0x618] sm:$0xff] }
 0x461   :  { %7814 = vmatpush1.bf16.msra.mxu0 %v8942_v19  ;;  %7487 = vmatprep.subr.bf16.mxu1 %v8949_v31  ;;  %v8997_v19 = vcombine.high %v773_v5, %v777_v7  ;;  %v8999_v31 = vcombine.high %v774_v8, %v778_v9 }
 0x462   :  { %7815 = vmatprep.subr.bf16.mxu0 %v8951_v20  ;;  %v781_v20 = vld [vmem:[#allocation10 + $0x510] sm:$0xff] }
 0x463   :  { %v9004_v33 = vcombine.low %v781_v20, %v785_v26 }
 0x464   :  { %7488 = vmatpush1.bf16.msra.mxu1 %v8948_v28  ;;  %v9005_v28 = vcombine.high %v781_v20, %v785_v26  ;;  %v830_v20 = vld [vmem:[#allocation10 + $0x698] sm:$0xff] }
 0x465   :  { %7816 = vmatpush1.bf16.msra.mxu0 %v8950_v0  ;;  %7489 = vmatprep.subr.bf16.mxu1 %v8957_v29  ;;  %v9007_v0 = vcombine.high %v782_v23, %v786_v25  ;;  %v789_v29 = vld [vmem:[#allocation10 + $0x550] sm:$0xff]  ;;  %v834_v26 = vld [vmem:[#allocation10 + $0x6b8] sm:$0xff] }
 0x466   :  { %7817 = vmatprep.subr.bf16.mxu0 %v8959_v32  ;;  %v793_v32 = vld [vmem:[#allocation10 + $0x570] sm:$0xff] }
 0x467   :  { %v9012_v35 = vcombine.low %v789_v29, %v793_v32 }
 0x468   :  { %7490 = vmatpush1.bf16.msra.mxu1 %v8956_v38  ;;  %v9013_v38 = vcombine.high %v789_v29, %v793_v32  ;;  %v838_v29 = vld [vmem:[#allocation10 + $0x6d8] sm:$0xff] }
 0x469   :  { %7818 = vmatpush1.bf16.msra.mxu0 %v8958_v39  ;;  %7491 = vmatprep.subr.bf16.mxu1 %v8965_v41  ;;  %v9015_v39 = vcombine.high %v790_v34, %v794_v30  ;;  %v797_v41 = vld [vmem:[#allocation10 + $0x590] sm:$0xff]  ;;  %v842_v32 = vld [vmem:[#allocation10 + $0x6f8] sm:$0xff]  ;;  %v9054_v30 = vcombine.low %v830_v20, %v834_v26 }
 0x46a   :  { %7819 = vmatprep.subr.bf16.mxu0 %v8967_v42  ;;  %v801_v42 = vld [vmem:[#allocation10 + $0x5b0] sm:$0xff] }
 0x46c   :  { %7492 = vmatpush1.bf16.msra.mxu1 %v8964_v21  ;;  %v9021_v21 = vcombine.high %v797_v41, %v801_v42 }
 0x46d   :  { %7820 = vmatpush1.bf16.msra.mxu0 %v8966_v58  ;;  %7502 = vmatprep.subr.bf16.mxu1 %v8973_v49  ;;  %v9023_v58 = vcombine.high %v798_v44, %v802_v60  ;;  %v805_v49 = vld [vmem:[#allocation10 + $0x5d0] sm:$0xff]  ;;  %v9062_v60 = vcombine.low %v838_v29, %v842_v32 }
 0x46e   :  { %7830 = vmatprep.subr.bf16.mxu0 %v8975_v50  ;;  %v809_v50 = vld [vmem:[#allocation10 + $0x5f0] sm:$0xff] }
 0x46f   :  { %7494 = vmatmul.mubr.bf16.vlgmr.msra.gmra.mrb[12].mxu1 %v10860_v22  ;;  %v9029_v55 = vcombine.high %v805_v49, %v809_v50 }
 0x470   :  { %7822 = vmatmul.mubr.bf16.vlgmr.msra.gmra.mrb[16].mxu0 %v10860_v22  ;;  %7503 = vmatpush1.bf16.msra.mxu1 %v8972_v16  ;;  %v8990_v22 = vcombine.low %v766_v61, %v770_v62  ;;  %v9020_v16 = vcombine.low %v797_v41, %v801_v42  ;;  %v9028_v61 = vcombine.low %v805_v49, %v809_v50  ;;  %v846_v41 = vld [vmem:[#allocation10 + $0x718] sm:$0xff] }
 0x471   :  { %7534 = vmatprep.mubr.bf16.mxu1 %v10864_v24  ;;  %7831 = vmatpush1.bf16.msra.mxu0 %v8974_v57  ;;  %v9031_v57 = vcombine.high %v806_v51, %v810_v52  ;;  %v9030_v62 = vcombine.low %v806_v51, %v810_v52  ;;  %v850_v42 = vld [vmem:[#allocation10 + $0x738] sm:$0xff] }
 0x472   :  { %7862 = vmatprep.mubr.bf16.mxu0 %v10864_v24  ;;  %7504 = vmatprep.subr.bf16.mxu1 %v8981_v56  ;;  %v8996_v24 = vcombine.low %v773_v5, %v777_v7  ;;  %v813_v56 = vld [vmem:[#allocation10 + $0x610] sm:$0xff]  ;;  %v822_v5 = vld [vmem:[#allocation10 + $0x658] sm:$0xff]  ;;  %v9070_v52 = vcombine.low %v846_v41, %v850_v42 }
 0x473   :  { %7832 = vmatprep.subr.bf16.mxu0 %v8983_v18  ;;  %v818_v18 = vld [vmem:[#allocation10 + $0x638] sm:$0xff]  ;;  %v9036_v8 = vcombine.low %v813_v56, %v817_v12 }
 0x474   :  { %7505 = vmatpush1.bf16.msra.mxu1 %v8980_v63  ;;  %v9037_v63 = vcombine.high %v813_v56, %v817_v12  ;;  %v826_v7 = vld [vmem:[#allocation10 + $0x678] sm:$0xff]  ;;  %v9038_v9 = vcombine.low %v814_v59, %v818_v18 }
 0x475   :  { %7833 = vmatpush1.bf16.msra.mxu0 %v8982_v1  ;;  %7506 = vmatprep.subr.bf16.mxu1 %v8989_v2  ;;  %v9039_v1 = vcombine.high %v814_v59, %v818_v18  ;;  %v821_v2 = vld [vmem:[#allocation10 + $0x650] sm:$0xff]  ;;  %v9046_v25 = vcombine.low %v822_v5, %v826_v7  ;;  %v854_v49 = vld [vmem:[#allocation10 + $0x758] sm:$0xff] }
 0x476   :  { %7834 = vmatprep.subr.bf16.mxu0 %v8991_v3  ;;  %v825_v3 = vld [vmem:[#allocation10 + $0x670] sm:$0xff]  ;;  %v858_v50 = vld [vmem:[#allocation10 + $0x778] sm:$0xff] }
 0x477   :  { %v9044_v23 = vcombine.low %v821_v2, %v825_v3  ;;  %v862_v56 = vld [vmem:[#allocation10 + $0x798] sm:$0xff]  ;;  %v9078_v18 = vcombine.low %v854_v49, %v858_v50 }
 0x478   :  { %7507 = vmatpush1.bf16.msra.mxu1 %v8988_v15  ;;  %v9045_v15 = vcombine.high %v821_v2, %v825_v3  ;;  %v866_v12 = vld [vmem:[#allocation10 + $0x7b8] sm:$0xff] }
 0x479   :  { %7835 = vmatpush1.bf16.msra.mxu0 %v8990_v22  ;;  %7508 = vmatprep.subr.bf16.mxu1 %v8997_v19  ;;  %v9047_v22 = vcombine.high %v822_v5, %v826_v7  ;;  %v829_v19 = vld [vmem:[#allocation10 + $0x690] sm:$0xff]  ;;  %v870_v2 = vld [vmem:[#allocation10 + $0x7d8] sm:$0xff]  ;;  %v9086_v7 = vcombine.low %v862_v56, %v866_v12 }
 0x47a   :  { %7836 = vmatprep.subr.bf16.mxu0 %v8999_v31  ;;  %v833_v31 = vld [vmem:[#allocation10 + $0x6b0] sm:$0xff]  ;;  %v874_v3 = vld [vmem:[#allocation10 + $0x7f8] sm:$0xff] }
 0x47b   :  { %v9052_v34 = vcombine.low %v829_v19, %v833_v31 }
 0x47c   :  { %7509 = vmatpush1.bf16.msra.mxu1 %v8996_v24  ;;  %v9053_v24 = vcombine.high %v829_v19, %v833_v31  ;;  %v878_v19 = vld [vmem:[#allocation10 + $0x818] sm:$0xff] }
 0x47d   :  { %7837 = vmatpush1.bf16.msra.mxu0 %v8998_v27  ;;  %7510 = vmatprep.subr.bf16.mxu1 %v9005_v28  ;;  %v9055_v27 = vcombine.high %v830_v20, %v834_v26  ;;  %v837_v28 = vld [vmem:[#allocation10 + $0x6d0] sm:$0xff]  ;;  %v882_v31 = vld [vmem:[#allocation10 + $0x838] sm:$0xff]  ;;  %v9094_v26 = vcombine.low %v870_v2, %v874_v3 }
 0x47e   :  { %7838 = vmatprep.subr.bf16.mxu0 %v9007_v0  ;;  %v841_v0 = vld [vmem:[#allocation10 + $0x6f0] sm:$0xff] }
 0x47f   :  { %v9060_v44 = vcombine.low %v837_v28, %v841_v0 }
 0x480   :  { %7511 = vmatpush1.bf16.msra.mxu1 %v9004_v33  ;;  %v9061_v33 = vcombine.high %v837_v28, %v841_v0  ;;  %v886_v0 = vld [vmem:[#allocation10 + $0x858] sm:$0xff] }
 0x481   :  { %7839 = vmatpush1.bf16.msra.mxu0 %v9006_v36  ;;  %7512 = vmatprep.subr.bf16.mxu1 %v9013_v38  ;;  %v9063_v36 = vcombine.high %v838_v29, %v842_v32  ;;  %v845_v38 = vld [vmem:[#allocation10 + $0x710] sm:$0xff]  ;;  %v890_v29 = vld [vmem:[#allocation10 + $0x878] sm:$0xff]  ;;  %v9102_v32 = vcombine.low %v878_v19, %v882_v31 }
 0x482   :  { %7840 = vmatprep.subr.bf16.mxu0 %v9015_v39  ;;  %v849_v39 = vld [vmem:[#allocation10 + $0x730] sm:$0xff] }
 0x483   :  { %v9068_v51 = vcombine.low %v845_v38, %v849_v39 }
 0x484   :  { %7513 = vmatpush1.bf16.msra.mxu1 %v9012_v35  ;;  %v9069_v35 = vcombine.high %v845_v38, %v849_v39  ;;  %v894_v38 = vld [vmem:[#allocation10 + $0x898] sm:$0xff] }
 0x485   :  { %7841 = vmatpush1.bf16.msra.mxu0 %v9014_v46  ;;  %7514 = vmatprep.subr.bf16.mxu1 %v9021_v21  ;;  %v9071_v46 = vcombine.high %v846_v41, %v850_v42  ;;  %v853_v21 = vld [vmem:[#allocation10 + $0x750] sm:$0xff]  ;;  %v898_v39 = vld [vmem:[#allocation10 + $0x8b8] sm:$0xff]  ;;  %v9110_v42 = vcombine.low %v886_v0, %v890_v29 }
 0x486   :  { %7842 = vmatprep.subr.bf16.mxu0 %v9023_v58  ;;  %v857_v58 = vld [vmem:[#allocation10 + $0x770] sm:$0xff] }
 0x487   :  { %v9076_v59 = vcombine.low %v853_v21, %v857_v58 }
 0x488   :  { %7515 = vmatpush1.bf16.msra.mxu1 %v9020_v16  ;;  %v9077_v16 = vcombine.high %v853_v21, %v857_v58  ;;  %v902_v21 = vld [vmem:[#allocation10 + $0x8d8] sm:$0xff] }
 0x489   :  { %7843 = vmatpush1.bf16.msra.mxu0 %v9022_v54  ;;  %7516 = vmatprep.subr.bf16.mxu1 %v9029_v55  ;;  %v9079_v54 = vcombine.high %v854_v49, %v858_v50  ;;  %v861_v55 = vld [vmem:[#allocation10 + $0x790] sm:$0xff]  ;;  %v906_v58 = vld [vmem:[#allocation10 + $0x8f8] sm:$0xff] }
 0x48a   :  { %7844 = vmatprep.subr.bf16.mxu0 %v9031_v57  ;;  %v865_v57 = vld [vmem:[#allocation10 + $0x7b0] sm:$0xff] }
 0x48b   :  { %v9084_v5 = vcombine.low %v861_v55, %v865_v57 }
 0x48c   :  { %7517 = vmatpush1.bf16.msra.mxu1 %v9028_v61  ;;  %v9085_v61 = vcombine.high %v861_v55, %v865_v57  ;;  %v914_v55 = vld [vmem:[#allocation10 + $0x938] sm:$0xff]  ;;  %v9126_v57 = vcombine.low %v902_v21, %v906_v58 }
 0x48d   :  { %7845 = vmatpush1.bf16.msra.mxu0 %v9030_v62  ;;  %7518 = vmatprep.subr.bf16.mxu1 %v9037_v63  ;;  %v9087_v62 = vcombine.high %v862_v56, %v866_v12  ;;  %v869_v63 = vld [vmem:[#allocation10 + $0x7d0] sm:$0xff] }
 0x48e   :  { %7846 = vmatprep.subr.bf16.mxu0 %v9039_v1  ;;  %v873_v1 = vld [vmem:[#allocation10 + $0x7f0] sm:$0xff] }
 0x48f   :  { %v9092_v20 = vcombine.low %v869_v63, %v873_v1 }
 0x490   :  { %7519 = vmatpush1.bf16.msra.mxu1 %v9036_v8  ;;  %v9093_v8 = vcombine.high %v869_v63, %v873_v1 }
 0x491   :  { %7847 = vmatpush1.bf16.msra.mxu0 %v9038_v9  ;;  %7520 = vmatprep.subr.bf16.mxu1 %v9045_v15  ;;  %v9095_v9 = vcombine.high %v870_v2, %v874_v3  ;;  %v877_v15 = vld [vmem:[#allocation10 + $0x810] sm:$0xff] }
 0x492   :  { %7848 = vmatprep.subr.bf16.mxu0 %v9047_v22  ;;  %v881_v22 = vld [vmem:[#allocation10 + $0x830] sm:$0xff] }
 0x493   :  { %v9100_v28 = vcombine.low %v877_v15, %v881_v22 }
 0x494   :  { %7521 = vmatpush1.bf16.msra.mxu1 %v9044_v23  ;;  %v9101_v23 = vcombine.high %v877_v15, %v881_v22 }
 0x495   :  { %7849 = vmatpush1.bf16.msra.mxu0 %v9046_v25  ;;  %7522 = vmatprep.subr.bf16.mxu1 %v9053_v24  ;;  %v9103_v25 = vcombine.high %v878_v19, %v882_v31  ;;  %v885_v24 = vld [vmem:[#allocation10 + $0x850] sm:$0xff] }
 0x496   :  { %7850 = vmatprep.subr.bf16.mxu0 %v9055_v27  ;;  %v889_v27 = vld [vmem:[#allocation10 + $0x870] sm:$0xff] }
 0x497   :  { %v9108_v41 = vcombine.low %v885_v24, %v889_v27 }
 0x498   :  { %7523 = vmatpush1.bf16.msra.mxu1 %v9052_v34  ;;  %v9109_v34 = vcombine.high %v885_v24, %v889_v27 }
 0x499   :  { %7851 = vmatpush1.bf16.msra.mxu0 %v9054_v30  ;;  %7524 = vmatprep.subr.bf16.mxu1 %v9061_v33  ;;  %v893_v30 = vld [vmem:[#allocation10 + $0x890] sm:$0xff] }
 0x49a   :  { %7852 = vmatprep.subr.bf16.mxu0 %v9063_v36  ;;  %v897_v33 = vld [vmem:[#allocation10 + $0x8b0] sm:$0xff]  ;;  %v9111_v36 = vcombine.high %v886_v0, %v890_v29 }
 0x49b   :  { %v9116_v49 = vcombine.low %v893_v30, %v897_v33  ;;  %v941_v29 = vld [vmem:[#allocation10 + $0xa10] sm:$0xff] }
 0x49c   :  { %7525 = vmatpush1.bf16.msra.mxu1 %v9060_v44  ;;  %v9117_v44 = vcombine.high %v893_v30, %v897_v33  ;;  %v946_v30 = vld [vmem:[#allocation10 + $0xa38] sm:$0xff] }
 0x49d   :  { %7853 = vmatpush1.bf16.msra.mxu0 %v9062_v60  ;;  %7526 = vmatprep.subr.bf16.mxu1 %v9069_v35  ;;  %v9119_v60 = vcombine.high %v894_v38, %v898_v39  ;;  %v901_v35 = vld [vmem:[#allocation10 + $0x8d0] sm:$0xff] }
 0x49e   :  { %7854 = vmatprep.subr.bf16.mxu0 %v9071_v46  ;;  %v905_v46 = vld [vmem:[#allocation10 + $0x8f0] sm:$0xff] }
 0x49f   :  { %v9125_v50 = vcombine.high %v901_v35, %v905_v46 }
 0x4a0   :  { %7527 = vmatpush1.bf16.msra.mxu1 %v9068_v51  ;;  %v9127_v51 = vcombine.high %v902_v21, %v906_v58 }
 0x4a1   :  { %7855 = vmatpush1.bf16.msra.mxu0 %v9070_v52  ;;  %7528 = vmatprep.subr.bf16.mxu1 %v9077_v16  ;;  %v909_v52 = vld [vmem:[#allocation10 + $0x910] sm:$0xff] }
 0x4a2   :  { %7856 = vmatprep.subr.bf16.mxu0 %v9079_v54  ;;  %v913_v16 = vld [vmem:[#allocation10 + $0x930] sm:$0xff]  ;;  %v910_v54 = vld [vmem:[#allocation10 + $0x918] sm:$0xff] }
 0x4a3   :  { %v9133_v56 = vcombine.high %v909_v52, %v913_v16  ;;  %v9135_v12 = vcombine.high %v910_v54, %v914_v55  ;;  %v9132_v63 = vcombine.low %v909_v52, %v913_v16  ;;  %v9134_v1 = vcombine.low %v910_v54, %v914_v55 }
 0x4a4   :  { %7529 = vmatpush1.bf16.msra.mxu1 %v9076_v59  ;;  %v917_v59 = vld [vmem:[#allocation10 + $0x950] sm:$0xff] }
 0x4a5   :  { %7857 = vmatpush1.bf16.msra.mxu0 %v9078_v18  ;;  %7530 = vmatprep.subr.bf16.mxu1 %v9085_v61  ;;  %v921_v18 = vld [vmem:[#allocation10 + $0x970] sm:$0xff]  ;;  %v918_v61 = vld [vmem:[#allocation10 + $0x958] sm:$0xff] }
 0x4a6   :  { %7858 = vmatprep.subr.bf16.mxu0 %v9087_v62  ;;  %v922_v62 = vld [vmem:[#allocation10 + $0x978] sm:$0xff]  ;;  %v9141_v2 = vcombine.high %v917_v59, %v921_v18  ;;  %v9140_v15 = vcombine.low %v917_v59, %v921_v18 }
 0x4a7   :  { %v9143_v3 = vcombine.high %v918_v61, %v922_v62  ;;  %v9142_v22 = vcombine.low %v918_v61, %v922_v62 }
 0x4a8   :  { %7531 = vmatpush1.bf16.msra.mxu1 %v9084_v5  ;;  %v925_v5 = vld [vmem:[#allocation10 + $0x990] sm:$0xff] }
 0x4a9   :  { %7859 = vmatpush1.bf16.msra.mxu0 %v9086_v7  ;;  %7532 = vmatprep.subr.bf16.mxu1 %v9093_v8  ;;  %v929_v7 = vld [vmem:[#allocation10 + $0x9b0] sm:$0xff]  ;;  %v926_v8 = vld [vmem:[#allocation10 + $0x998] sm:$0xff] }
 0x4aa   :  { %7860 = vmatprep.subr.bf16.mxu0 %v9095_v9  ;;  %v930_v9 = vld [vmem:[#allocation10 + $0x9b8] sm:$0xff]  ;;  %v9149_v19 = vcombine.high %v925_v5, %v929_v7  ;;  %v9148_v24 = vcombine.low %v925_v5, %v929_v7 }
 0x4ab   :  { %v9151_v31 = vcombine.high %v926_v8, %v930_v9  ;;  %v9150_v27 = vcombine.low %v926_v8, %v930_v9 }
 0x4ac   :  { %7533 = vmatpush1.bf16.msra.mxu1 %v9092_v20  ;;  %v933_v20 = vld [vmem:[#allocation10 + $0x9d0] sm:$0xff] }
 0x4ad   :  { %7861 = vmatpush1.bf16.msra.mxu0 %v9094_v26  ;;  %7543 = vmatprep.subr.bf16.mxu1 %v9101_v23  ;;  %v937_v26 = vld [vmem:[#allocation10 + $0x9f0] sm:$0xff]  ;;  %v934_v23 = vld [vmem:[#allocation10 + $0x9d8] sm:$0xff] }
 0x4ae   :  { %7871 = vmatprep.subr.bf16.mxu0 %v9103_v25  ;;  %v938_v25 = vld [vmem:[#allocation10 + $0x9f8] sm:$0xff]  ;;  %v9156_v33 = vcombine.low %v933_v20, %v937_v26 }
 0x4af   :  { %7535 = vmatmul.mubr.bf16.vlgmr.msra.gmra.mrb[12].mxu1 %v10882_v45  ;;  %v9159_v0 = vcombine.high %v934_v23, %v938_v25 }
 0x4b0   :  { %7863 = vmatmul.mubr.bf16.vlgmr.msra.gmra.mrb[16].mxu0 %v10882_v45  ;;  %7544 = vmatpush1.bf16.msra.mxu1 %v9100_v28  ;;  %v9118_v45 = vcombine.low %v894_v38, %v898_v39  ;;  %v9157_v28 = vcombine.high %v933_v20, %v937_v26 }
 0x4b1   :  { %7575 = vmatprep.mubr.bf16.mxu1 %v10884_v47  ;;  %7872 = vmatpush1.bf16.msra.mxu0 %v9102_v32  ;;  %v945_v32 = vld [vmem:[#allocation10 + $0xa30] sm:$0xff] }
 0x4b2   :  { %7903 = vmatprep.mubr.bf16.mxu0 %v10884_v47  ;;  %7545 = vmatprep.subr.bf16.mxu1 %v9109_v34  ;;  %v9124_v47 = vcombine.low %v901_v35, %v905_v46  ;;  %v942_v34 = vld [vmem:[#allocation10 + $0xa18] sm:$0xff]  ;;  %v9165_v38 = vcombine.high %v941_v29, %v945_v32  ;;  %v9164_v35 = vcombine.low %v941_v29, %v945_v32 }
 0x4b3   :  { %7873 = vmatprep.subr.bf16.mxu0 %v9111_v36  ;;  %v9158_v36 = vcombine.low %v934_v23, %v938_v25  ;;  %v9167_v39 = vcombine.high %v942_v34, %v946_v30  ;;  %v9166_v46 = vcombine.low %v942_v34, %v946_v30 }
 0x4b4   :  { %7546 = vmatpush1.bf16.msra.mxu1 %v9108_v41  ;;  %v949_v41 = vld [vmem:[#allocation10 + $0xa50] sm:$0xff] }
 0x4b5   :  { %7874 = vmatpush1.bf16.msra.mxu0 %v9110_v42  ;;  %7547 = vmatprep.subr.bf16.mxu1 %v9117_v44  ;;  %v953_v42 = vld [vmem:[#allocation10 + $0xa70] sm:$0xff]  ;;  %v950_v44 = vld [vmem:[#allocation10 + $0xa58] sm:$0xff] }
 0x4b6   :  { %7875 = vmatprep.subr.bf16.mxu0 %v9119_v60  ;;  %v954_v60 = vld [vmem:[#allocation10 + $0xa78] sm:$0xff]  ;;  %v9173_v21 = vcombine.high %v949_v41, %v953_v42  ;;  %v9172_v52 = vcombine.low %v949_v41, %v953_v42 }
 0x4b7   :  { %v9175_v58 = vcombine.high %v950_v44, %v954_v60  ;;  %v9174_v16 = vcombine.low %v950_v44, %v954_v60 }
 0x4b8   :  { %7548 = vmatpush1.bf16.msra.mxu1 %v9116_v49  ;;  %v957_v49 = vld [vmem:[#allocation10 + $0xa90] sm:$0xff] }
 0x4b9   :  { %7876 = vmatpush1.bf16.msra.mxu0 %v9118_v45  ;;  %7549 = vmatprep.subr.bf16.mxu1 %v9125_v50  ;;  %v961_v45 = vld [vmem:[#allocation10 + $0xab0] sm:$0xff]  ;;  %v958_v50 = vld [vmem:[#allocation10 + $0xa98] sm:$0xff] }
 0x4ba   :  { %7877 = vmatprep.subr.bf16.mxu0 %v9127_v51  ;;  %v962_v51 = vld [vmem:[#allocation10 + $0xab8] sm:$0xff]  ;;  %v9181_v54 = vcombine.high %v957_v49, %v961_v45  ;;  %v9180_v59 = vcombine.low %v957_v49, %v961_v45 }
 0x4bb   :  { %v9183_v55 = vcombine.high %v958_v50, %v962_v51  ;;  %v9182_v18 = vcombine.low %v958_v50, %v962_v51 }
 0x4bc   :  { %7550 = vmatpush1.bf16.msra.mxu1 %v9124_v47  ;;  %v965_v47 = vld [vmem:[#allocation10 + $0xad0] sm:$0xff] }
 0x4bd   :  { %7878 = vmatpush1.bf16.msra.mxu0 %v9126_v57  ;;  %7551 = vmatprep.subr.bf16.mxu1 %v9133_v56  ;;  %v969_v57 = vld [vmem:[#allocation10 + $0xaf0] sm:$0xff]  ;;  %v966_v56 = vld [vmem:[#allocation10 + $0xad8] sm:$0xff] }
 0x4be   :  { %7879 = vmatprep.subr.bf16.mxu0 %v9135_v12  ;;  %v970_v12 = vld [vmem:[#allocation10 + $0xaf8] sm:$0xff]  ;;  %v9189_v61 = vcombine.high %v965_v47, %v969_v57  ;;  %v9188_v5 = vcombine.low %v965_v47, %v969_v57 }
 0x4bf   :  { %v9191_v62 = vcombine.high %v966_v56, %v970_v12  ;;  %v9190_v7 = vcombine.low %v966_v56, %v970_v12  ;;  %v1018_v47 = vld [vmem:[#allocation10 + $0xc78] sm:$0xff]  ;;  %v1021_v12 = vld [vmem:[#allocation10 + $0xc90] sm:$0xff] }
 0x4c0   :  { %7552 = vmatpush1.bf16.msra.mxu1 %v9132_v63  ;;  %v973_v63 = vld [vmem:[#allocation10 + $0xb10] sm:$0xff] }
 0x4c1   :  { %7880 = vmatpush1.bf16.msra.mxu0 %v9134_v1  ;;  %7553 = vmatprep.subr.bf16.mxu1 %v9141_v2  ;;  %v977_v1 = vld [vmem:[#allocation10 + $0xb30] sm:$0xff]  ;;  %v974_v2 = vld [vmem:[#allocation10 + $0xb18] sm:$0xff] }
 0x4c2   :  { %7881 = vmatprep.subr.bf16.mxu0 %v9143_v3  ;;  %v978_v3 = vld [vmem:[#allocation10 + $0xb38] sm:$0xff]  ;;  %v9197_v8 = vcombine.high %v973_v63, %v977_v1  ;;  %v9196_v20 = vcombine.low %v973_v63, %v977_v1 }
 0x4c3   :  { %v9199_v9 = vcombine.high %v974_v2, %v978_v3  ;;  %v9198_v26 = vcombine.low %v974_v2, %v978_v3 }
 0x4c4   :  { %7554 = vmatpush1.bf16.msra.mxu1 %v9140_v15  ;;  %v981_v15 = vld [vmem:[#allocation10 + $0xb50] sm:$0xff] }
 0x4c5   :  { %7882 = vmatpush1.bf16.msra.mxu0 %v9142_v22  ;;  %7555 = vmatprep.subr.bf16.mxu1 %v9149_v19  ;;  %v985_v22 = vld [vmem:[#allocation10 + $0xb70] sm:$0xff]  ;;  %v982_v19 = vld [vmem:[#allocation10 + $0xb58] sm:$0xff] }
 0x4c6   :  { %7883 = vmatprep.subr.bf16.mxu0 %v9151_v31  ;;  %v986_v31 = vld [vmem:[#allocation10 + $0xb78] sm:$0xff]  ;;  %v9205_v23 = vcombine.high %v981_v15, %v985_v22  ;;  %v9204_v29 = vcombine.low %v981_v15, %v985_v22 }
 0x4c7   :  { %v9207_v25 = vcombine.high %v982_v19, %v986_v31  ;;  %v9206_v32 = vcombine.low %v982_v19, %v986_v31  ;;  %v1037_v31 = vld [vmem:[#allocation10 + $0xd10] sm:$0xff] }
 0x4c8   :  { %7556 = vmatpush1.bf16.msra.mxu1 %v9148_v24  ;;  %v989_v24 = vld [vmem:[#allocation10 + $0xb90] sm:$0xff] }
 0x4c9   :  { %7884 = vmatpush1.bf16.msra.mxu0 %v9150_v27  ;;  %7557 = vmatprep.subr.bf16.mxu1 %v9157_v28  ;;  %v993_v27 = vld [vmem:[#allocation10 + $0xbb0] sm:$0xff]  ;;  %v990_v28 = vld [vmem:[#allocation10 + $0xb98] sm:$0xff] }
 0x4ca   :  { %7885 = vmatprep.subr.bf16.mxu0 %v9159_v0  ;;  %v994_v0 = vld [vmem:[#allocation10 + $0xbb8] sm:$0xff]  ;;  %v9213_v34 = vcombine.high %v989_v24, %v993_v27  ;;  %v9212_v41 = vcombine.low %v989_v24, %v993_v27 }
 0x4cb   :  { %v9215_v30 = vcombine.high %v990_v28, %v994_v0  ;;  %v9214_v42 = vcombine.low %v990_v28, %v994_v0  ;;  %v1045_v28 = vld [vmem:[#allocation10 + $0xd50] sm:$0xff] }
 0x4cc   :  { %7558 = vmatpush1.bf16.msra.mxu1 %v9156_v33  ;;  %v997_v33 = vld [vmem:[#allocation10 + $0xbd0] sm:$0xff] }
 0x4cd   :  { %7886 = vmatpush1.bf16.msra.mxu0 %v9158_v36  ;;  %7559 = vmatprep.subr.bf16.mxu1 %v9165_v38  ;;  %v1001_v36 = vld [vmem:[#allocation10 + $0xbf0] sm:$0xff]  ;;  %v998_v38 = vld [vmem:[#allocation10 + $0xbd8] sm:$0xff] }
 0x4ce   :  { %7887 = vmatprep.subr.bf16.mxu0 %v9167_v39  ;;  %v1002_v39 = vld [vmem:[#allocation10 + $0xbf8] sm:$0xff]  ;;  %v9221_v44 = vcombine.high %v997_v33, %v1001_v36  ;;  %v9220_v49 = vcombine.low %v997_v33, %v1001_v36  ;;  %v1049_v0 = vld [vmem:[#allocation10 + $0xd70] sm:$0xff] }
 0x4cf   :  { %v9223_v60 = vcombine.high %v998_v38, %v1002_v39  ;;  %v9222_v45 = vcombine.low %v998_v38, %v1002_v39  ;;  %v9269_v33 = vcombine.high %v1045_v28, %v1049_v0  ;;  %v1053_v38 = vld [vmem:[#allocation10 + $0xd90] sm:$0xff] }
 0x4d0   :  { %7560 = vmatpush1.bf16.msra.mxu1 %v9164_v35  ;;  %v1005_v35 = vld [vmem:[#allocation10 + $0xc10] sm:$0xff] }
 0x4d1   :  { %7888 = vmatpush1.bf16.msra.mxu0 %v9166_v46  ;;  %7561 = vmatprep.subr.bf16.mxu1 %v9173_v21  ;;  %v1009_v46 = vld [vmem:[#allocation10 + $0xc30] sm:$0xff]  ;;  %v1006_v21 = vld [vmem:[#allocation10 + $0xc18] sm:$0xff] }
 0x4d2   :  { %7889 = vmatprep.subr.bf16.mxu0 %v9175_v58  ;;  %v1010_v58 = vld [vmem:[#allocation10 + $0xc38] sm:$0xff]  ;;  %v9229_v50 = vcombine.high %v1005_v35, %v1009_v46  ;;  %v1057_v39 = vld [vmem:[#allocation10 + $0xdb0] sm:$0xff] }
 0x4d3   :  { %v9231_v51 = vcombine.high %v1006_v21, %v1010_v58  ;;  %v9230_v57 = vcombine.low %v1006_v21, %v1010_v58  ;;  %v1061_v58 = vld [vmem:[#allocation10 + $0xdd0] sm:$0xff] }
 0x4d4   :  { %7562 = vmatpush1.bf16.msra.mxu1 %v9172_v52  ;;  %v1013_v52 = vld [vmem:[#allocation10 + $0xc50] sm:$0xff] }
 0x4d5   :  { %7890 = vmatpush1.bf16.msra.mxu0 %v9174_v16  ;;  %7563 = vmatprep.subr.bf16.mxu1 %v9181_v54  ;;  %v1017_v16 = vld [vmem:[#allocation10 + $0xc70] sm:$0xff]  ;;  %v9228_v54 = vcombine.low %v1005_v35, %v1009_v46  ;;  %v9277_v35 = vcombine.high %v1053_v38, %v1057_v39 }
 0x4d6   :  { %7891 = vmatprep.subr.bf16.mxu0 %v9183_v55  ;;  %v1014_v55 = vld [vmem:[#allocation10 + $0xc58] sm:$0xff]  ;;  %v9237_v56 = vcombine.high %v1013_v52, %v1017_v16  ;;  %v9236_v63 = vcombine.low %v1013_v52, %v1017_v16 }
 0x4d7   :  { %v9238_v1 = vcombine.low %v1014_v55, %v1018_v47  ;;  %v1066_v52 = vld [vmem:[#allocation10 + $0xdf8] sm:$0xff] }
 0x4d8   :  { %7564 = vmatpush1.bf16.msra.mxu1 %v9180_v59  ;;  %v1025_v59 = vld [vmem:[#allocation10 + $0xcb0] sm:$0xff] }
 0x4d9   :  { %7892 = vmatpush1.bf16.msra.mxu0 %v9182_v18  ;;  %7565 = vmatprep.subr.bf16.mxu1 %v9189_v61  ;;  %v9239_v18 = vcombine.high %v1014_v55, %v1018_v47  ;;  %v1022_v61 = vld [vmem:[#allocation10 + $0xc98] sm:$0xff]  ;;  %v9245_v2 = vcombine.high %v1021_v12, %v1025_v59  ;;  %v9244_v15 = vcombine.low %v1021_v12, %v1025_v59 }
 0x4da   :  { %7893 = vmatprep.subr.bf16.mxu0 %v9191_v62  ;;  %v1026_v62 = vld [vmem:[#allocation10 + $0xcb8] sm:$0xff]  ;;  %v9276_v55 = vcombine.low %v1053_v38, %v1057_v39 }
 0x4db   :  { %v9247_v3 = vcombine.high %v1022_v61, %v1026_v62 }
 0x4dc   :  { %7566 = vmatpush1.bf16.msra.mxu1 %v9188_v5  ;;  %v1029_v5 = vld [vmem:[#allocation10 + $0xcd0] sm:$0xff] }
 0x4dd   :  { %7894 = vmatpush1.bf16.msra.mxu0 %v9190_v7  ;;  %7567 = vmatprep.subr.bf16.mxu1 %v9197_v8  ;;  %v1033_v7 = vld [vmem:[#allocation10 + $0xcf0] sm:$0xff]  ;;  %v1030_v8 = vld [vmem:[#allocation10 + $0xcd8] sm:$0xff] }
 0x4de   :  { %7895 = vmatprep.subr.bf16.mxu0 %v9199_v9  ;;  %v1034_v9 = vld [vmem:[#allocation10 + $0xcf8] sm:$0xff]  ;;  %v9253_v22 = vcombine.high %v1029_v5, %v1033_v7 }
 0x4df   :  { %v9255_v19 = vcombine.high %v1030_v8, %v1034_v9 }
 0x4e0   :  { %7568 = vmatpush1.bf16.msra.mxu1 %v9196_v20  ;;  %v1041_v20 = vld [vmem:[#allocation10 + $0xd30] sm:$0xff] }
 0x4e1   :  { %7896 = vmatpush1.bf16.msra.mxu0 %v9198_v26  ;;  %7569 = vmatprep.subr.bf16.mxu1 %v9205_v23  ;;  %v1038_v26 = vld [vmem:[#allocation10 + $0xd18] sm:$0xff]  ;;  %v9261_v24 = vcombine.high %v1037_v31, %v1041_v20 }
 0x4e2   :  { %7897 = vmatprep.subr.bf16.mxu0 %v9207_v25  ;;  %v1042_v23 = vld [vmem:[#allocation10 + $0xd38] sm:$0xff]  ;;  %v9254_v25 = vcombine.low %v1030_v8, %v1034_v9  ;;  %v1077_v8 = vld [vmem:[#allocation10 + $0xe50] sm:$0xff] }
 0x4e3   :  { %v9263_v27 = vcombine.high %v1038_v26, %v1042_v23  ;;  %v1081_v9 = vld [vmem:[#allocation10 + $0xe70] sm:$0xff] }
 0x4e4   :  { %7570 = vmatpush1.bf16.msra.mxu1 %v9204_v29  ;;  %v1046_v29 = vld [vmem:[#allocation10 + $0xd58] sm:$0xff] }
 0x4e5   :  { %7898 = vmatpush1.bf16.msra.mxu0 %v9206_v32  ;;  %7571 = vmatprep.subr.bf16.mxu1 %v9213_v34  ;;  %v1050_v32 = vld [vmem:[#allocation10 + $0xd78] sm:$0xff]  ;;  %v9260_v34 = vcombine.low %v1037_v31, %v1041_v20  ;;  %v9301_v31 = vcombine.high %v1077_v8, %v1081_v9 }
 0x4e6   :  { %7899 = vmatprep.subr.bf16.mxu0 %v9215_v30  ;;  %v9262_v30 = vcombine.low %v1038_v26, %v1042_v23  ;;  %v9271_v36 = vcombine.high %v1046_v29, %v1050_v32  ;;  %v1085_v26 = vld [vmem:[#allocation10 + $0xe90] sm:$0xff] }
 0x4e7   :  { %v1089_v23 = vld [vmem:[#allocation10 + $0xeb0] sm:$0xff] }
 0x4e8   :  { %7572 = vmatpush1.bf16.msra.mxu1 %v9212_v41  ;;  %v1054_v41 = vld [vmem:[#allocation10 + $0xd98] sm:$0xff] }
 0x4e9   :  { %7900 = vmatpush1.bf16.msra.mxu0 %v9214_v42  ;;  %7573 = vmatprep.subr.bf16.mxu1 %v9221_v44  ;;  %v1058_v42 = vld [vmem:[#allocation10 + $0xdb8] sm:$0xff]  ;;  %v9268_v44 = vcombine.low %v1045_v28, %v1049_v0  ;;  %v9309_v28 = vcombine.high %v1085_v26, %v1089_v23 }
 0x4ea   :  { %7901 = vmatprep.subr.bf16.mxu0 %v9223_v60  ;;  %v9270_v60 = vcombine.low %v1046_v29, %v1050_v32  ;;  %v9279_v21 = vcombine.high %v1054_v41, %v1058_v42  ;;  %v1093_v29 = vld [vmem:[#allocation10 + $0xed0] sm:$0xff] }
 0x4eb   :  { %v1097_v32 = vld [vmem:[#allocation10 + $0xef0] sm:$0xff] }
 0x4ec   :  { %7574 = vmatpush1.bf16.msra.mxu1 %v9220_v49  ;;  %v1065_v49 = vld [vmem:[#allocation10 + $0xdf0] sm:$0xff]  ;;  %v9317_v38 = vcombine.high %v1093_v29, %v1097_v32 }
 0x4ed   :  { %7902 = vmatpush1.bf16.msra.mxu0 %v9222_v45  ;;  %7584 = vmatprep.subr.bf16.mxu1 %v9229_v50  ;;  %v9285_v12 = vcombine.high %v1061_v58, %v1065_v49 }
 0x4ee   :  { %7912 = vmatprep.subr.bf16.mxu0 %v9231_v51  ;;  %v1062_v51 = vld [vmem:[#allocation10 + $0xdd8] sm:$0xff] }
 0x4ef   :  { %7576 = vmatmul.mubr.bf16.vlgmr.msra.gmra.mrb[12].mxu1 %v10899_v6 }
 0x4f0   :  { %7904 = vmatmul.mubr.bf16.vlgmr.msra.gmra.mrb[16].mxu0 %v10899_v6  ;;  %7585 = vmatpush1.bf16.msra.mxu1 %v9228_v54  ;;  %v9246_v6 = vcombine.low %v1022_v61, %v1026_v62  ;;  %v1069_v61 = vld [vmem:[#allocation10 + $0xe10] sm:$0xff] }
 0x4f1   :  { %7616 = vmatprep.mubr.bf16.mxu1 %v10902_v13  ;;  %7913 = vmatpush1.bf16.msra.mxu0 %v9230_v57  ;;  %v1073_v62 = vld [vmem:[#allocation10 + $0xe30] sm:$0xff] }
 0x4f2   :  { %7944 = vmatprep.mubr.bf16.mxu0 %v10902_v13  ;;  %7586 = vmatprep.subr.bf16.mxu1 %v9237_v56  ;;  %v9252_v13 = vcombine.low %v1029_v5, %v1033_v7  ;;  %v9278_v56 = vcombine.low %v1054_v41, %v1058_v42  ;;  %v9293_v5 = vcombine.high %v1069_v61, %v1073_v62  ;;  %v1101_v41 = vld [vmem:[#allocation10 + $0xf10] sm:$0xff] }
 0x4f3   :  { %7914 = vmatprep.subr.bf16.mxu0 %v9239_v18  ;;  %v9287_v18 = vcombine.high %v1062_v51, %v1066_v52  ;;  %v1105_v42 = vld [vmem:[#allocation10 + $0xf30] sm:$0xff] }
 0x4f4   :  { %7587 = vmatpush1.bf16.msra.mxu1 %v9236_v63  ;;  %v1070_v63 = vld [vmem:[#allocation10 + $0xe18] sm:$0xff] }
 0x4f5   :  { %7915 = vmatpush1.bf16.msra.mxu0 %v9238_v1  ;;  %7588 = vmatprep.subr.bf16.mxu1 %v9245_v2  ;;  %v1074_v1 = vld [vmem:[#allocation10 + $0xe38] sm:$0xff]  ;;  %v9284_v2 = vcombine.low %v1061_v58, %v1065_v49  ;;  %v9325_v58 = vcombine.high %v1101_v41, %v1105_v42 }
 0x4f6   :  { %7916 = vmatprep.subr.bf16.mxu0 %v9247_v3  ;;  %v9286_v3 = vcombine.low %v1062_v51, %v1066_v52  ;;  %v9295_v7 = vcombine.high %v1070_v63, %v1074_v1  ;;  %v1109_v51 = vld [vmem:[#allocation10 + $0xf50] sm:$0xff] }
 0x4f7   :  { %v1113_v52 = vld [vmem:[#allocation10 + $0xf70] sm:$0xff] }
 0x4f8   :  { %7589 = vmatpush1.bf16.msra.mxu1 %v9244_v15  ;;  %v1078_v15 = vld [vmem:[#allocation10 + $0xe58] sm:$0xff] }
 0x4f9   :  { %7917 = vmatpush1.bf16.msra.mxu0 %v9246_v6  ;;  %7590 = vmatprep.subr.bf16.mxu1 %v9253_v22  ;;  %v1082_v6 = vld [vmem:[#allocation10 + $0xe78] sm:$0xff]  ;;  %v9292_v22 = vcombine.low %v1069_v61, %v1073_v62 }
 0x4fa   :  { %7918 = vmatprep.subr.bf16.mxu0 %v9255_v19  ;;  %v9294_v19 = vcombine.low %v1070_v63, %v1074_v1  ;;  %v9303_v20 = vcombine.high %v1078_v15, %v1082_v6  ;;  %v1118_v61 = vld [vmem:[#allocation10 + $0xf98] sm:$0xff]  ;;  %v9332_v63 = vcombine.low %v1109_v51, %v1113_v52 }
 0x4fb   :  { %v1122_v62 = vld [vmem:[#allocation10 + $0xfb8] sm:$0xff] }
 0x4fc   :  { %7591 = vmatpush1.bf16.msra.mxu1 %v9252_v13  ;;  %v1086_v13 = vld [vmem:[#allocation10 + $0xe98] sm:$0xff] }
 0x4fd   :  { %7919 = vmatpush1.bf16.msra.mxu0 %v9254_v25  ;;  %7592 = vmatprep.subr.bf16.mxu1 %v9261_v24  ;;  %v1090_v25 = vld [vmem:[#allocation10 + $0xeb8] sm:$0xff]  ;;  %v9300_v24 = vcombine.low %v1077_v8, %v1081_v9 }
 0x4fe   :  { %7920 = vmatprep.subr.bf16.mxu0 %v9263_v27  ;;  %v9302_v27 = vcombine.low %v1078_v15, %v1082_v6  ;;  %v9311_v0 = vcombine.high %v1086_v13, %v1090_v25  ;;  %v1126_v8 = vld [vmem:[#allocation10 + $0xfd8] sm:$0xff]  ;;  %v9342_v6 = vcombine.low %v1118_v61, %v1122_v62 }
 0x4ff   :  { %v1130_v9 = vld [vmem:[#allocation10 + $0xff8] sm:$0xff] }
 0x500   :  { %7593 = vmatpush1.bf16.msra.mxu1 %v9260_v34  ;;  %v1094_v34 = vld [vmem:[#allocation10 + $0xed8] sm:$0xff] }
 0x501   :  { %7921 = vmatpush1.bf16.msra.mxu0 %v9262_v30  ;;  %7594 = vmatprep.subr.bf16.mxu1 %v9269_v33  ;;  %v1098_v30 = vld [vmem:[#allocation10 + $0xef8] sm:$0xff]  ;;  %v9308_v33 = vcombine.low %v1085_v26, %v1089_v23 }
 0x502   :  { %v10997_v46 = vpop.f32.mrb[8].mxu1  ;;  %7922 = vmatprep.subr.bf16.mxu0 %v9271_v36  ;;  %v9310_v36 = vcombine.low %v1086_v13, %v1090_v25  ;;  %v9319_v39 = vcombine.high %v1094_v34, %v1098_v30  ;;  %v1134_v26 = vld [vmem:[#allocation10 + $0x1018] sm:$0xff]  ;;  %v9350_v25 = vcombine.low %v1126_v8, %v1130_v9 }
 0x503   :  { %v10999_v45 = vpop.f32.mrb[12].mxu0  ;;  %v11001_v50 = vpop.f32.mrb[9].mxu1  ;;  %v1138_v23 = vld [vmem:[#allocation10 + $0x1038] sm:$0xff] }
 0x504   :  { %v11003_v16 = vpop.f32.mrb[13].mxu0  ;;  %v7130_v54 = vpop.f32.mrb[10].mxu1  ;;  %7595 = vmatpush1.bf16.msra.mxu1 %v9268_v44  ;;  %v1102_v44 = vld [vmem:[#allocation10 + $0xf18] sm:$0xff] }
 0x505   :  { %v7458_v47 = vpop.f32.mrb[14].mxu0  ;;  %7923 = vmatpush1.bf16.msra.mxu0 %v9270_v60  ;;  %v7131_v57 = vpop.f32.mrb[11].mxu1  ;;  %7596 = vmatprep.subr.bf16.mxu1 %v9277_v35  ;;  %v1106_v60 = vld [vmem:[#allocation10 + $0xf38] sm:$0xff]  ;;  %v9316_v35 = vcombine.low %v1093_v29, %v1097_v32 }
 0x506   :  { %v7459_v59 = vpop.f32.mrb[15].mxu0  ;;  %7924 = vmatprep.subr.bf16.mxu0 %v9279_v21  ;;  %v9318_v21 = vcombine.low %v1094_v34, %v1098_v30  ;;  %v9327_v49 = vcombine.high %v1102_v44, %v1106_v60  ;;  %v1110_v54 = vld [vmem:[#allocation10 + $0xf58] sm:$0xff]  ;;  %v9324_v47 = vcombine.low %v1101_v41, %v1105_v42  ;;  %v9326_v57 = vcombine.low %v1102_v44, %v1106_v60 }
 0x507   :  { %v1117_v59 = vld [vmem:[#allocation10 + $0xf90] sm:$0xff]  ;;  %v1142_v32 = vld [vmem:[#allocation10 + $0x1058] sm:$0xff]  ;;  %v9358_v30 = vcombine.low %v1134_v26, %v1138_v23 }
 0x508   :  { %7597 = vmatpush1.bf16.msra.mxu1 %v9276_v55  ;;  %v1114_v55 = vld [vmem:[#allocation10 + $0xf78] sm:$0xff] }
 0x509   :  { %7925 = vmatpush1.bf16.msra.mxu0 %v9278_v56  ;;  %7598 = vmatprep.subr.bf16.mxu1 %v9285_v12  ;;  %v9333_v56 = vcombine.high %v1109_v51, %v1113_v52  ;;  %v9335_v12 = vcombine.high %v1110_v54, %v1114_v55  ;;  %v9334_v1 = vcombine.low %v1110_v54, %v1114_v55  ;;  %v1146_v34 = vld [vmem:[#allocation10 + $0x1078] sm:$0xff] }
 0x50a   :  { %7926 = vmatprep.subr.bf16.mxu0 %v9287_v18  ;;  %v1121_v18 = vld [vmem:[#allocation10 + $0xfb0] sm:$0xff]  ;;  %v1150_v41 = vld [vmem:[#allocation10 + $0x1098] sm:$0xff]  ;;  %v9366_v60 = vcombine.low %v1142_v32, %v1146_v34 }
 0x50b   :  { %v9340_v15 = vcombine.low %v1117_v59, %v1121_v18  ;;  %v1154_v42 = vld [vmem:[#allocation10 + $0x10b8] sm:$0xff] }
 0x50c   :  { %7599 = vmatpush1.bf16.msra.mxu1 %v9284_v2  ;;  %v9341_v2 = vcombine.high %v1117_v59, %v1121_v18  ;;  %v1158_v51 = vld [vmem:[#allocation10 + $0x10d8] sm:$0xff] }
 0x50d   :  { %7927 = vmatpush1.bf16.msra.mxu0 %v9286_v3  ;;  %7600 = vmatprep.subr.bf16.mxu1 %v9293_v5  ;;  %v9343_v3 = vcombine.high %v1118_v61, %v1122_v62  ;;  %v1125_v5 = vld [vmem:[#allocation10 + $0xfd0] sm:$0xff]  ;;  %v1162_v52 = vld [vmem:[#allocation10 + $0x10f8] sm:$0xff] }
 0x50e   :  { %7928 = vmatprep.subr.bf16.mxu0 %v9295_v7  ;;  %v1129_v7 = vld [vmem:[#allocation10 + $0xff0] sm:$0xff]  ;;  %v1170_v59 = vld [vmem:[#allocation10 + $0x1138] sm:$0xff]  ;;  %v9382_v18 = vcombine.low %v1158_v51, %v1162_v52 }
 0x50f   :  { %v9348_v13 = vcombine.low %v1125_v5, %v1129_v7 }
 0x510   :  { %7601 = vmatpush1.bf16.msra.mxu1 %v9292_v22  ;;  %v9349_v22 = vcombine.high %v1125_v5, %v1129_v7 }
 0x511   :  { %7929 = vmatpush1.bf16.msra.mxu0 %v9294_v19  ;;  %7602 = vmatprep.subr.bf16.mxu1 %v9301_v31  ;;  %v9351_v19 = vcombine.high %v1126_v8, %v1130_v9  ;;  %v1133_v31 = vld [vmem:[#allocation10 + $0x1010] sm:$0xff] }
 0x512   :  { %7930 = vmatprep.subr.bf16.mxu0 %v9303_v20  ;;  %v1137_v20 = vld [vmem:[#allocation10 + $0x1030] sm:$0xff] }
 0x513   :  { %v9356_v29 = vcombine.low %v1133_v31, %v1137_v20 }
 0x514   :  { %7603 = vmatpush1.bf16.msra.mxu1 %v9300_v24  ;;  %v9357_v24 = vcombine.high %v1133_v31, %v1137_v20 }
 0x515   :  { %7931 = vmatpush1.bf16.msra.mxu0 %v9302_v27  ;;  %7604 = vmatprep.subr.bf16.mxu1 %v9309_v28  ;;  %v9359_v27 = vcombine.high %v1134_v26, %v1138_v23  ;;  %v1141_v28 = vld [vmem:[#allocation10 + $0x1050] sm:$0xff] }
 0x516   :  { %7932 = vmatprep.subr.bf16.mxu0 %v9311_v0  ;;  %v1145_v0 = vld [vmem:[#allocation10 + $0x1070] sm:$0xff] }
 0x517   :  { %v9364_v44 = vcombine.low %v1141_v28, %v1145_v0 }
 0x518   :  { %7605 = vmatpush1.bf16.msra.mxu1 %v9308_v33  ;;  %v9365_v33 = vcombine.high %v1141_v28, %v1145_v0 }
 0x519   :  { %7933 = vmatpush1.bf16.msra.mxu0 %v9310_v36  ;;  %7606 = vmatprep.subr.bf16.mxu1 %v9317_v38  ;;  %v1149_v36 = vld [vmem:[#allocation10 + $0x1090] sm:$0xff] }
 0x51a   :  { %7934 = vmatprep.subr.bf16.mxu0 %v9319_v39  ;;  %v1153_v38 = vld [vmem:[#allocation10 + $0x10b0] sm:$0xff]  ;;  %v9367_v39 = vcombine.high %v1142_v32, %v1146_v34 }
 0x51b   :  { %v9372_v54 = vcombine.low %v1149_v36, %v1153_v38  ;;  %v1197_v34 = vld [vmem:[#allocation10 + $0x1210] sm:$0xff] }
 0x51c   :  { %7607 = vmatpush1.bf16.msra.mxu1 %v9316_v35  ;;  %v9373_v35 = vcombine.high %v1149_v36, %v1153_v38  ;;  %v1202_v36 = vld [vmem:[#allocation10 + $0x1238] sm:$0xff] }
 0x51d   :  { %7935 = vmatpush1.bf16.msra.mxu0 %v9318_v21  ;;  %7608 = vmatprep.subr.bf16.mxu1 %v9325_v58  ;;  %v9375_v21 = vcombine.high %v1150_v41, %v1154_v42  ;;  %v1157_v58 = vld [vmem:[#allocation10 + $0x10d0] sm:$0xff] }
 0x51e   :  { %7936 = vmatprep.subr.bf16.mxu0 %v9327_v49  ;;  %v1161_v49 = vld [vmem:[#allocation10 + $0x10f0] sm:$0xff] }
 0x51f   :  { %v9381_v55 = vcombine.high %v1157_v58, %v1161_v49 }
 0x520   :  { %7609 = vmatpush1.bf16.msra.mxu1 %v9324_v47  ;;  %v9383_v47 = vcombine.high %v1158_v51, %v1162_v52 }
 0x521   :  { %7937 = vmatpush1.bf16.msra.mxu0 %v9326_v57  ;;  %7610 = vmatprep.subr.bf16.mxu1 %v9333_v56  ;;  %v1165_v57 = vld [vmem:[#allocation10 + $0x1110] sm:$0xff] }
 0x522   :  { %7938 = vmatprep.subr.bf16.mxu0 %v9335_v12  ;;  %v1169_v56 = vld [vmem:[#allocation10 + $0x1130] sm:$0xff]  ;;  %v1166_v12 = vld [vmem:[#allocation10 + $0x1118] sm:$0xff] }
 0x523   :  { %v9389_v61 = vcombine.high %v1165_v57, %v1169_v56  ;;  %v9391_v62 = vcombine.high %v1166_v12, %v1170_v59  ;;  %v9388_v5 = vcombine.low %v1165_v57, %v1169_v56  ;;  %v9390_v7 = vcombine.low %v1166_v12, %v1170_v59 }
 0x524   :  { %7611 = vmatpush1.bf16.msra.mxu1 %v9332_v63  ;;  %v1173_v63 = vld [vmem:[#allocation10 + $0x1150] sm:$0xff] }
 0x525   :  { %7939 = vmatpush1.bf16.msra.mxu0 %v9334_v1  ;;  %7612 = vmatprep.subr.bf16.mxu1 %v9341_v2  ;;  %v1177_v1 = vld [vmem:[#allocation10 + $0x1170] sm:$0xff]  ;;  %v1174_v2 = vld [vmem:[#allocation10 + $0x1158] sm:$0xff] }
 0x526   :  { %7940 = vmatprep.subr.bf16.mxu0 %v9343_v3  ;;  %v1178_v3 = vld [vmem:[#allocation10 + $0x1178] sm:$0xff]  ;;  %v9397_v8 = vcombine.high %v1173_v63, %v1177_v1  ;;  %v9396_v31 = vcombine.low %v1173_v63, %v1177_v1 }
 0x527   :  { %v9399_v9 = vcombine.high %v1174_v2, %v1178_v3  ;;  %v9398_v20 = vcombine.low %v1174_v2, %v1178_v3 }
 0x528   :  { %7613 = vmatpush1.bf16.msra.mxu1 %v9340_v15  ;;  %v1181_v15 = vld [vmem:[#allocation10 + $0x1190] sm:$0xff] }
 0x529   :  { %7941 = vmatpush1.bf16.msra.mxu0 %v9342_v6  ;;  %7614 = vmatprep.subr.bf16.mxu1 %v9349_v22  ;;  %v1185_v6 = vld [vmem:[#allocation10 + $0x11b0] sm:$0xff]  ;;  %v1182_v22 = vld [vmem:[#allocation10 + $0x1198] sm:$0xff] }
 0x52a   :  { %7942 = vmatprep.subr.bf16.mxu0 %v9351_v19  ;;  %v1186_v19 = vld [vmem:[#allocation10 + $0x11b8] sm:$0xff]  ;;  %v9405_v26 = vcombine.high %v1181_v15, %v1185_v6  ;;  %v9404_v28 = vcombine.low %v1181_v15, %v1185_v6 }
 0x52b   :  { %v9407_v23 = vcombine.high %v1182_v22, %v1186_v19  ;;  %v9406_v0 = vcombine.low %v1182_v22, %v1186_v19 }
 0x52c   :  { %7615 = vmatpush1.bf16.msra.mxu1 %v9348_v13  ;;  %v1189_v13 = vld [vmem:[#allocation10 + $0x11d0] sm:$0xff] }
 0x52d   :  { %7943 = vmatpush1.bf16.msra.mxu0 %v9350_v25  ;;  %7625 = vmatprep.subr.bf16.mxu1 %v9357_v24  ;;  %v1193_v25 = vld [vmem:[#allocation10 + $0x11f0] sm:$0xff]  ;;  %v1190_v24 = vld [vmem:[#allocation10 + $0x11d8] sm:$0xff] }
 0x52e   :  { %7953 = vmatprep.subr.bf16.mxu0 %v9359_v27  ;;  %v1194_v27 = vld [vmem:[#allocation10 + $0x11f8] sm:$0xff]  ;;  %v9412_v38 = vcombine.low %v1189_v13, %v1193_v25 }
 0x52f   :  { %7617 = vmatmul.mubr.bf16.vlgmr.msra.gmra.mrb[12].mxu1 %v10917_v37  ;;  %v9415_v32 = vcombine.high %v1190_v24, %v1194_v27 }
 0x530   :  { %7945 = vmatmul.mubr.bf16.vlgmr.msra.gmra.mrb[16].mxu0 %v10917_v37  ;;  %7626 = vmatpush1.bf16.msra.mxu1 %v9356_v29  ;;  %v9374_v37 = vcombine.low %v1150_v41, %v1154_v42  ;;  %v9413_v29 = vcombine.high %v1189_v13, %v1193_v25 }
 0x531   :  { %7657 = vmatprep.mubr.bf16.mxu1 %v10919_v43  ;;  %7954 = vmatpush1.bf16.msra.mxu0 %v9358_v30  ;;  %v1201_v30 = vld [vmem:[#allocation10 + $0x1230] sm:$0xff] }
 0x532   :  { %7985 = vmatprep.mubr.bf16.mxu0 %v10919_v43  ;;  %7627 = vmatprep.subr.bf16.mxu1 %v9365_v33  ;;  %v9380_v43 = vcombine.low %v1157_v58, %v1161_v49  ;;  %v1198_v33 = vld [vmem:[#allocation10 + $0x1218] sm:$0xff]  ;;  %v9421_v41 = vcombine.high %v1197_v34, %v1201_v30  ;;  %v9420_v58 = vcombine.low %v1197_v34, %v1201_v30 }
 0x533   :  { %7955 = vmatprep.subr.bf16.mxu0 %v9367_v39  ;;  %v9414_v39 = vcombine.low %v1190_v24, %v1194_v27  ;;  %v9423_v42 = vcombine.high %v1198_v33, %v1202_v36  ;;  %v9422_v49 = vcombine.low %v1198_v33, %v1202_v36 }
 0x534   :  { %7628 = vmatpush1.bf16.msra.mxu1 %v9364_v44  ;;  %v1205_v44 = vld [vmem:[#allocation10 + $0x1250] sm:$0xff] }
 0x535   :  { %7956 = vmatpush1.bf16.msra.mxu0 %v9366_v60  ;;  %7629 = vmatprep.subr.bf16.mxu1 %v9373_v35  ;;  %v1209_v60 = vld [vmem:[#allocation10 + $0x1270] sm:$0xff]  ;;  %v1206_v35 = vld [vmem:[#allocation10 + $0x1258] sm:$0xff] }
 0x536   :  { %7957 = vmatprep.subr.bf16.mxu0 %v9375_v21  ;;  %v1210_v21 = vld [vmem:[#allocation10 + $0x1278] sm:$0xff]  ;;  %v9429_v51 = vcombine.high %v1205_v44, %v1209_v60  ;;  %v9428_v57 = vcombine.low %v1205_v44, %v1209_v60 }
 0x537   :  { %v9431_v52 = vcombine.high %v1206_v35, %v1210_v21  ;;  %v9430_v56 = vcombine.low %v1206_v35, %v1210_v21 }
 0x538   :  { %7630 = vmatpush1.bf16.msra.mxu1 %v9372_v54  ;;  %v1213_v54 = vld [vmem:[#allocation10 + $0x1290] sm:$0xff] }
 0x539   :  { %7958 = vmatpush1.bf16.msra.mxu0 %v9374_v37  ;;  %7631 = vmatprep.subr.bf16.mxu1 %v9381_v55  ;;  %v1217_v37 = vld [vmem:[#allocation10 + $0x12b0] sm:$0xff]  ;;  %v1214_v55 = vld [vmem:[#allocation10 + $0x1298] sm:$0xff] }
 0x53a   :  { %7959 = vmatprep.subr.bf16.mxu0 %v9383_v47  ;;  %v1218_v47 = vld [vmem:[#allocation10 + $0x12b8] sm:$0xff]  ;;  %v9437_v12 = vcombine.high %v1213_v54, %v1217_v37  ;;  %v9436_v63 = vcombine.low %v1213_v54, %v1217_v37 }
 0x53b   :  { %v9439_v59 = vcombine.high %v1214_v55, %v1218_v47  ;;  %v9438_v1 = vcombine.low %v1214_v55, %v1218_v47 }
 0x53c   :  { %7632 = vmatpush1.bf16.msra.mxu1 %v9380_v43  ;;  %v1221_v43 = vld [vmem:[#allocation10 + $0x12d0] sm:$0xff] }
 0x53d   :  { %7960 = vmatpush1.bf16.msra.mxu0 %v9382_v18  ;;  %7633 = vmatprep.subr.bf16.mxu1 %v9389_v61  ;;  %v1225_v18 = vld [vmem:[#allocation10 + $0x12f0] sm:$0xff]  ;;  %v1222_v61 = vld [vmem:[#allocation10 + $0x12d8] sm:$0xff] }
 0x53e   :  { %7961 = vmatprep.subr.bf16.mxu0 %v9391_v62  ;;  %v1226_v62 = vld [vmem:[#allocation10 + $0x12f8] sm:$0xff]  ;;  %v9445_v2 = vcombine.high %v1221_v43, %v1225_v18  ;;  %v9444_v15 = vcombine.low %v1221_v43, %v1225_v18 }
 0x53f   :  { %v9447_v3 = vcombine.high %v1222_v61, %v1226_v62  ;;  %v9446_v6 = vcombine.low %v1222_v61, %v1226_v62  ;;  %v1274_v43 = vld [vmem:[#allocation10 + $0x1478] sm:$0xff]  ;;  %v1277_v62 = vld [vmem:[#allocation10 + $0x1490] sm:$0xff] }
 0x540   :  { %7634 = vmatpush1.bf16.msra.mxu1 %v9388_v5  ;;  %v1229_v5 = vld [vmem:[#allocation10 + $0x1310] sm:$0xff] }
 0x541   :  { %7962 = vmatpush1.bf16.msra.mxu0 %v9390_v7  ;;  %7635 = vmatprep.subr.bf16.mxu1 %v9397_v8  ;;  %v1233_v7 = vld [vmem:[#allocation10 + $0x1330] sm:$0xff]  ;;  %v1230_v8 = vld [vmem:[#allocation10 + $0x1318] sm:$0xff] }
 0x542   :  { %7963 = vmatprep.subr.bf16.mxu0 %v9399_v9  ;;  %v1234_v9 = vld [vmem:[#allocation10 + $0x1338] sm:$0xff]  ;;  %v9453_v22 = vcombine.high %v1229_v5, %v1233_v7  ;;  %v9452_v13 = vcombine.low %v1229_v5, %v1233_v7 }
 0x543   :  { %v9455_v19 = vcombine.high %v1230_v8, %v1234_v9  ;;  %v9454_v25 = vcombine.low %v1230_v8, %v1234_v9 }
 0x544   :  { %7636 = vmatpush1.bf16.msra.mxu1 %v9396_v31  ;;  %v1237_v31 = vld [vmem:[#allocation10 + $0x1350] sm:$0xff] }
 0x545   :  { %7964 = vmatpush1.bf16.msra.mxu0 %v9398_v20  ;;  %7637 = vmatprep.subr.bf16.mxu1 %v9405_v26  ;;  %v1241_v20 = vld [vmem:[#allocation10 + $0x1370] sm:$0xff]  ;;  %v1238_v26 = vld [vmem:[#allocation10 + $0x1358] sm:$0xff] }
 0x546   :  { %7965 = vmatprep.subr.bf16.mxu0 %v9407_v23  ;;  %v1242_v23 = vld [vmem:[#allocation10 + $0x1378] sm:$0xff]  ;;  %v9461_v24 = vcombine.high %v1237_v31, %v1241_v20  ;;  %v9460_v34 = vcombine.low %v1237_v31, %v1241_v20 }
 0x547   :  { %v9463_v27 = vcombine.high %v1238_v26, %v1242_v23  ;;  %v9462_v30 = vcombine.low %v1238_v26, %v1242_v23  ;;  %v1293_v23 = vld [vmem:[#allocation10 + $0x1510] sm:$0xff] }
 0x548   :  { %7638 = vmatpush1.bf16.msra.mxu1 %v9404_v28  ;;  %v1245_v28 = vld [vmem:[#allocation10 + $0x1390] sm:$0xff] }
 0x549   :  { %7966 = vmatpush1.bf16.msra.mxu0 %v9406_v0  ;;  %7639 = vmatprep.subr.bf16.mxu1 %v9413_v29  ;;  %v1249_v0 = vld [vmem:[#allocation10 + $0x13b0] sm:$0xff]  ;;  %v1246_v29 = vld [vmem:[#allocation10 + $0x1398] sm:$0xff] }
 0x54a   :  { %7967 = vmatprep.subr.bf16.mxu0 %v9415_v32  ;;  %v1250_v32 = vld [vmem:[#allocation10 + $0x13b8] sm:$0xff]  ;;  %v9469_v33 = vcombine.high %v1245_v28, %v1249_v0  ;;  %v9468_v44 = vcombine.low %v1245_v28, %v1249_v0 }
 0x54b   :  { %v9471_v36 = vcombine.high %v1246_v29, %v1250_v32  ;;  %v9470_v60 = vcombine.low %v1246_v29, %v1250_v32  ;;  %v1301_v29 = vld [vmem:[#allocation10 + $0x1550] sm:$0xff] }
 0x54c   :  { %7640 = vmatpush1.bf16.msra.mxu1 %v9412_v38  ;;  %v1253_v38 = vld [vmem:[#allocation10 + $0x13d0] sm:$0xff] }
 0x54d   :  { %7968 = vmatpush1.bf16.msra.mxu0 %v9414_v39  ;;  %7641 = vmatprep.subr.bf16.mxu1 %v9421_v41  ;;  %v1257_v39 = vld [vmem:[#allocation10 + $0x13f0] sm:$0xff]  ;;  %v1254_v41 = vld [vmem:[#allocation10 + $0x13d8] sm:$0xff] }
 0x54e   :  { %7969 = vmatprep.subr.bf16.mxu0 %v9423_v42  ;;  %v1258_v42 = vld [vmem:[#allocation10 + $0x13f8] sm:$0xff]  ;;  %v9477_v35 = vcombine.high %v1253_v38, %v1257_v39  ;;  %v9476_v54 = vcombine.low %v1253_v38, %v1257_v39  ;;  %v1305_v32 = vld [vmem:[#allocation10 + $0x1570] sm:$0xff] }
 0x54f   :  { %v9479_v21 = vcombine.high %v1254_v41, %v1258_v42  ;;  %v9478_v37 = vcombine.low %v1254_v41, %v1258_v42  ;;  %v9525_v38 = vcombine.high %v1301_v29, %v1305_v32  ;;  %v1309_v41 = vld [vmem:[#allocation10 + $0x1590] sm:$0xff] }
 0x550   :  { %7642 = vmatpush1.bf16.msra.mxu1 %v9420_v58  ;;  %v1261_v58 = vld [vmem:[#allocation10 + $0x1410] sm:$0xff] }
 0x551   :  { %7970 = vmatpush1.bf16.msra.mxu0 %v9422_v49  ;;  %7643 = vmatprep.subr.bf16.mxu1 %v9429_v51  ;;  %v1265_v49 = vld [vmem:[#allocation10 + $0x1430] sm:$0xff]  ;;  %v1262_v51 = vld [vmem:[#allocation10 + $0x1418] sm:$0xff] }
 0x552   :  { %7971 = vmatprep.subr.bf16.mxu0 %v9431_v52  ;;  %v1266_v52 = vld [vmem:[#allocation10 + $0x1438] sm:$0xff]  ;;  %v9485_v55 = vcombine.high %v1261_v58, %v1265_v49  ;;  %v1313_v42 = vld [vmem:[#allocation10 + $0x15b0] sm:$0xff] }
 0x553   :  { %v9487_v47 = vcombine.high %v1262_v51, %v1266_v52  ;;  %v9486_v18 = vcombine.low %v1262_v51, %v1266_v52  ;;  %v1317_v51 = vld [vmem:[#allocation10 + $0x15d0] sm:$0xff] }
 0x554   :  { %7644 = vmatpush1.bf16.msra.mxu1 %v9428_v57  ;;  %v1269_v57 = vld [vmem:[#allocation10 + $0x1450] sm:$0xff] }
 0x555   :  { %7972 = vmatpush1.bf16.msra.mxu0 %v9430_v56  ;;  %7645 = vmatprep.subr.bf16.mxu1 %v9437_v12  ;;  %v1273_v56 = vld [vmem:[#allocation10 + $0x1470] sm:$0xff]  ;;  %v9484_v12 = vcombine.low %v1261_v58, %v1265_v49  ;;  %v9533_v58 = vcombine.high %v1309_v41, %v1313_v42 }
 0x556   :  { %7973 = vmatprep.subr.bf16.mxu0 %v9439_v59  ;;  %v1270_v59 = vld [vmem:[#allocation10 + $0x1458] sm:$0xff]  ;;  %v9493_v61 = vcombine.high %v1269_v57, %v1273_v56  ;;  %v9492_v5 = vcombine.low %v1269_v57, %v1273_v56  ;;  %v1321_v52 = vld [vmem:[#allocation10 + $0x15f0] sm:$0xff] }
 0x557   :  { %v9494_v7 = vcombine.low %v1270_v59, %v1274_v43  ;;  %v9541_v57 = vcombine.high %v1317_v51, %v1321_v52 }
 0x558   :  { %7646 = vmatpush1.bf16.msra.mxu1 %v9436_v63  ;;  %v1281_v63 = vld [vmem:[#allocation10 + $0x14b0] sm:$0xff] }
 0x559   :  { %7974 = vmatpush1.bf16.msra.mxu0 %v9438_v1  ;;  %7647 = vmatprep.subr.bf16.mxu1 %v9445_v2  ;;  %v9495_v1 = vcombine.high %v1270_v59, %v1274_v43  ;;  %v1278_v2 = vld [vmem:[#allocation10 + $0x1498] sm:$0xff]  ;;  %v9501_v8 = vcombine.high %v1277_v62, %v1281_v63  ;;  %v9500_v31 = vcombine.low %v1277_v62, %v1281_v63  ;;  %v1329_v59 = vld [vmem:[#allocation10 + $0x1630] sm:$0xff] }
 0x55a   :  { %7975 = vmatprep.subr.bf16.mxu0 %v9447_v3  ;;  %v1282_v3 = vld [vmem:[#allocation10 + $0x14b8] sm:$0xff] }
 0x55b   :  { %v9503_v9 = vcombine.high %v1278_v2, %v1282_v3  ;;  %v1326_v43 = vld [vmem:[#allocation10 + $0x1618] sm:$0xff] }
 0x55c   :  { %7648 = vmatpush1.bf16.msra.mxu1 %v9444_v15  ;;  %v1285_v15 = vld [vmem:[#allocation10 + $0x14d0] sm:$0xff] }
 0x55d   :  { %7976 = vmatpush1.bf16.msra.mxu0 %v9446_v6  ;;  %7649 = vmatprep.subr.bf16.mxu1 %v9453_v22  ;;  %v1289_v6 = vld [vmem:[#allocation10 + $0x14f0] sm:$0xff]  ;;  %v1286_v22 = vld [vmem:[#allocation10 + $0x14d8] sm:$0xff] }
 0x55e   :  { %7977 = vmatprep.subr.bf16.mxu0 %v9455_v19  ;;  %v1290_v19 = vld [vmem:[#allocation10 + $0x14f8] sm:$0xff]  ;;  %v9509_v20 = vcombine.high %v1285_v15, %v1289_v6 }
 0x55f   :  { %v9511_v26 = vcombine.high %v1286_v22, %v1290_v19 }
 0x560   :  { %7650 = vmatpush1.bf16.msra.mxu1 %v9452_v13  ;;  %v1297_v13 = vld [vmem:[#allocation10 + $0x1530] sm:$0xff] }
 0x561   :  { %7978 = vmatpush1.bf16.msra.mxu0 %v9454_v25  ;;  %7651 = vmatprep.subr.bf16.mxu1 %v9461_v24  ;;  %v1294_v25 = vld [vmem:[#allocation10 + $0x1518] sm:$0xff]  ;;  %v9517_v28 = vcombine.high %v1293_v23, %v1297_v13 }
 0x562   :  { %7979 = vmatprep.subr.bf16.mxu0 %v9463_v27  ;;  %v1298_v24 = vld [vmem:[#allocation10 + $0x1538] sm:$0xff]  ;;  %v9510_v27 = vcombine.low %v1286_v22, %v1290_v19  ;;  %v1341_v22 = vld [vmem:[#allocation10 + $0x1690] sm:$0xff] }
 0x563   :  { %v9519_v0 = vcombine.high %v1294_v25, %v1298_v24  ;;  %v1345_v19 = vld [vmem:[#allocation10 + $0x16b0] sm:$0xff] }
 0x564   :  { %7652 = vmatpush1.bf16.msra.mxu1 %v9460_v34  ;;  %v1302_v34 = vld [vmem:[#allocation10 + $0x1558] sm:$0xff] }
 0x565   :  { %7980 = vmatpush1.bf16.msra.mxu0 %v9462_v30  ;;  %7653 = vmatprep.subr.bf16.mxu1 %v9469_v33  ;;  %v1306_v30 = vld [vmem:[#allocation10 + $0x1578] sm:$0xff]  ;;  %v9516_v33 = vcombine.low %v1293_v23, %v1297_v13  ;;  %v9565_v23 = vcombine.high %v1341_v22, %v1345_v19 }
 0x566   :  { %7981 = vmatprep.subr.bf16.mxu0 %v9471_v36  ;;  %v9518_v36 = vcombine.low %v1294_v25, %v1298_v24  ;;  %v9527_v39 = vcombine.high %v1302_v34, %v1306_v30  ;;  %v1349_v25 = vld [vmem:[#allocation10 + $0x16d0] sm:$0xff] }
 0x567   :  { %v1353_v24 = vld [vmem:[#allocation10 + $0x16f0] sm:$0xff] }
 0x568   :  { %7654 = vmatpush1.bf16.msra.mxu1 %v9468_v44  ;;  %v1310_v44 = vld [vmem:[#allocation10 + $0x1598] sm:$0xff] }
 0x569   :  { %7982 = vmatpush1.bf16.msra.mxu0 %v9470_v60  ;;  %7655 = vmatprep.subr.bf16.mxu1 %v9477_v35  ;;  %v1314_v60 = vld [vmem:[#allocation10 + $0x15b8] sm:$0xff]  ;;  %v9524_v35 = vcombine.low %v1301_v29, %v1305_v32  ;;  %v9573_v29 = vcombine.high %v1349_v25, %v1353_v24 }
 0x56a   :  { %7983 = vmatprep.subr.bf16.mxu0 %v9479_v21  ;;  %v9526_v21 = vcombine.low %v1302_v34, %v1306_v30  ;;  %v9535_v49 = vcombine.high %v1310_v44, %v1314_v60  ;;  %v1357_v34 = vld [vmem:[#allocation10 + $0x1710] sm:$0xff] }
 0x56b   :  { %v1361_v30 = vld [vmem:[#allocation10 + $0x1730] sm:$0xff] }
 0x56c   :  { %7656 = vmatpush1.bf16.msra.mxu1 %v9476_v54  ;;  %v1318_v54 = vld [vmem:[#allocation10 + $0x15d8] sm:$0xff] }
 0x56d   :  { %7984 = vmatpush1.bf16.msra.mxu0 %v9478_v37  ;;  %7666 = vmatprep.subr.bf16.mxu1 %v9485_v55  ;;  %v1322_v37 = vld [vmem:[#allocation10 + $0x15f8] sm:$0xff]  ;;  %v9532_v55 = vcombine.low %v1309_v41, %v1313_v42  ;;  %v9581_v41 = vcombine.high %v1357_v34, %v1361_v30 }
 0x56e   :  { %7994 = vmatprep.subr.bf16.mxu0 %v9487_v47  ;;  %v9534_v47 = vcombine.low %v1310_v44, %v1314_v60  ;;  %v9543_v56 = vcombine.high %v1318_v54, %v1322_v37  ;;  %v9542_v62 = vcombine.low %v1318_v54, %v1322_v37  ;;  %v1365_v44 = vld [vmem:[#allocation10 + $0x1750] sm:$0xff] }
 0x56f   :  { %7658 = vmatmul.mubr.bf16.vlgmr.msra.gmra.mrb[12].mxu1 %v10934_v4  ;;  %v1369_v60 = vld [vmem:[#allocation10 + $0x1770] sm:$0xff] }
 0x570   :  { %7986 = vmatmul.mubr.bf16.vlgmr.msra.gmra.mrb[16].mxu0 %v10934_v4  ;;  %7667 = vmatpush1.bf16.msra.mxu1 %v9484_v12  ;;  %v9502_v4 = vcombine.low %v1278_v2, %v1282_v3  ;;  %v1325_v12 = vld [vmem:[#allocation10 + $0x1610] sm:$0xff] }
 0x571   :  { %7698 = vmatprep.mubr.bf16.mxu1 %v10937_v14  ;;  %7995 = vmatpush1.bf16.msra.mxu0 %v9486_v18  ;;  %v1330_v18 = vld [vmem:[#allocation10 + $0x1638] sm:$0xff]  ;;  %v9549_v63 = vcombine.high %v1325_v12, %v1329_v59  ;;  %v1333_v2 = vld [vmem:[#allocation10 + $0x1650] sm:$0xff] }
 0x572   :  { %8026 = vmatprep.mubr.bf16.mxu0 %v10937_v14  ;;  %7668 = vmatprep.subr.bf16.mxu1 %v9493_v61  ;;  %v9508_v14 = vcombine.low %v1285_v15, %v1289_v6  ;;  %v9540_v61 = vcombine.low %v1317_v51, %v1321_v52  ;;  %v1337_v3 = vld [vmem:[#allocation10 + $0x1670] sm:$0xff]  ;;  %v9589_v51 = vcombine.high %v1365_v44, %v1369_v60 }
 0x573   :  { %7996 = vmatprep.subr.bf16.mxu0 %v9495_v1  ;;  %v9551_v1 = vcombine.high %v1326_v43, %v1330_v18  ;;  %v9557_v15 = vcombine.high %v1333_v2, %v1337_v3  ;;  %v1373_v54 = vld [vmem:[#allocation10 + $0x1790] sm:$0xff] }
 0x574   :  { %7669 = vmatpush1.bf16.msra.mxu1 %v9492_v5  ;;  %v1334_v5 = vld [vmem:[#allocation10 + $0x1658] sm:$0xff]  ;;  %v1377_v37 = vld [vmem:[#allocation10 + $0x17b0] sm:$0xff] }
 0x575   :  { %7997 = vmatpush1.bf16.msra.mxu0 %v9494_v7  ;;  %7670 = vmatprep.subr.bf16.mxu1 %v9501_v8  ;;  %v1338_v7 = vld [vmem:[#allocation10 + $0x1678] sm:$0xff]  ;;  %v9548_v8 = vcombine.low %v1325_v12, %v1329_v59  ;;  %v9597_v12 = vcombine.high %v1373_v54, %v1377_v37 }
 0x576   :  { %7998 = vmatprep.subr.bf16.mxu0 %v9503_v9  ;;  %v9550_v9 = vcombine.low %v1326_v43, %v1330_v18  ;;  %v9559_v6 = vcombine.high %v1334_v5, %v1338_v7  ;;  %v1381_v43 = vld [vmem:[#allocation10 + $0x17d0] sm:$0xff] }
 0x577   :  { %v1385_v18 = vld [vmem:[#allocation10 + $0x17f0] sm:$0xff] }
 0x578   :  { %7671 = vmatpush1.bf16.msra.mxu1 %v9500_v31  ;;  %v1342_v31 = vld [vmem:[#allocation10 + $0x1698] sm:$0xff] }
 0x579   :  { %7999 = vmatpush1.bf16.msra.mxu0 %v9502_v4  ;;  %7672 = vmatprep.subr.bf16.mxu1 %v9509_v20  ;;  %v1346_v4 = vld [vmem:[#allocation10 + $0x16b8] sm:$0xff]  ;;  %v9556_v20 = vcombine.low %v1333_v2, %v1337_v3  ;;  %v9605_v2 = vcombine.high %v1381_v43, %v1385_v18 }
 0x57a   :  { %8000 = vmatprep.subr.bf16.mxu0 %v9511_v26  ;;  %v9558_v26 = vcombine.low %v1334_v5, %v1338_v7  ;;  %v9567_v13 = vcombine.high %v1342_v31, %v1346_v4  ;;  %v1389_v5 = vld [vmem:[#allocation10 + $0x1810] sm:$0xff] }
 0x57b   :  { %v1393_v7 = vld [vmem:[#allocation10 + $0x1830] sm:$0xff] }
 0x57c   :  { %7673 = vmatpush1.bf16.msra.mxu1 %v9508_v14  ;;  %v1350_v14 = vld [vmem:[#allocation10 + $0x16d8] sm:$0xff] }
 0x57d   :  { %8001 = vmatpush1.bf16.msra.mxu0 %v9510_v27  ;;  %7674 = vmatprep.subr.bf16.mxu1 %v9517_v28  ;;  %v1354_v27 = vld [vmem:[#allocation10 + $0x16f8] sm:$0xff]  ;;  %v9564_v28 = vcombine.low %v1341_v22, %v1345_v19  ;;  %v9613_v22 = vcombine.high %v1389_v5, %v1393_v7 }
 0x57e   :  { %8002 = vmatprep.subr.bf16.mxu0 %v9519_v0  ;;  %v9566_v0 = vcombine.low %v1342_v31, %v1346_v4  ;;  %v9575_v32 = vcombine.high %v1350_v14, %v1354_v27  ;;  %v1397_v31 = vld [vmem:[#allocation10 + $0x1850] sm:$0xff] }
 0x57f   :  { %v1401_v4 = vld [vmem:[#allocation10 + $0x1870] sm:$0xff] }
 0x580   :  { %7675 = vmatpush1.bf16.msra.mxu1 %v9516_v33  ;;  %v1358_v33 = vld [vmem:[#allocation10 + $0x1718] sm:$0xff] }
 0x581   :  { %8003 = vmatpush1.bf16.msra.mxu0 %v9518_v36  ;;  %7676 = vmatprep.subr.bf16.mxu1 %v9525_v38  ;;  %v1362_v36 = vld [vmem:[#allocation10 + $0x1738] sm:$0xff]  ;;  %v9572_v38 = vcombine.low %v1349_v25, %v1353_v24  ;;  %v9621_v25 = vcombine.high %v1397_v31, %v1401_v4  ;;  %v1405_v24 = vld [vmem:[#allocation10 + $0x1890] sm:$0xff] }
 0x582   :  { %8004 = vmatprep.subr.bf16.mxu0 %v9527_v39  ;;  %v9574_v39 = vcombine.low %v1350_v14, %v1354_v27  ;;  %v9583_v42 = vcombine.high %v1358_v33, %v1362_v36  ;;  %v1409_v14 = vld [vmem:[#allocation10 + $0x18b0] sm:$0xff] }
 0x584   :  { %7677 = vmatpush1.bf16.msra.mxu1 %v9524_v35  ;;  %v1366_v35 = vld [vmem:[#allocation10 + $0x1758] sm:$0xff] }
 0x585   :  { %8005 = vmatpush1.bf16.msra.mxu0 %v9526_v21  ;;  %7678 = vmatprep.subr.bf16.mxu1 %v9533_v58  ;;  %v1370_v21 = vld [vmem:[#allocation10 + $0x1778] sm:$0xff]  ;;  %v9580_v58 = vcombine.low %v1357_v34, %v1361_v30  ;;  %v9629_v34 = vcombine.high %v1405_v24, %v1409_v14 }
 0x586   :  { %8006 = vmatprep.subr.bf16.mxu0 %v9535_v49  ;;  %v9582_v49 = vcombine.low %v1358_v33, %v1362_v36  ;;  %v9591_v52 = vcombine.high %v1366_v35, %v1370_v21  ;;  %v1413_v33 = vld [vmem:[#allocation10 + $0x18d0] sm:$0xff] }
 0x587   :  { %v1417_v36 = vld [vmem:[#allocation10 + $0x18f0] sm:$0xff] }
 0x588   :  { %7679 = vmatpush1.bf16.msra.mxu1 %v9532_v55  ;;  %v1374_v55 = vld [vmem:[#allocation10 + $0x1798] sm:$0xff] }
 0x589   :  { %8007 = vmatpush1.bf16.msra.mxu0 %v9534_v47  ;;  %7680 = vmatprep.subr.bf16.mxu1 %v9541_v57  ;;  %v1378_v47 = vld [vmem:[#allocation10 + $0x17b8] sm:$0xff]  ;;  %v9588_v57 = vcombine.low %v1365_v44, %v1369_v60  ;;  %v1421_v60 = vld [vmem:[#allocation10 + $0x1910] sm:$0xff] }
 0x58a   :  { %8008 = vmatprep.subr.bf16.mxu0 %v9543_v56  ;;  %v9590_v56 = vcombine.low %v1366_v35, %v1370_v21  ;;  %v9599_v59 = vcombine.high %v1374_v55, %v1378_v47  ;;  %v1425_v35 = vld [vmem:[#allocation10 + $0x1930] sm:$0xff]  ;;  %v1422_v21 = vld [vmem:[#allocation10 + $0x1918] sm:$0xff] }
 0x58c   :  { %7681 = vmatpush1.bf16.msra.mxu1 %v9540_v61  ;;  %v1382_v61 = vld [vmem:[#allocation10 + $0x17d8] sm:$0xff] }
 0x58d   :  { %8009 = vmatpush1.bf16.msra.mxu0 %v9542_v62  ;;  %7682 = vmatprep.subr.bf16.mxu1 %v9549_v63  ;;  %v1386_v62 = vld [vmem:[#allocation10 + $0x17f8] sm:$0xff]  ;;  %v9596_v63 = vcombine.low %v1373_v54, %v1377_v37  ;;  %v1429_v54 = vld [vmem:[#allocation10 + $0x1950] sm:$0xff] }
 0x58e   :  { %8010 = vmatprep.subr.bf16.mxu0 %v9551_v1  ;;  %v9598_v1 = vcombine.low %v1374_v55, %v1378_v47  ;;  %v9607_v3 = vcombine.high %v1382_v61, %v1386_v62  ;;  %v1433_v37 = vld [vmem:[#allocation10 + $0x1970] sm:$0xff]  ;;  %v1430_v55 = vld [vmem:[#allocation10 + $0x1958] sm:$0xff] }
 0x58f   :  { %v1434_v47 = vld [vmem:[#allocation10 + $0x1978] sm:$0xff] }
 0x590   :  { %7683 = vmatpush1.bf16.msra.mxu1 %v9548_v8  ;;  %v1390_v8 = vld [vmem:[#allocation10 + $0x1818] sm:$0xff] }
 0x591   :  { %8011 = vmatpush1.bf16.msra.mxu0 %v9550_v9  ;;  %7684 = vmatprep.subr.bf16.mxu1 %v9557_v15  ;;  %v1394_v9 = vld [vmem:[#allocation10 + $0x1838] sm:$0xff]  ;;  %v9604_v15 = vcombine.low %v1381_v43, %v1385_v18  ;;  %v1437_v43 = vld [vmem:[#allocation10 + $0x1990] sm:$0xff] }
 0x592   :  { %8012 = vmatprep.subr.bf16.mxu0 %v9559_v6  ;;  %v9606_v6 = vcombine.low %v1382_v61, %v1386_v62  ;;  %v9615_v19 = vcombine.high %v1390_v8, %v1394_v9  ;;  %v1441_v18 = vld [vmem:[#allocation10 + $0x19b0] sm:$0xff]  ;;  %v1438_v61 = vld [vmem:[#allocation10 + $0x1998] sm:$0xff] }
 0x593   :  { %v1442_v62 = vld [vmem:[#allocation10 + $0x19b8] sm:$0xff] }
 0x594   :  { %7685 = vmatpush1.bf16.msra.mxu1 %v9556_v20  ;;  %v9612_v20 = vcombine.low %v1389_v5, %v1393_v7  ;;  %v1445_v5 = vld [vmem:[#allocation10 + $0x19d0] sm:$0xff] }
 0x595   :  { %8013 = vmatpush1.bf16.msra.mxu0 %v9558_v26  ;;  %7686 = vmatprep.subr.bf16.mxu1 %v9565_v23  ;;  %v1398_v26 = vld [vmem:[#allocation10 + $0x1858] sm:$0xff]  ;;  %v1449_v7 = vld [vmem:[#allocation10 + $0x19f0] sm:$0xff] }
 0x596   :  { %8014 = vmatprep.subr.bf16.mxu0 %v9567_v13  ;;  %v1402_v23 = vld [vmem:[#allocation10 + $0x1878] sm:$0xff]  ;;  %v9614_v13 = vcombine.low %v1390_v8, %v1394_v9 }
 0x597   :  { %v9623_v27 = vcombine.high %v1398_v26, %v1402_v23  ;;  %v1446_v8 = vld [vmem:[#allocation10 + $0x19d8] sm:$0xff] }
 0x598   :  { %7687 = vmatpush1.bf16.msra.mxu1 %v9564_v28  ;;  %v1406_v28 = vld [vmem:[#allocation10 + $0x1898] sm:$0xff] }
 0x599   :  { %8015 = vmatpush1.bf16.msra.mxu0 %v9566_v0  ;;  %7688 = vmatprep.subr.bf16.mxu1 %v9573_v29  ;;  %v1410_v0 = vld [vmem:[#allocation10 + $0x18b8] sm:$0xff]  ;;  %v9620_v29 = vcombine.low %v1397_v31, %v1401_v4  ;;  %v1453_v31 = vld [vmem:[#allocation10 + $0x1a10] sm:$0xff] }
 0x59a   :  { %8016 = vmatprep.subr.bf16.mxu0 %v9575_v32  ;;  %v9622_v32 = vcombine.low %v1398_v26, %v1402_v23  ;;  %v9631_v30 = vcombine.high %v1406_v28, %v1410_v0  ;;  %v1450_v9 = vld [vmem:[#allocation10 + $0x19f8] sm:$0xff]  ;;  %v1457_v4 = vld [vmem:[#allocation10 + $0x1a30] sm:$0xff]  ;;  %v9668_v23 = vcombine.low %v1445_v5, %v1449_v7 }
 0x59b   :  { %v1458_v26 = vld [vmem:[#allocation10 + $0x1a38] sm:$0xff] }
 0x59c   :  { %7689 = vmatpush1.bf16.msra.mxu1 %v9572_v38  ;;  %v1414_v38 = vld [vmem:[#allocation10 + $0x18d8] sm:$0xff] }
 0x59d   :  { %8017 = vmatpush1.bf16.msra.mxu0 %v9574_v39  ;;  %7690 = vmatprep.subr.bf16.mxu1 %v9581_v41  ;;  %v1418_v39 = vld [vmem:[#allocation10 + $0x18f8] sm:$0xff]  ;;  %v9628_v41 = vcombine.low %v1405_v24, %v1409_v14  ;;  %v1461_v14 = vld [vmem:[#allocation10 + $0x1a50] sm:$0xff] }
 0x59e   :  { %8018 = vmatprep.subr.bf16.mxu0 %v9583_v42  ;;  %v9637_v42 = vcombine.high %v1413_v33, %v1417_v36  ;;  %v9639_v44 = vcombine.high %v1414_v38, %v1418_v39 }
 0x5a0   :  { %7691 = vmatpush1.bf16.msra.mxu1 %v9580_v58  ;;  %v1426_v58 = vld [vmem:[#allocation10 + $0x1938] sm:$0xff] }
 0x5a1   :  { %8019 = vmatpush1.bf16.msra.mxu0 %v9582_v49  ;;  %7692 = vmatprep.subr.bf16.mxu1 %v9589_v51  ;;  %v9638_v49 = vcombine.low %v1414_v38, %v1418_v39  ;;  %v9645_v51 = vcombine.high %v1421_v60, %v1425_v35  ;;  %v1470_v38 = vld [vmem:[#allocation10 + $0x1a98] sm:$0xff] }
 0x5a2   :  { %8020 = vmatprep.subr.bf16.mxu0 %v9591_v52  ;;  %v9647_v52 = vcombine.high %v1422_v21, %v1426_v58  ;;  %v1474_v39 = vld [vmem:[#allocation10 + $0x1ab8] sm:$0xff] }
 0x5a4   :  { %7693 = vmatpush1.bf16.msra.mxu1 %v9588_v57  ;;  %v9644_v57 = vcombine.low %v1421_v60, %v1425_v35  ;;  %v1477_v60 = vld [vmem:[#allocation10 + $0x1ad0] sm:$0xff] }
 0x5a5   :  { %8021 = vmatpush1.bf16.msra.mxu0 %v9590_v56  ;;  %7694 = vmatprep.subr.bf16.mxu1 %v9597_v12  ;;  %v9646_v56 = vcombine.low %v1422_v21, %v1426_v58  ;;  %v9653_v12 = vcombine.high %v1429_v54, %v1433_v37  ;;  %v1481_v35 = vld [vmem:[#allocation10 + $0x1af0] sm:$0xff]  ;;  %v1478_v21 = vld [vmem:[#allocation10 + $0x1ad8] sm:$0xff] }
 0x5a6   :  { %8022 = vmatprep.subr.bf16.mxu0 %v9599_v59  ;;  %v9655_v59 = vcombine.high %v1430_v55, %v1434_v47  ;;  %v1482_v58 = vld [vmem:[#allocation10 + $0x1af8] sm:$0xff] }
 0x5a8   :  { %7695 = vmatpush1.bf16.msra.mxu1 %v9596_v63  ;;  %v9652_v63 = vcombine.low %v1429_v54, %v1433_v37  ;;  %v1485_v54 = vld [vmem:[#allocation10 + $0x1b10] sm:$0xff] }
 0x5a9   :  { %8023 = vmatpush1.bf16.msra.mxu0 %v9598_v1  ;;  %7696 = vmatprep.subr.bf16.mxu1 %v9605_v2  ;;  %v9654_v1 = vcombine.low %v1430_v55, %v1434_v47  ;;  %v9661_v2 = vcombine.high %v1437_v43, %v1441_v18  ;;  %v1489_v37 = vld [vmem:[#allocation10 + $0x1b30] sm:$0xff]  ;;  %v1486_v55 = vld [vmem:[#allocation10 + $0x1b18] sm:$0xff] }
 0x5aa   :  { %8024 = vmatprep.subr.bf16.mxu0 %v9607_v3  ;;  %v9663_v3 = vcombine.high %v1438_v61, %v1442_v62  ;;  %v1490_v47 = vld [vmem:[#allocation10 + $0x1b38] sm:$0xff] }
 0x5ac   :  { %7697 = vmatpush1.bf16.msra.mxu1 %v9604_v15  ;;  %v9660_v15 = vcombine.low %v1437_v43, %v1441_v18  ;;  %v1493_v43 = vld [vmem:[#allocation10 + $0x1b50] sm:$0xff] }
 0x5ad   :  { %8025 = vmatpush1.bf16.msra.mxu0 %v9606_v6  ;;  %7707 = vmatprep.subr.bf16.mxu1 %v9613_v22  ;;  %v9662_v6 = vcombine.low %v1438_v61, %v1442_v62  ;;  %v9669_v22 = vcombine.high %v1445_v5, %v1449_v7  ;;  %v1497_v18 = vld [vmem:[#allocation10 + $0x1b70] sm:$0xff]  ;;  %v1494_v61 = vld [vmem:[#allocation10 + $0x1b58] sm:$0xff] }
 0x5ae   :  { %8035 = vmatprep.subr.bf16.mxu0 %v9615_v19  ;;  %v9671_v19 = vcombine.high %v1446_v8, %v1450_v9  ;;  %v1498_v62 = vld [vmem:[#allocation10 + $0x1b78] sm:$0xff]  ;;  %v1501_v5 = vld [vmem:[#allocation10 + $0x1b90] sm:$0xff] }
 0x5af   :  { %7699 = vmatmul.mubr.bf16.vlgmr.msra.gmra.mrb[12].mxu1 %v10952_v48  ;;  %v1505_v7 = vld [vmem:[#allocation10 + $0x1bb0] sm:$0xff] }
 0x5b0   :  { %8027 = vmatmul.mubr.bf16.vlgmr.msra.gmra.mrb[16].mxu0 %v10952_v48  ;;  %7708 = vmatpush1.bf16.msra.mxu1 %v9612_v20  ;;  %v9630_v48 = vcombine.low %v1406_v28, %v1410_v0  ;;  %v1454_v20 = vld [vmem:[#allocation10 + $0x1a18] sm:$0xff] }
 0x5b1   :  { %7739 = vmatprep.mubr.bf16.mxu1 %v10955_v53  ;;  %8036 = vmatpush1.bf16.msra.mxu0 %v9614_v13  ;;  %v9670_v13 = vcombine.low %v1446_v8, %v1450_v9  ;;  %v9679_v24 = vcombine.high %v1454_v20, %v1458_v26  ;;  %v1462_v28 = vld [vmem:[#allocation10 + $0x1a58] sm:$0xff] }
 0x5b2   :  { %8067 = vmatprep.mubr.bf16.mxu0 %v10955_v53  ;;  %7709 = vmatprep.subr.bf16.mxu1 %v9621_v25  ;;  %v9636_v53 = vcombine.low %v1413_v33, %v1417_v36  ;;  %v9677_v25 = vcombine.high %v1453_v31, %v1457_v4  ;;  %v1466_v0 = vld [vmem:[#allocation10 + $0x1a78] sm:$0xff]  ;;  %v1469_v33 = vld [vmem:[#allocation10 + $0x1a90] sm:$0xff] }
 0x5b3   :  { %8037 = vmatprep.subr.bf16.mxu0 %v9623_v27  ;;  %v1465_v27 = vld [vmem:[#allocation10 + $0x1a70] sm:$0xff]  ;;  %v1502_v8 = vld [vmem:[#allocation10 + $0x1b98] sm:$0xff] }
 0x5b4   :  { %7710 = vmatpush1.bf16.msra.mxu1 %v9620_v29  ;;  %v9676_v29 = vcombine.low %v1453_v31, %v1457_v4  ;;  %v1473_v36 = vld [vmem:[#allocation10 + $0x1ab0] sm:$0xff]  ;;  %v1506_v9 = vld [vmem:[#allocation10 + $0x1bb8] sm:$0xff] }
 0x5b5   :  { %8038 = vmatpush1.bf16.msra.mxu0 %v9622_v32  ;;  %7711 = vmatprep.subr.bf16.mxu1 %v9629_v34  ;;  %v9678_v32 = vcombine.low %v1454_v20, %v1458_v26  ;;  %v9685_v34 = vcombine.high %v1461_v14, %v1465_v27  ;;  %v1509_v31 = vld [vmem:[#allocation10 + $0x1bd0] sm:$0xff]  ;;  %v1510_v20 = vld [vmem:[#allocation10 + $0x1bd8] sm:$0xff] }
 0x5b6   :  { %8039 = vmatprep.subr.bf16.mxu0 %v9631_v30  ;;  %v9687_v30 = vcombine.high %v1462_v28, %v1466_v0  ;;  %v1513_v4 = vld [vmem:[#allocation10 + $0x1bf0] sm:$0xff]  ;;  %v1514_v26 = vld [vmem:[#allocation10 + $0x1bf8] sm:$0xff] }
 0x5b8   :  { %7712 = vmatpush1.bf16.msra.mxu1 %v9628_v41  ;;  %v9684_v41 = vcombine.low %v1461_v14, %v1465_v27  ;;  %v1517_v14 = vld [vmem:[#allocation10 + $0x1c10] sm:$0xff] }
 0x5b9   :  { %8040 = vmatpush1.bf16.msra.mxu0 %v9630_v48  ;;  %7713 = vmatprep.subr.bf16.mxu1 %v9637_v42  ;;  %v9686_v48 = vcombine.low %v1462_v28, %v1466_v0  ;;  %v9693_v42 = vcombine.high %v1469_v33, %v1473_v36  ;;  %v1521_v27 = vld [vmem:[#allocation10 + $0x1c30] sm:$0xff]  ;;  %v1518_v28 = vld [vmem:[#allocation10 + $0x1c18] sm:$0xff] }
 0x5ba   :  { %8041 = vmatprep.subr.bf16.mxu0 %v9639_v44  ;;  %v9695_v44 = vcombine.high %v1470_v38, %v1474_v39  ;;  %v1522_v0 = vld [vmem:[#allocation10 + $0x1c38] sm:$0xff] }
 0x5bc   :  { %7714 = vmatpush1.bf16.msra.mxu1 %v9636_v53  ;;  %v9692_v53 = vcombine.low %v1469_v33, %v1473_v36  ;;  %v1525_v33 = vld [vmem:[#allocation10 + $0x1c50] sm:$0xff] }
 0x5bd   :  { %8042 = vmatpush1.bf16.msra.mxu0 %v9638_v49  ;;  %7715 = vmatprep.subr.bf16.mxu1 %v9645_v51  ;;  %v9694_v49 = vcombine.low %v1470_v38, %v1474_v39  ;;  %v9701_v51 = vcombine.high %v1477_v60, %v1481_v35  ;;  %v1529_v36 = vld [vmem:[#allocation10 + $0x1c70] sm:$0xff]  ;;  %v9740_v38 = vcombine.low %v1517_v14, %v1521_v27  ;;  %v1526_v39 = vld [vmem:[#allocation10 + $0x1c58] sm:$0xff] }
 0x5be   :  { %8043 = vmatprep.subr.bf16.mxu0 %v9647_v52  ;;  %v9703_v52 = vcombine.high %v1478_v21, %v1482_v58 }
 0x5c0   :  { %7716 = vmatpush1.bf16.msra.mxu1 %v9644_v57  ;;  %v9700_v57 = vcombine.low %v1477_v60, %v1481_v35  ;;  %v1537_v60 = vld [vmem:[#allocation10 + $0x1cb0] sm:$0xff] }
 0x5c1   :  { %8044 = vmatpush1.bf16.msra.mxu0 %v9646_v56  ;;  %7717 = vmatprep.subr.bf16.mxu1 %v9653_v12  ;;  %v9702_v56 = vcombine.low %v1478_v21, %v1482_v58  ;;  %v9709_v12 = vcombine.high %v1485_v54, %v1489_v37  ;;  %v1534_v21 = vld [vmem:[#allocation10 + $0x1c98] sm:$0xff] }
 0x5c2   :  { %8045 = vmatprep.subr.bf16.mxu0 %v9655_v59  ;;  %v9711_v59 = vcombine.high %v1486_v55, %v1490_v47  ;;  %v1538_v58 = vld [vmem:[#allocation10 + $0x1cb8] sm:$0xff] }
 0x5c4   :  { %7718 = vmatpush1.bf16.msra.mxu1 %v9652_v63  ;;  %v9708_v63 = vcombine.low %v1485_v54, %v1489_v37  ;;  %v1541_v54 = vld [vmem:[#allocation10 + $0x1cd0] sm:$0xff] }
 0x5c5   :  { %8046 = vmatpush1.bf16.msra.mxu0 %v9654_v1  ;;  %7719 = vmatprep.subr.bf16.mxu1 %v9661_v2  ;;  %v9710_v1 = vcombine.low %v1486_v55, %v1490_v47  ;;  %v9717_v2 = vcombine.high %v1493_v43, %v1497_v18  ;;  %v1545_v37 = vld [vmem:[#allocation10 + $0x1cf0] sm:$0xff]  ;;  %v1542_v55 = vld [vmem:[#allocation10 + $0x1cd8] sm:$0xff] }
 0x5c6   :  { %8047 = vmatprep.subr.bf16.mxu0 %v9663_v3  ;;  %v9719_v3 = vcombine.high %v1494_v61, %v1498_v62  ;;  %v1546_v47 = vld [vmem:[#allocation10 + $0x1cf8] sm:$0xff] }
 0x5c8   :  { %7720 = vmatpush1.bf16.msra.mxu1 %v9660_v15  ;;  %v9716_v15 = vcombine.low %v1493_v43, %v1497_v18  ;;  %v1553_v43 = vld [vmem:[#allocation10 + $0x1d30] sm:$0xff]  ;;  %v1550_v18 = vld [vmem:[#allocation10 + $0x1d18] sm:$0xff] }
 0x5c9   :  { %8048 = vmatpush1.bf16.msra.mxu0 %v9662_v6  ;;  %7721 = vmatprep.subr.bf16.mxu1 %v9669_v22  ;;  %v9718_v6 = vcombine.low %v1494_v61, %v1498_v62  ;;  %v9725_v22 = vcombine.high %v1501_v5, %v1505_v7  ;;  %v1554_v61 = vld [vmem:[#allocation10 + $0x1d38] sm:$0xff]  ;;  %v9766_v62 = vcombine.low %v1542_v55, %v1546_v47 }
 0x5ca   :  { %8049 = vmatprep.subr.bf16.mxu0 %v9671_v19  ;;  %v9727_v19 = vcombine.high %v1502_v8, %v1506_v9 }
 0x5cc   :  { %7722 = vmatpush1.bf16.msra.mxu1 %v9668_v23  ;;  %v9724_v23 = vcombine.low %v1501_v5, %v1505_v7  ;;  %v1558_v5 = vld [vmem:[#allocation10 + $0x1d58] sm:$0xff] }
 0x5cd   :  { %8050 = vmatpush1.bf16.msra.mxu0 %v9670_v13  ;;  %7723 = vmatprep.subr.bf16.mxu1 %v9677_v25  ;;  %v9726_v13 = vcombine.low %v1502_v8, %v1506_v9  ;;  %v9733_v25 = vcombine.high %v1509_v31, %v1513_v4  ;;  %v1562_v7 = vld [vmem:[#allocation10 + $0x1d78] sm:$0xff]  ;;  %v9774_v9 = vcombine.low %v1550_v18, %v1554_v61 }
 0x5ce   :  { %8051 = vmatprep.subr.bf16.mxu0 %v9679_v24  ;;  %v9735_v24 = vcombine.high %v1510_v20, %v1514_v26 }
 0x5d0   :  { %7724 = vmatpush1.bf16.msra.mxu1 %v9676_v29  ;;  %v9732_v29 = vcombine.low %v1509_v31, %v1513_v4  ;;  %v1566_v31 = vld [vmem:[#allocation10 + $0x1d98] sm:$0xff] }
 0x5d1   :  { %8052 = vmatpush1.bf16.msra.mxu0 %v9678_v32  ;;  %7725 = vmatprep.subr.bf16.mxu1 %v9685_v34  ;;  %v9734_v32 = vcombine.low %v1510_v20, %v1514_v26  ;;  %v9741_v34 = vcombine.high %v1517_v14, %v1521_v27  ;;  %v1570_v4 = vld [vmem:[#allocation10 + $0x1db8] sm:$0xff]  ;;  %v9782_v26 = vcombine.low %v1558_v5, %v1562_v7 }
 0x5d2   :  { %8053 = vmatprep.subr.bf16.mxu0 %v9687_v30  ;;  %v9743_v30 = vcombine.high %v1518_v28, %v1522_v0  ;;  %v1574_v14 = vld [vmem:[#allocation10 + $0x1dd8] sm:$0xff] }
 0x5d3   :  { %v1578_v27 = vld [vmem:[#allocation10 + $0x1df8] sm:$0xff] }
 0x5d4   :  { %7726 = vmatpush1.bf16.msra.mxu1 %v9684_v41  ;;  %v1530_v41 = vld [vmem:[#allocation10 + $0x1c78] sm:$0xff] }
 0x5d5   :  { %8054 = vmatpush1.bf16.msra.mxu0 %v9686_v48  ;;  %7727 = vmatprep.subr.bf16.mxu1 %v9693_v42  ;;  %v9742_v48 = vcombine.low %v1518_v28, %v1522_v0  ;;  %v9749_v42 = vcombine.high %v1525_v33, %v1529_v36  ;;  %v9751_v35 = vcombine.high %v1526_v39, %v1530_v41 }
 0x5d6   :  { %8055 = vmatprep.subr.bf16.mxu0 %v9695_v44  ;;  %v1533_v44 = vld [vmem:[#allocation10 + $0x1c90] sm:$0xff]  ;;  %v9790_v0 = vcombine.low %v1566_v31, %v1570_v4 }
 0x5d8   :  { %7728 = vmatpush1.bf16.msra.mxu1 %v9692_v53  ;;  %v9748_v53 = vcombine.low %v1525_v33, %v1529_v36  ;;  %v1582_v33 = vld [vmem:[#allocation10 + $0x1e18] sm:$0xff] }
 0x5d9   :  { %8056 = vmatpush1.bf16.msra.mxu0 %v9694_v49  ;;  %7729 = vmatprep.subr.bf16.mxu1 %v9701_v51  ;;  %v9750_v49 = vcombine.low %v1526_v39, %v1530_v41  ;;  %v9757_v51 = vcombine.high %v1533_v44, %v1537_v60  ;;  %v1586_v36 = vld [vmem:[#allocation10 + $0x1e38] sm:$0xff]  ;;  %v9798_v39 = vcombine.low %v1574_v14, %v1578_v27 }
 0x5da   :  { %8057 = vmatprep.subr.bf16.mxu0 %v9703_v52  ;;  %v9759_v52 = vcombine.high %v1534_v21, %v1538_v58 }
 0x5dc   :  { %7730 = vmatpush1.bf16.msra.mxu1 %v9700_v57  ;;  %v9756_v57 = vcombine.low %v1533_v44, %v1537_v60  ;;  %v1593_v44 = vld [vmem:[#allocation10 + $0x1e70] sm:$0xff]  ;;  %v1590_v60 = vld [vmem:[#allocation10 + $0x1e58] sm:$0xff] }
 0x5dd   :  { %8058 = vmatpush1.bf16.msra.mxu0 %v9702_v56  ;;  %7731 = vmatprep.subr.bf16.mxu1 %v9709_v12  ;;  %v9765_v56 = vcombine.high %v1541_v54, %v1545_v37  ;;  %v9767_v12 = vcombine.high %v1542_v55, %v1546_v47 }
 0x5de   :  { %8059 = vmatprep.subr.bf16.mxu0 %v9711_v59  ;;  %v1549_v59 = vld [vmem:[#allocation10 + $0x1d10] sm:$0xff] }
 0x5df   :  { %v9772_v8 = vcombine.low %v1549_v59, %v1553_v43 }
 0x5e0   :  { %7732 = vmatpush1.bf16.msra.mxu1 %v9708_v63  ;;  %v9773_v63 = vcombine.high %v1549_v59, %v1553_v43  ;;  %v1606_v59 = vld [vmem:[#allocation10 + $0x1ed8] sm:$0xff] }
 0x5e1   :  { %8060 = vmatpush1.bf16.msra.mxu0 %v9710_v1  ;;  %7733 = vmatprep.subr.bf16.mxu1 %v9717_v2  ;;  %v9775_v1 = vcombine.high %v1550_v18, %v1554_v61  ;;  %v1557_v2 = vld [vmem:[#allocation10 + $0x1d50] sm:$0xff]  ;;  %v1610_v43 = vld [vmem:[#allocation10 + $0x1ef8] sm:$0xff] }
 0x5e2   :  { %8061 = vmatprep.subr.bf16.mxu0 %v9719_v3  ;;  %v1561_v3 = vld [vmem:[#allocation10 + $0x1d70] sm:$0xff] }
 0x5e3   :  { %v9780_v20 = vcombine.low %v1557_v2, %v1561_v3 }
 0x5e4   :  { %7734 = vmatpush1.bf16.msra.mxu1 %v9716_v15  ;;  %v9781_v15 = vcombine.high %v1557_v2, %v1561_v3  ;;  %v1614_v2 = vld [vmem:[#allocation10 + $0x1f18] sm:$0xff] }
 0x5e5   :  { %8062 = vmatpush1.bf16.msra.mxu0 %v9718_v6  ;;  %7735 = vmatprep.subr.bf16.mxu1 %v9725_v22  ;;  %v9783_v6 = vcombine.high %v1558_v5, %v1562_v7  ;;  %v1565_v22 = vld [vmem:[#allocation10 + $0x1d90] sm:$0xff]  ;;  %v1618_v3 = vld [vmem:[#allocation10 + $0x1f38] sm:$0xff]  ;;  %v9830_v7 = vcombine.low %v1606_v59, %v1610_v43 }
 0x5e6   :  { %8063 = vmatprep.subr.bf16.mxu0 %v9727_v19  ;;  %v1569_v19 = vld [vmem:[#allocation10 + $0x1db0] sm:$0xff] }
 0x5e7   :  { %v9788_v28 = vcombine.low %v1565_v22, %v1569_v19 }
 0x5e8   :  { %7736 = vmatpush1.bf16.msra.mxu1 %v9724_v23  ;;  %v9789_v23 = vcombine.high %v1565_v22, %v1569_v19  ;;  %v1622_v22 = vld [vmem:[#allocation10 + $0x1f58] sm:$0xff] }
 0x5e9   :  { %8064 = vmatpush1.bf16.msra.mxu0 %v9726_v13  ;;  %7737 = vmatprep.subr.bf16.mxu1 %v9733_v25  ;;  %v9791_v13 = vcombine.high %v1566_v31, %v1570_v4  ;;  %v1573_v25 = vld [vmem:[#allocation10 + $0x1dd0] sm:$0xff]  ;;  %v1626_v19 = vld [vmem:[#allocation10 + $0x1f78] sm:$0xff]  ;;  %v9838_v4 = vcombine.low %v1614_v2, %v1618_v3 }
 0x5ea   :  { %8065 = vmatprep.subr.bf16.mxu0 %v9735_v24  ;;  %v1577_v24 = vld [vmem:[#allocation10 + $0x1df0] sm:$0xff] }
 0x5ec   :  { %7738 = vmatpush1.bf16.msra.mxu1 %v9732_v29  ;;  %v9797_v29 = vcombine.high %v1573_v25, %v1577_v24 }
 0x5ed   :  { %8066 = vmatpush1.bf16.msra.mxu0 %v9734_v32  ;;  %7748 = vmatprep.subr.bf16.mxu1 %v9741_v34  ;;  %v9799_v32 = vcombine.high %v1574_v14, %v1578_v27  ;;  %v1581_v34 = vld [vmem:[#allocation10 + $0x1e10] sm:$0xff]  ;;  %v1634_v14 = vld [vmem:[#allocation10 + $0x1fb8] sm:$0xff]  ;;  %v11022_v27 = vld [vmem:[#allocation12] sm:$0xff] }
 0x5ee   :  { %8076 = vmatprep.subr.bf16.mxu0 %v9743_v30  ;;  %v1585_v30 = vld [vmem:[#allocation10 + $0x1e30] sm:$0xff] }
 0x5ef   :  { %7740 = vmatmul.mubr.bf16.vlgmr.msra.gmra.mrb[12].mxu1 %v10969_v11  ;;  %v9805_v41 = vcombine.high %v1581_v34, %v1585_v30 }
 0x5f0   :  { %8068 = vmatmul.mubr.bf16.vlgmr.msra.gmra.mrb[16].mxu0 %v10969_v11  ;;  %7749 = vmatpush1.bf16.msra.mxu1 %v9740_v38  ;;  %v9758_v11 = vcombine.low %v1534_v21, %v1538_v58  ;;  %v9796_v38 = vcombine.low %v1573_v25, %v1577_v24  ;;  %v9804_v21 = vcombine.low %v1581_v34, %v1585_v30  ;;  %v1651_v25 = vsub.s32 1, %v10847_v10  ;;  %v1630_v24 = vld [vmem:[#allocation10 + $0x1f98] sm:$0xff]  ;;  %v1637_v30 = vld [vmem:[#allocation10 + $0x1fd0] sm:$0xff] }
 0x5f1   :  { %7780 = vmatprep.mubr.bf16.mxu1 %v10972_v40  ;;  %8077 = vmatpush1.bf16.msra.mxu0 %v9742_v48  ;;  %v9807_v48 = vcombine.high %v1582_v33, %v1586_v36  ;;  %v9806_v58 = vcombine.low %v1582_v33, %v1586_v36  ;;  %v9855_v34 = vcombine.high %v1630_v24, %v1634_v14  ;;  %v1641_v33 = vld [vmem:[#allocation10 + $0x1ff0] sm:$0xff] }
 0x5f2   :  { %8108 = vmatprep.mubr.bf16.mxu0 %v10972_v40  ;;  %7750 = vmatprep.subr.bf16.mxu1 %v9749_v42  ;;  %v9764_v40 = vcombine.low %v1541_v54, %v1545_v37  ;;  %v1589_v42 = vld [vmem:[#allocation10 + $0x1e50] sm:$0xff]  ;;  %v1598_v54 = vld [vmem:[#allocation10 + $0x1e98] sm:$0xff]  ;;  %v1652_v36 = vrot.slane %v11022_v27, %v1651_v25 }
 0x5f3   :  { %8078 = vmatprep.subr.bf16.mxu0 %v9751_v35  ;;  %v1594_v35 = vld [vmem:[#allocation10 + $0x1e78] sm:$0xff]  ;;  %v9812_v55 = vcombine.low %v1589_v42, %v1593_v44 }
 0x5f4   :  { %7751 = vmatpush1.bf16.msra.mxu1 %v9748_v53  ;;  %v9813_v53 = vcombine.high %v1589_v42, %v1593_v44  ;;  %v1602_v37 = vld [vmem:[#allocation10 + $0x1eb8] sm:$0xff]  ;;  %v9814_v47 = vcombine.low %v1590_v60, %v1594_v35  ;;  %v9854_v42 = vcombine.low %v1630_v24, %v1634_v14  ;;  %v9861_v44 = vcombine.high %v1637_v30, %v1641_v33  ;;  %v10298_v24 = vld [vmem:[#allocation13 + $0xf8] sm:$0xff]  }
 0x5f5   :  { %8079 = vmatpush1.bf16.msra.mxu0 %v9750_v49  ;;  %7752 = vmatprep.subr.bf16.mxu1 %v9757_v51  ;;  %v9815_v49 = vcombine.high %v1590_v60, %v1594_v35  ;;  %v1597_v51 = vld [vmem:[#allocation10 + $0x1e90] sm:$0xff]  ;;  %v9822_v61 = vcombine.low %v1598_v54, %v1602_v37  ;;  %v10131_v35 = vadd.f32 %v11001_v50, %v1652_v36  ;;  %v10299_v14 = vld [vmem:[#allocation13 + $0x38] sm:$0xff]  }
 0x5f6   :  { %8080 = vmatprep.subr.bf16.mxu0 %v9759_v52  ;;  %v1601_v52 = vld [vmem:[#allocation10 + $0x1eb0] sm:$0xff] }
 0x5f7   :  { %v9820_v18 = vcombine.low %v1597_v51, %v1601_v52  ;;  %v10305_v36 = vld [vmem:[#allocation13 + $0x148] sm:$0xff]  }
 0x5f8   :  { %7753 = vmatpush1.bf16.msra.mxu1 %v9756_v57  ;;  %v9821_v57 = vcombine.high %v1597_v51, %v1601_v52  ;;  %v10270_v51 = vld [vmem:[#allocation13 + $0xc0] sm:$0xff]   ;;  %v8118_v52 = vmax.f32 %v10131_v35, 0.0  ;;  %v10313_v35 = vld [vmem:[#allocation13 + $0x158] sm:$0xff]  }
 0x5f9   :  { %8081 = vmatpush1.bf16.msra.mxu0 %v9758_v11  ;;  %7754 = vmatprep.subr.bf16.mxu1 %v9765_v56  ;;  %v9823_v11 = vcombine.high %v1598_v54, %v1602_v37  ;;  %v1605_v56 = vld [vmem:[#allocation10 + $0x1ed0] sm:$0xff]  ;;  %v10271_v37 = vld [vmem:[#allocation13] sm:$0xff]  }
 0x5fa   :  { %8082 = vmatprep.subr.bf16.mxu0 %v9767_v12  ;;  %v1609_v12 = vld [vmem:[#allocation10 + $0x1ef0] sm:$0xff]  ;;  %v8126_v50 = vpack.c.bf16 %v8118_v52, %v8118_v52  ;;  %v10319_v52 = vld [vmem:[#allocation13 + $0x120] sm:$0xff]  }
 0x5fb   :  { %v9828_v5 = vcombine.low %v1605_v56, %v1609_v12 }
 0x5fc   :  { %7755 = vmatpush1.bf16.msra.mxu1 %v9764_v40  ;;  %v9829_v40 = vcombine.high %v1605_v56, %v1609_v12  ;;  %v10276_v56 = vld [vmem:[#allocation13 + $0x88] sm:$0xff]   ;;  %v10277_v12 = vld [vmem:[#allocation13 + $0x50] sm:$0xff]  }
 0x5fd   :  { %8083 = vmatpush1.bf16.msra.mxu0 %v9766_v62  ;;  %7756 = vmatprep.subr.bf16.mxu1 %v9773_v63  ;;  %v9831_v62 = vcombine.high %v1606_v59, %v1610_v43  ;;  %v1613_v63 = vld [vmem:[#allocation10 + $0x1f10] sm:$0xff]  ;;  %v10278_v59 = vld [vmem:[#allocation13 + $0xd0] sm:$0xff]  }
 0x5fe   :  { %8084 = vmatprep.subr.bf16.mxu0 %v9775_v1  ;;  %v1617_v1 = vld [vmem:[#allocation10 + $0x1f30] sm:$0xff]  ;;  %v10279_v43 = vld [vmem:[#allocation13 + $0x10] sm:$0xff]  }
 0x5ff   :  { %v9836_v31 = vcombine.low %v1613_v63, %v1617_v1 }
 0x600   :  { %7757 = vmatpush1.bf16.msra.mxu1 %v9772_v8  ;;  %v9837_v8 = vcombine.high %v1613_v63, %v1617_v1  ;;  %v10285_v63 = vld [vmem:[#allocation13 + $0x60] sm:$0xff]  }
 0x601   :  { %8085 = vmatpush1.bf16.msra.mxu0 %v9774_v9  ;;  %7758 = vmatprep.subr.bf16.mxu1 %v9781_v15  ;;  %v9839_v9 = vcombine.high %v1614_v2, %v1618_v3  ;;  %v1621_v15 = vld [vmem:[#allocation10 + $0x1f50] sm:$0xff]  ;;  %v10286_v1 = vld [vmem:[#allocation13 + $0xe0] sm:$0xff]   ;;  %v1647_v3 = vsub.s32 0, %v10847_v10 }
 0x602   :  { %8086 = vmatprep.subr.bf16.mxu0 %v9783_v6  ;;  %v1625_v6 = vld [vmem:[#allocation10 + $0x1f70] sm:$0xff]  ;;  %v10287_v2 = vld [vmem:[#allocation13 + $0x20] sm:$0xff]  }
 0x604   :  { %7759 = vmatpush1.bf16.msra.mxu1 %v9780_v20  ;;  %v9845_v20 = vcombine.high %v1621_v15, %v1625_v6 }
 0x605   :  { %8087 = vmatpush1.bf16.msra.mxu0 %v9782_v26  ;;  %7760 = vmatprep.subr.bf16.mxu1 %v9789_v23  ;;  %v9847_v26 = vcombine.high %v1622_v22, %v1626_v19  ;;  %v1629_v23 = vld [vmem:[#allocation10 + $0x1f90] sm:$0xff] }
 0x606   :  { %8088 = vmatprep.subr.bf16.mxu0 %v9791_v13  ;;  %v1633_v13 = vld [vmem:[#allocation10 + $0x1fb0] sm:$0xff] }
 0x608   :  { %7761 = vmatpush1.bf16.msra.mxu1 %v9788_v28  ;;  %v1659_v28 = vsub.s32 3, %v10847_v10 }
 0x609   :  { %8089 = vmatpush1.bf16.msra.mxu0 %v9790_v0  ;;  %7762 = vmatprep.subr.bf16.mxu1 %v9797_v29  ;;  %v9844_v0 = vcombine.low %v1621_v15, %v1625_v6  ;;  %v9846_v29 = vcombine.low %v1622_v22, %v1626_v19  ;;  %v10291_v15 = vld [vmem:[#allocation13 + $0x28] sm:$0xff]   ;;  %v1648_v6 = vrot.slane %v11022_v27, %v1647_v3  ;;  %v10293_v19 = vld [vmem:[#allocation13 + $0x70] sm:$0xff]  }
 0x60a   :  { %8090 = vmatprep.subr.bf16.mxu0 %v9799_v32  ;;  %v9853_v32 = vcombine.high %v1629_v23, %v1633_v13  ;;  %v10292_v22 = vld [vmem:[#allocation13 + $0xa8] sm:$0xff]  }
 0x60c   :  { %7763 = vmatpush1.bf16.msra.mxu1 %v9796_v38  ;;  %v1638_v38 = vld [vmem:[#allocation10 + $0x1fd8] sm:$0xff] }
 0x60d   :  { %8091 = vmatpush1.bf16.msra.mxu0 %v9798_v39  ;;  %7764 = vmatprep.subr.bf16.mxu1 %v9805_v41  ;;  %v1642_v39 = vld [vmem:[#allocation10 + $0x1ff8] sm:$0xff]  ;;  %v1660_v41 = vrot.slane %v11022_v27, %v1659_v28 }
 0x60e   :  { %8092 = vmatprep.subr.bf16.mxu0 %v9807_v48  ;;  %v9852_v48 = vcombine.low %v1629_v23, %v1633_v13  ;;  %v9863_v60 = vcombine.high %v1638_v38, %v1642_v39  ;;  %v10296_v23 = vld [vmem:[#allocation13 + $0xb0] sm:$0xff]   ;;  %v10297_v13 = vld [vmem:[#allocation13 + $0x78] sm:$0xff]  }
 0x610   :  { %7765 = vmatpush1.bf16.msra.mxu1 %v9804_v21  ;;  %v10133_v21 = vadd.f32 %v11003_v16, %v1660_v41  ;;  %v10274_v16 = vld [vmem:[#allocation13 + $0xc8] sm:$0xff]  }
 0x611   :  { %8093 = vmatpush1.bf16.msra.mxu0 %v9806_v58  ;;  %7766 = vmatprep.subr.bf16.mxu1 %v9813_v53  ;;  %v9860_v58 = vcombine.low %v1637_v30, %v1641_v33  ;;  %v9862_v53 = vcombine.low %v1638_v38, %v1642_v39  ;;  %v10304_v33 = vld [vmem:[#allocation13 + $0x180] sm:$0xff]   ;;  %v10306_v38 = vld [vmem:[#allocation13 + $0x1c8] sm:$0xff]  }
 0x612   :  { %8094 = vmatprep.subr.bf16.mxu0 %v9815_v49  ;;  %v10269_v49 = vld [vmem:[#allocation13 + $0x40] sm:$0xff]   ;;  %v8120_v54 = vmax.f32 %v10133_v21, 0.0  ;;  %v10307_v39 = vld [vmem:[#allocation13 + $0x108] sm:$0xff]   ;;  %v10314_v21 = vld [vmem:[#allocation13 + $0x1d8] sm:$0xff]  }
 0x613   :  { %v10308_v41 = vld [vmem:[#allocation13 + $0x188] sm:$0xff]  }
 0x614   :  { %7767 = vmatpush1.bf16.msra.mxu1 %v9812_v55  ;;  %v10272_v55 = vld [vmem:[#allocation13 + $0x80] sm:$0xff]  }
 0x615   :  { %8095 = vmatpush1.bf16.msra.mxu0 %v9814_v47  ;;  %7768 = vmatprep.subr.bf16.mxu1 %v9821_v57  ;;  %v10273_v47 = vld [vmem:[#allocation13 + $0x48] sm:$0xff]   ;;  %v8128_v57 = vpack.c.bf16 %v8120_v54, %v8120_v54  ;;  %v10320_v54 = vld [vmem:[#allocation13 + $0x1a0] sm:$0xff]  }
 0x616   :  { %8096 = vmatprep.subr.bf16.mxu0 %v9823_v11  ;;  %v10275_v11 = vld [vmem:[#allocation13 + $0x8] sm:$0xff]  }
 0x618   :  { %7769 = vmatpush1.bf16.msra.mxu1 %v9820_v18  ;;  %v10280_v18 = vld [vmem:[#allocation13 + $0x90] sm:$0xff]  }
 0x619   :  { %8097 = vmatpush1.bf16.msra.mxu0 %v9822_v61  ;;  %7770 = vmatprep.subr.bf16.mxu1 %v9829_v40  ;;  %v10281_v61 = vld [vmem:[#allocation13 + $0x58] sm:$0xff]  }
 0x61a   :  { %8098 = vmatprep.subr.bf16.mxu0 %v9831_v62  ;;  %v10282_v40 = vld [vmem:[#allocation13 + $0xd8] sm:$0xff]  }
 0x61b   :  { %v10284_v62 = vld [vmem:[#allocation13 + $0x98] sm:$0xff]  }
 0x61c   :  { %7771 = vmatpush1.bf16.msra.mxu1 %v9828_v5  ;;  %v10288_v5 = vld [vmem:[#allocation13 + $0xa0] sm:$0xff]  }
 0x61d   :  { %8099 = vmatpush1.bf16.msra.mxu0 %v9830_v7  ;;  %7772 = vmatprep.subr.bf16.mxu1 %v9837_v8  ;;  %v10289_v7 = vld [vmem:[#allocation13 + $0x68] sm:$0xff]   ;;  %v1655_v8 = vsub.s32 2, %v10847_v10 }
 0x61e   :  { %8100 = vmatprep.subr.bf16.mxu0 %v9839_v9  ;;  %v10290_v9 = vld [vmem:[#allocation13 + $0xe8] sm:$0xff]  }
 0x620   :  { %7773 = vmatpush1.bf16.msra.mxu1 %v9836_v31  ;;  %v1656_v31 = vrot.slane %v11022_v27, %v1655_v8 }
 0x621   :  { %8101 = vmatpush1.bf16.msra.mxu0 %v9838_v4  ;;  %7774 = vmatprep.subr.bf16.mxu1 %v9845_v20  ;;  %v10294_v4 = vld [vmem:[#allocation13 + $0xf0] sm:$0xff]  }
 0x622   :  { %8102 = vmatprep.subr.bf16.mxu0 %v9847_v26  ;;  %v10295_v20 = vld [vmem:[#allocation13 + $0x30] sm:$0xff]   ;;  %v10130_v26 = vadd.f32 %v10997_v46, %v1648_v6  ;;  %v10132_v25 = vadd.f32 %v10999_v45, %v1656_v31  ;;  %v10303_v46 = vld [vmem:[#allocation13 + $0x100] sm:$0xff]  }
 0x624   :  { %7775 = vmatpush1.bf16.msra.mxu1 %v9844_v0  ;;  %v8117_v28 = vmax.f32 %v10130_v26, 0.0  ;;  %v10300_v0 = vld [vmem:[#allocation13 + $0xb8] sm:$0xff]  }
 0x625   :  { %8103 = vmatpush1.bf16.msra.mxu0 %v9846_v29  ;;  %7776 = vmatprep.subr.bf16.mxu1 %v9853_v32  ;;  %v10301_v29 = vld [vmem:[#allocation13 + $0x140] sm:$0xff]   ;;  %v8119_v32 = vmax.f32 %v10132_v25, 0.0 }
 0x626   :  { %8104 = vmatprep.subr.bf16.mxu0 %v9855_v34  ;;  %v10302_v34 = vld [vmem:[#allocation13 + $0x1c0] sm:$0xff]   ;;  %v8125_v30 = vpack.c.bf16 %v8117_v28, %v8117_v28 }
 0x627   :  { %v8127_v45 = vpack.c.bf16 %v8119_v32, %v8119_v32  ;;  %v9864_v32 = vld [vmem:[#allocation15] ss:$0 sm:$0xff] }
 0x628   :  { %7777 = vmatpush1.bf16.msra.mxu1 %v9852_v48  ;;  %v10309_v48 = vld [vmem:[#allocation13 + $0x150] sm:$0xff]  }
 0x629   :  { %8105 = vmatpush1.bf16.msra.mxu0 %v9854_v42  ;;  %7778 = vmatprep.subr.bf16.mxu1 %v9861_v44  ;;  %v10310_v42 = vld [vmem:[#allocation13 + $0x1d0] sm:$0xff]  }
 0x62a   :  { %8106 = vmatprep.subr.bf16.mxu0 %v9863_v60  ;;  %v10311_v44 = vld [vmem:[#allocation13 + $0x110] sm:$0xff]  }
 0x62b   :  { %v10312_v60 = vld [vmem:[#allocation13 + $0x190] sm:$0xff]  }
 0x62c   :  { %7779 = vmatpush1.bf16.msra.mxu1 %v9860_v58  ;;  %v10315_v58 = vld [vmem:[#allocation13 + $0x118] sm:$0xff]  }
 0x62d   :  { %8107 = vmatpush1.bf16.msra.mxu0 %v9862_v53  ;;  %9978 = vmatprep.subr.bf16.mxu1 %v10269_v49  ;;  %v10316_v53 = vld [vmem:[#allocation13 + $0x198] sm:$0xff]   ;;  %v10317_v49 = vld [vmem:[#allocation13 + $0x160] sm:$0xff]  }
 0x62e   :  { %10000 = vmatprep.subr.bf16.mxu0 %v10270_v51  ;;  %v10318_v51 = vld [vmem:[#allocation13 + $0x1e0] sm:$0xff]  }
 0x62f   :  { %7781 = vmatmul.mubr.bf16.vlgmr.msra.gmra.mrb[12].mxu1 %v10979_v17 }
 0x630   :  { %8109 = vmatmul.mubr.bf16.vlgmr.msra.gmra.mrb[16].mxu0 %v10979_v17  ;;  %9979 = vmatpush3.bf16.msra.mxu1 %v10271_v37  ;;  %v10283_v17 = vld [vmem:[#allocation13 + $0x18] sm:$0xff]   ;;  %v10321_v37 = vld [vmem:[#allocation13 + $0x168] sm:$0xff]  }
 0x631   :  { %8684 = vmatprep.mubr.bf16.mxu1 %v8126_v50  ;;  %10001 = vmatpush3.bf16.msra.mxu0 %v10272_v55  ;;  %v10322_v55 = vld [vmem:[#allocation13 + $0x1e8] sm:$0xff]  }
 0x632   :  { %8724 = vmatprep.mubr.bf16.mxu0 %v8128_v57  ;;  %9980 = vmatprep.subr.bf16.mxu1 %v10273_v47  ;;  %v10323_v47 = vld [vmem:[#allocation13 + $0x128] sm:$0xff]   ;;  %v10326_v57 = vld [vmem:[#allocation13 + $0x1f0] sm:$0xff]  }
 0x633   :  { %10002 = vmatprep.subr.bf16.mxu0 %v10274_v16  ;;  %v10324_v50 = vld [vmem:[#allocation13 + $0x1a8] sm:$0xff]   ;;  %v10325_v16 = vld [vmem:[#allocation13 + $0x170] sm:$0xff]  }
 0x634   :  { %9981 = vmatpush3.bf16.msra.mxu1 %v10275_v11  ;;  %v10327_v11 = vld [vmem:[#allocation13 + $0x130] sm:$0xff]  }
 0x635   :  { %10003 = vmatpush3.bf16.msra.mxu0 %v10276_v56  ;;  %9982 = vmatprep.subr.bf16.mxu1 %v10277_v12  ;;  %v10328_v56 = vld [vmem:[#allocation13 + $0x1b0] sm:$0xff]   ;;  %v10329_v12 = vld [vmem:[#allocation13 + $0x178] sm:$0xff]  }
 0x636   :  { %10004 = vmatprep.subr.bf16.mxu0 %v10278_v59  ;;  %v10330_v59 = vld [vmem:[#allocation13 + $0x1f8] sm:$0xff]  }
 0x638   :  { %9983 = vmatpush3.bf16.msra.mxu1 %v10279_v43  ;;  %v10331_v43 = vld [vmem:[#allocation13 + $0x138] sm:$0xff]  }
 0x639   :  { %10005 = vmatpush3.bf16.msra.mxu0 %v10280_v18  ;;  %9984 = vmatprep.subr.bf16.mxu1 %v10281_v61  ;;  %v10332_v18 = vld [vmem:[#allocation13 + $0x1b8] sm:$0xff]   ;;  %v1663_v61 = vsub.s32 4, %v10847_v10 }
 0x63a   :  { %10006 = vmatprep.subr.bf16.mxu0 %v10282_v40  ;;  %v1671_v40 = vsub.s32 6, %v10847_v10 }
 0x63c   :  { %9985 = vmatpush3.bf16.msra.mxu1 %v10283_v17  ;;  %v1667_v17 = vsub.s32 5, %v10847_v10 }
 0x63d   :  { %10007 = vmatpush3.bf16.msra.mxu0 %v10284_v62  ;;  %9986 = vmatprep.subr.bf16.mxu1 %v10285_v63  ;;  %v1675_v62 = vsub.s32 7, %v10847_v10  ;;  %v1664_v63 = vrot.slane %v11022_v27, %v1663_v61 }
 0x63e   :  { %10008 = vmatprep.subr.bf16.mxu0 %v10286_v1  ;;  %v1672_v1 = vrot.slane %v11022_v27, %v1671_v40 }
 0x63f   :  { %v1676_v3 = vrot.slane %v11022_v27, %v1675_v62 }
 0x640   :  { %9987 = vmatpush3.bf16.msra.mxu1 %v10287_v2  ;;  %v1668_v2 = vrot.slane %v11022_v27, %v1667_v17 }
 0x641   :  { %10009 = vmatpush3.bf16.msra.mxu0 %v10288_v5  ;;  %9988 = vmatprep.subr.bf16.mxu1 %v10289_v7 }
 0x642   :  { %10010 = vmatprep.subr.bf16.mxu0 %v10290_v9 }
 0x644   :  { %9989 = vmatpush3.bf16.msra.mxu1 %v10291_v15 }
 0x645   :  { %10011 = vmatpush3.bf16.msra.mxu0 %v10292_v22  ;;  %9990 = vmatprep.subr.bf16.mxu1 %v10293_v19 }
 0x646   :  { %10012 = vmatprep.subr.bf16.mxu0 %v10294_v4 }
 0x648   :  { %9991 = vmatpush3.bf16.msra.mxu1 %v10295_v20 }
 0x649   :  { %10013 = vmatpush3.bf16.msra.mxu0 %v10296_v23  ;;  %9992 = vmatprep.subr.bf16.mxu1 %v10297_v13 }
 0x64a   :  { %10014 = vmatprep.subr.bf16.mxu0 %v10298_v24 }
 0x64c   :  { %9993 = vmatpush3.bf16.msra.mxu1 %v10299_v14 }
 0x64d   :  { %10015 = vmatpush3.bf16.msra.mxu0 %v10300_v0  ;;  %10022 = vmatprep.subr.bf16.mxu1 %v10301_v29 }
 0x64e   :  { %10044 = vmatprep.subr.bf16.mxu0 %v10302_v34 }
 0x64f   :  { %8685 = vmatmul.mubr.bf16.vlgmr.msra.gmra.mrb[16].mxu1 %v8125_v30 }
 0x650   :  { %8725 = vmatmul.mubr.bf16.vlgmr.msra.gmra.mrb[20].mxu0 %v8127_v45  ;;  %10023 = vmatpush3.bf16.msra.mxu1 %v10303_v46 }
 0x651   :  { %10045 = vmatpush3.bf16.msra.mxu0 %v10304_v33  ;;  %10024 = vmatprep.subr.bf16.mxu1 %v10305_v36 }
 0x652   :  { %10046 = vmatprep.subr.bf16.mxu0 %v10306_v38 }
 0x654   :  { %10025 = vmatpush3.bf16.msra.mxu1 %v10307_v39 }
 0x655   :  { %10047 = vmatpush3.bf16.msra.mxu0 %v10308_v41  ;;  %10026 = vmatprep.subr.bf16.mxu1 %v10309_v48 }
 0x656   :  { %10048 = vmatprep.subr.bf16.mxu0 %v10310_v42 }
 0x658   :  { %10027 = vmatpush3.bf16.msra.mxu1 %v10311_v44 }
 0x659   :  { %10049 = vmatpush3.bf16.msra.mxu0 %v10312_v60  ;;  %10028 = vmatprep.subr.bf16.mxu1 %v10313_v35 }
 0x65a   :  { %10050 = vmatprep.subr.bf16.mxu0 %v10314_v21 }
 0x65c   :  { %10029 = vmatpush3.bf16.msra.mxu1 %v10315_v58 }
 0x65d   :  { %10051 = vmatpush3.bf16.msra.mxu0 %v10316_v53  ;;  %10030 = vmatprep.subr.bf16.mxu1 %v10317_v49 }
 0x65e   :  { %10052 = vmatprep.subr.bf16.mxu0 %v10318_v51 }
 0x660   :  { %10031 = vmatpush3.bf16.msra.mxu1 %v10319_v52 }
 0x661   :  { %10053 = vmatpush3.bf16.msra.mxu0 %v10320_v54  ;;  %10032 = vmatprep.subr.bf16.mxu1 %v10321_v37 }
 0x662   :  { %10054 = vmatprep.subr.bf16.mxu0 %v10322_v55 }
 0x664   :  { %10033 = vmatpush3.bf16.msra.mxu1 %v10323_v47 }
 0x665   :  { %10055 = vmatpush3.bf16.msra.mxu0 %v10324_v50  ;;  %10034 = vmatprep.subr.bf16.mxu1 %v10325_v16 }
 0x666   :  { %10056 = vmatprep.subr.bf16.mxu0 %v10326_v57 }
 0x668   :  { %10035 = vmatpush3.bf16.msra.mxu1 %v10327_v11 }
 0x669   :  { %10057 = vmatpush3.bf16.msra.mxu0 %v10328_v56  ;;  %10036 = vmatprep.subr.bf16.mxu1 %v10329_v12 }
 0x66a   :  { %10058 = vmatprep.subr.bf16.mxu0 %v10330_v59 }
 0x66c   :  { %10037 = vmatpush3.bf16.msra.mxu1 %v10331_v43 }
 0x66d   :  { %10059 = vmatpush3.bf16.msra.mxu0 %v10332_v18 }
 0x702   :  { %v7782_v5 = vpop.f32.mrb[12].mxu1 }
 0x703   :  { %v10134_v7 = vadd.f32 %v7782_v5, %v1664_v63  ;;  %v8110_v8 = vpop.f32.mrb[16].mxu0  ;;  %v7784_v9 = vpop.f32.mrb[13].mxu1 }
 0x704   :  { %v10136_v15 = vadd.f32 %v8110_v8, %v1672_v1  ;;  %v10135_v6 = vadd.f32 %v7784_v9, %v1668_v2  ;;  %v8112_v22 = vpop.f32.mrb[17].mxu0  ;;  %v7786_v19 = vpop.f32.mrb[14].mxu1 }
 0x705   :  { %v8121_v31 = vmax.f32 %v10134_v7, 0.0  ;;  %v10137_v4 = vadd.f32 %v8112_v22, %v1676_v3  ;;  %v8114_v20 = vpop.f32.mrb[18].mxu0  ;;  %v7787_v10 = vpop.f32.mrb[15].mxu1 }
 0x706   :  { %v8123_v26 = vmax.f32 %v10136_v15, 0.0  ;;  %v8122_v23 = vmax.f32 %v10135_v6, 0.0  ;;  %v8115_v13 = vpop.f32.mrb[19].mxu0 }
 0x707   :  { %v8124_v25 = vmax.f32 %v10137_v4, 0.0  ;;  %v8129_v14 = vpack.c.bf16 %v8121_v31, %v8121_v31 }
 0x708   :  { %v8130_v24 = vpack.c.bf16 %v8122_v23, %v8122_v23  ;;  %v8131_v27 = vpack.c.bf16 %v8123_v26, %v8123_v26 }
 0x709   :  { %v8132_v28 = vpack.c.bf16 %v8124_v25, %v8124_v25 }
 0x70a   :  { %8764 = vmatprep.mubr.bf16.mxu1 %v8130_v24 }
 0x70b   :  { %8804 = vmatprep.mubr.bf16.mxu0 %v8132_v28  ;;  %8765 = vmatmul.mubr.bf16.vlgmr.msra.gmra.mrb[20].mxu1 %v8129_v14 }
 0x70c   :  { %8805 = vmatmul.mubr.bf16.vlgmr.msra.gmra.mrb[24].mxu0 %v8131_v27 }
 0x722   :  { %v9994_v0 = vpop.f32.mrb[16].mxu1 }
 0x723   :  { %v10016_v29 = vpop.f32.mrb[20].mxu0  ;;  %v9995_v34 = vpop.f32.mrb[17].mxu1 }
 0x724   :  { %v9996_v46 = vadd.f32 %v9995_v34, %v9994_v0  ;;  %v10017_v30 = vpop.f32.mrb[21].mxu0  ;;  %v9997_v33 = vpop.f32.mrb[18].mxu1 }
 0x725   :  { %v10018_v36 = vadd.f32 %v10017_v30, %v10016_v29  ;;  %v10019_v45 = vpop.f32.mrb[22].mxu0  ;;  %v9998_v38 = vpop.f32.mrb[19].mxu1 }
 0x726   :  { %v8687_v39 = vadd.f32 %v9996_v46, %v9864_v32  ;;  %v10020_v41 = vpop.f32.mrb[23].mxu0 }
 0x728   :  { %v8727_v48 = vadd.f32 %v10018_v36, %v8687_v39 }
 0x7de   :  { %v10038_v42 = vpop.f32.mrb[20].mxu1 }
 0x7df   :  { %v10060_v44 = vpop.f32.mrb[24].mxu0  ;;  %v10039_v60 = vpop.f32.mrb[21].mxu1 }
 0x7e0   :  { %v10040_v35 = vadd.f32 %v10039_v60, %v10038_v42  ;;  %v10061_v21 = vpop.f32.mrb[25].mxu0  ;;  %v10041_v58 = vpop.f32.mrb[22].mxu1 }
 0x7e1   :  { %v10062_v53 = vadd.f32 %v10061_v21, %v10060_v44  ;;  %v10063_v49 = vpop.f32.mrb[26].mxu0  ;;  %v10042_v51 = vpop.f32.mrb[23].mxu1 }
 0x7e2   :  { %v8767_v52 = vadd.f32 %v10040_v35, %v8727_v48  ;;  %v10064_v54 = vpop.f32.mrb[27].mxu0 }
 0x7e4   :  { %v8807_v37 = vadd.f32 %v10062_v53, %v8767_v52 }
 0x7e6   :  { %8812 = vst [vmem:[#allocation16] sm:$0x3] %v8807_v37 }
 0x7e7   :  { %10498 = shalt.err (!%p10495_p4)
}
 0x7e8   :  { %s10499_s3 = scalar_lea.hbm %s11065_s8, 32 }
 0x7e9   :  { %p10500_p5 = scmp.ne.s32.totalorder %s11065_s8, %s10499_s3  ;;  %p10503_p6 = scmp.lt.u32.totalorder %s10499_s3, %s11065_s8 }
 0x7eb   :  { %p10505_p7 = pnand %p10503_p6, %p10500_p5 }
 0x7ed   :  { %10508 = shalt.err (!%p10505_p7)
}
 0x7ee   :  { %8822 = dma.vmem_to_hbm [thread:$0]  %s8820_s30, 32, %s11065_s8, [#allocation6]  }
 0x7ef   :  { %10517 = dma.done.wait [#allocation6], 32  }
 0x7f0   :  { %10518 = vsyncadd [#allocation6], 4294967264 }
 0x7f1   :  { %8826 = vsyncpa [#allocation5], 1 }
 0x7f2   :  { %8827 = vsyncpa [#allocation8], 1 }
 0x7f3   :  { %8828 = vsyncpa [#allocation11], 1 }
 0x7f4   :  { %8829 = vsyncpa [#allocation14], 1 }
 0x7f5   :  { %8830 = vsyncpa [#allocation6], 1 }

</bundles_post_ra>
